<compile_context>
chip_gen: v7x
topology: tpu7x:2x2x1
jax: 0.10.0
libtpu: 0.0.40
codegen_flags: <defaults>
</compile_context>

<pallas_src>
import jax
import jax.numpy as jnp
from jax.experimental import pallas as pl
from jax.experimental.pallas import tpu as pltpu

BATCH = 4                     # module-level `batch`
PATCH = 6
STRIDE = 5
NPATCH = PATCH * PATCH        # 36 patches / 36-dim flattened patch
EMBED = 50                    # args.embed_dim (implied by bias (1,36,50) and fc(36*50,10))
ROWS = BATCH * NPATCH         # 144 = batch folded into the MXU M dimension
FC_IN = NPATCH * EMBED        # 1800
FC_OUT = 10
EPS = 1e-8


# ----------------------------- glue (plain JAX) -----------------------------
def _image2matrix(x, patch=PATCH, stride=STRIDE):
    """JAX port of image2matrix(patch=6, stride=5): (b,1,28,28) -> (b,36,36)."""
    b = x.shape[0]
    xp = jnp.pad(x, ((0, 0), (0, 0), (1, 2), (1, 2)))          # ZeroPad2d(1,2,1,2)
    rows = []
    for i in range(patch):
        for j in range(patch):
            rows.append(
                xp[:, 0,
                   stride * i:stride * i + patch,
                   stride * j:stride * j + patch].reshape(b, patch * patch))
    return jnp.stack(rows, axis=1)                              # out[:, 6*i+j, :]


# ------------------------------ fused Pallas kernel --------------------------
def _cnn_fc_kernel(x_ref, wt_ref, wm_ref, bias_ref, wcat_ref, rmat_ref, msel_ref,
                   bfc_ref, xfc_ref, out_ref):
    """ocnn optical FC (+bias, +ReLU) and nn.Linear(1800, 10), fully fused.

    Per-sample the reference computes  y = |x @ |W|^T| / max|x @ |W|^T| * (im * wm)
    (the norm_matrix_channel divides cancel algebraically; the zero padding to
    (50,50) contributes only zero rows/cols, so we contract over the 36-dim axis).
    """
    xin = x_ref[...]                                  # (144, 36) patch rows (4 samples x 36)
    wt = wt_ref[...]                                  # (36, 50) == |W|^T
    wm = wm_ref[0, 0]                                 # weight_max (hoisted, SMEM scalar)

    # Optical product: one MXU matmul with batch folded into M (M=144).
    prod = jnp.dot(xin, wt, preferred_element_type=jnp.float32)   # (144, 50)
    a = jnp.abs(prod)                                 # torch.abs(matrix_C / amplitude)

    # Per-row sample id (no vector integer div: sum of compares).
    r_col = jax.lax.broadcasted_iota(jnp.int32, (ROWS, 1), 0)     # (144, 1)
    grp = jnp.zeros((ROWS, 1), jnp.int32)
    for b in range(1, BATCH):
        grp = grp + (r_col >= b * NPATCH).astype(jnp.int32)       # r // 36
    rmod = r_col - NPATCH * grp                                   # r %  36

    # Per-sample maxima (a >= 0, and input_max is taken over the zero-padded
    # (50,50) input in the reference, hence the implicit clamp at 0 via the
    # 0.0 fill), broadcast back to per-row columns.
    pm_col = jnp.zeros((ROWS, 1), jnp.float32)
    im_col = jnp.zeros((ROWS, 1), jnp.float32)
    for b in range(BATCH):
        sel = grp == b                                # (144, 1) group mask
        pm_b = jnp.max(jnp.where(sel, a, 0.0))        # max |prod| of sample b
        im_b = jnp.max(jnp.where(sel, xin, 0.0))      # max(input, 0) of sample b
        pm_col = jnp.where(sel, pm_b, pm_col)
        im_col = jnp.where(sel, im_b, im_col)

    # res/max(res) * (input_max*weight_max) as one multiply + EUP reciprocal.
    scale = (im_col * wm) * pl.reciprocal(pm_col + EPS, approx=True)
    y = jnp.maximum(a * scale + bias_ref[...], 0.0)               # bias + ReLU, (144, 50)

    # x_fc: single contiguous dense store; (144,50) -> (B,1,1800) is a free
    # row-major reshape in the wrapper.
    xfc_ref[...] = y

    # fc = nn.Linear(1800, 10), fed from registers (no store->load round trip).
    # Block-diagonal contraction over (patch i, embed c) done with dense 2D matmuls:
    #   H[r, i*10+o]   = sum_c y[r,c] * Wfc[o, i*50+c]
    #   keep only i == r%36, sum the 10-wide blocks (R), then group-sum rows (Msel).
    H = jnp.dot(y, wcat_ref[...], preferred_element_type=jnp.float32)       # (144, 360)
    j_idx = jax.lax.broadcasted_iota(jnp.int32, (ROWS, NPATCH * FC_OUT), 1)
    jlow = FC_OUT * rmod                                                    # (144, 1)
    keep = jnp.logical_and(j_idx >= jlow, j_idx < jlow + FC_OUT)
    Hm = jnp.where(keep, H, 0.0)
    rows_out = jnp.dot(Hm, rmat_ref[...], preferred_element_type=jnp.float32)   # (144, 10)
    out_ref[...] = (jnp.dot(msel_ref[...], rows_out,
                            preferred_element_type=jnp.float32)
                    + bfc_ref[...])                                          # (4, 10)


def _cnn_fc_pallas(patches2d, w_abs_t, wm, bias_tiled, wcat, rmat, msel, bfc_row):
    vmem = pl.BlockSpec(memory_space=pltpu.MemorySpace.VMEM)
    smem = pl.BlockSpec(memory_space=pltpu.MemorySpace.SMEM)
    return pl.pallas_call(
        _cnn_fc_kernel,
        out_shape=(jax.ShapeDtypeStruct((ROWS, EMBED), jnp.float32),    # x_fc slab
                   jax.ShapeDtypeStruct((BATCH, FC_OUT), jnp.float32)), # logits
        in_specs=[vmem, vmem, smem, vmem, vmem, vmem, vmem, vmem],
        out_specs=(vmem, vmem),
    )(patches2d, w_abs_t, wm, bias_tiled, wcat, rmat, msel, bfc_row)


# --------------------------------- forward ----------------------------------
def cnn_fc_forward(x, params):
    """Returns (x, x_cnn, x_fc) exactly like cnn_fc.forward."""
    W, bias, Wfc, bfc = params

    x = x + jnp.ones((1, 28, 28), jnp.float32)                  # x + torch.ones(1,28,28)
    patches = _image2matrix(x)                                   # (B, 36, 36) == x_cnn
    patches2d = patches.reshape(ROWS, NPATCH)                    # free row-major reshape

    # Parameter prep (tiny, fuses in XLA; constant-foldable for fixed params).
    w_abs_t = jnp.abs(W).T                                       # (36, 50)
    wm = jnp.max(jnp.abs(W)).reshape(1, 1)                       # weight_max, hoisted
    bias_tiled = jnp.tile(bias[0], (BATCH, 1))                   # (144, 50)
    wcat = (Wfc.reshape(FC_OUT, NPATCH, EMBED)
            .transpose(2, 1, 0).reshape(EMBED, NPATCH * FC_OUT)) # (50, 360)
    rmat = jnp.tile(jnp.eye(FC_OUT, dtype=jnp.float32), (NPATCH, 1))        # (360, 10)
    msel = (jnp.arange(ROWS, dtype=jnp.int32)[None, :] // NPATCH
            == jnp.arange(BATCH, dtype=jnp.int32)[:, None]).astype(jnp.float32)  # (4, 144)
    bfc_row = bfc.reshape(1, FC_OUT)

    x_fc_2d, logits = _cnn_fc_pallas(patches2d, w_abs_t, wm, bias_tiled,
                                     wcat, rmat, msel, bfc_row)
    x_fc = x_fc_2d.reshape(BATCH, 1, FC_IN)                      # (B, 1, 1800), free reshape
    return logits, patches, x_fc


# ----------------------------------- main ------------------------------------
if __name__ == "__main__":
    key = jax.random.PRNGKey(0)
    k_x, k_w, k_fcw, k_fcb = jax.random.split(key, 4)

    x = jax.random.normal(k_x, (BATCH, 1, 28, 28), jnp.float32)

    # ocnn parameters: weight (embed_dim, 36) ~ trunc_normal(std=0.1), bias zeros
    W = 0.1 * jax.random.truncated_normal(k_w, -2.0, 2.0, (EMBED, NPATCH),
                                          jnp.float32)
    bias = jnp.zeros((1, NPATCH, EMBED), jnp.float32)

    # fc = nn.Linear(1800, 10): torch-default-scale uniform init
    bound = 1.0 / (FC_IN ** 0.5)
    Wfc = jax.random.uniform(k_fcw, (FC_OUT, FC_IN), jnp.float32, -bound, bound)
    bfc = jax.random.uniform(k_fcb, (FC_OUT,), jnp.float32, -bound, bound)

    fwd = jax.jit(cnn_fc_forward)
    logits, x_cnn, x_fc = fwd(x, (W, bias, Wfc, bfc))
    jax.block_until_ready((logits, x_cnn, x_fc))

    assert logits.shape == (BATCH, FC_OUT)
    assert x_cnn.shape == (BATCH, NPATCH, NPATCH)
    assert x_fc.shape == (BATCH, 1, FC_IN)
    print("KERNEL_OK")
</pallas_src>

<mosaic_0001>
module attributes {stable_mosaic.version = 11 : i64} {
  func.func @_cnn_fc_kernel(%arg0: memref<144x36xf32, #tpu.memory_space<vmem>>, %arg1: memref<36x50xf32, #tpu.memory_space<vmem>>, %arg2: memref<1x1xf32, #tpu.memory_space<smem>>, %arg3: memref<144x50xf32, #tpu.memory_space<vmem>>, %arg4: memref<50x360xf32, #tpu.memory_space<vmem>>, %arg5: memref<360x10xf32, #tpu.memory_space<vmem>>, %arg6: memref<4x144xf32, #tpu.memory_space<vmem>>, %arg7: memref<1x10xf32, #tpu.memory_space<vmem>>, %arg8: memref<144x50xf32, #tpu.memory_space<vmem>>, %arg9: memref<4x10xf32, #tpu.memory_space<vmem>>) attributes {dimension_semantics = [], scalar_prefetch = 0 : i64, scratch_operands = 0 : i64, tpu.core_type = #tpu.core_type<tc>} {
    %c0 = arith.constant 0 : index
    %c0_0 = arith.constant 0 : index
    %0 = vector.load %arg0[%c0, %c0_0] : memref<144x36xf32, #tpu.memory_space<vmem>>, vector<144x36xf32>
    %c0_1 = arith.constant 0 : index
    %c0_2 = arith.constant 0 : index
    %1 = vector.load %arg1[%c0_1, %c0_2] : memref<36x50xf32, #tpu.memory_space<vmem>>, vector<36x50xf32>
    %c0_3 = arith.constant 0 : index
    %c0_4 = arith.constant 0 : index
    %2 = memref.load %arg2[%c0_3, %c0_4] : memref<1x1xf32, #tpu.memory_space<smem>>
    %cst = arith.constant dense<0.000000e+00> : vector<144x50xf32>
    %3 = tpu.matmul %0, %1, %cst {dimension_numbers = #tpu.dot_dimension_numbers<[1], [0], [0], [1], [0, 0, 1, 1], [], []>} : vector<144x36xf32>, vector<36x50xf32>, vector<144x50xf32> -> vector<144x50xf32>
    %4 = math.absf %3 : vector<144x50xf32>
    %5 = tpu.iota {dimensions = array<i32: 0>} : vector<144x1xi32>
    %c0_i32 = arith.constant 0 : i32
    %6 = vector.broadcast %c0_i32 : i32 to vector<144x1xi32>
    %c36_i32 = arith.constant 36 : i32
    %7 = vector.broadcast %c36_i32 : i32 to vector<144x1xi32>
    %8 = arith.cmpi sge, %5, %7 : vector<144x1xi32>
    %9 = arith.extui %8 : vector<144x1xi1> to vector<144x1xi32>
    %10 = arith.addi %6, %9 : vector<144x1xi32>
    %c72_i32 = arith.constant 72 : i32
    %11 = vector.broadcast %c72_i32 : i32 to vector<144x1xi32>
    %12 = arith.cmpi sge, %5, %11 : vector<144x1xi32>
    %13 = arith.extui %12 : vector<144x1xi1> to vector<144x1xi32>
    %14 = arith.addi %10, %13 : vector<144x1xi32>
    %c108_i32 = arith.constant 108 : i32
    %15 = vector.broadcast %c108_i32 : i32 to vector<144x1xi32>
    %16 = arith.cmpi sge, %5, %15 : vector<144x1xi32>
    %17 = arith.extui %16 : vector<144x1xi1> to vector<144x1xi32>
    %18 = arith.addi %14, %17 : vector<144x1xi32>
    %c36_i32_5 = arith.constant 36 : i32
    %19 = vector.broadcast %c36_i32_5 : i32 to vector<144x1xi32>
    %20 = arith.muli %19, %18 : vector<144x1xi32>
    %21 = arith.subi %5, %20 : vector<144x1xi32>
    %cst_6 = arith.constant 0.000000e+00 : f32
    %22 = vector.broadcast %cst_6 : f32 to vector<144x1xf32>
    %cst_7 = arith.constant 0.000000e+00 : f32
    %23 = vector.broadcast %cst_7 : f32 to vector<144x1xf32>
    %c0_i32_8 = arith.constant 0 : i32
    %24 = vector.broadcast %c0_i32_8 : i32 to vector<144x1xi32>
    %25 = arith.cmpi eq, %18, %24 : vector<144x1xi32>
    %cst_9 = arith.constant 0.000000e+00 : f32
    %26 = vector.shape_cast %25 : vector<144x1xi1> to vector<144x1xi1>
    %27 = vector.broadcast %26 : vector<144x1xi1> to vector<144x50xi1>
    %28 = vector.broadcast %cst_9 : f32 to vector<144x50xf32>
    %29 = arith.select %27, %4, %28 : vector<144x50xi1>, vector<144x50xf32>
    %30 = vector.shape_cast %29 : vector<144x50xf32> to vector<1x144x50xf32>
    %cst_10 = arith.constant dense<0xFF800000> : vector<1xf32>
    %31 = vector.multi_reduction <maximumf>, %30, %cst_10 [1, 2] : vector<1x144x50xf32> to vector<1xf32>
    %32 = vector.shape_cast %31 : vector<1xf32> to vector<1x1x1xf32>
    %33 = vector.extract %32[0, 0, 0] : f32 from vector<1x1x1xf32>
    %cst_11 = arith.constant 0.000000e+00 : f32
    %34 = vector.shape_cast %25 : vector<144x1xi1> to vector<144x1xi1>
    %35 = vector.broadcast %34 : vector<144x1xi1> to vector<144x36xi1>
    %36 = vector.broadcast %cst_11 : f32 to vector<144x36xf32>
    %37 = arith.select %35, %0, %36 : vector<144x36xi1>, vector<144x36xf32>
    %38 = vector.shape_cast %37 : vector<144x36xf32> to vector<1x144x36xf32>
    %cst_12 = arith.constant dense<0xFF800000> : vector<1xf32>
    %39 = vector.multi_reduction <maximumf>, %38, %cst_12 [1, 2] : vector<1x144x36xf32> to vector<1xf32>
    %40 = vector.shape_cast %39 : vector<1xf32> to vector<1x1x1xf32>
    %41 = vector.extract %40[0, 0, 0] : f32 from vector<1x1x1xf32>
    %42 = vector.broadcast %33 : f32 to vector<144x1xf32>
    %43 = arith.select %25, %42, %22 : vector<144x1xi1>, vector<144x1xf32>
    %44 = vector.broadcast %41 : f32 to vector<144x1xf32>
    %45 = arith.select %25, %44, %23 : vector<144x1xi1>, vector<144x1xf32>
    %c1_i32 = arith.constant 1 : i32
    %46 = vector.broadcast %c1_i32 : i32 to vector<144x1xi32>
    %47 = arith.cmpi eq, %18, %46 : vector<144x1xi32>
    %cst_13 = arith.constant 0.000000e+00 : f32
    %48 = vector.shape_cast %47 : vector<144x1xi1> to vector<144x1xi1>
    %49 = vector.broadcast %48 : vector<144x1xi1> to vector<144x50xi1>
    %50 = vector.broadcast %cst_13 : f32 to vector<144x50xf32>
    %51 = arith.select %49, %4, %50 : vector<144x50xi1>, vector<144x50xf32>
    %52 = vector.shape_cast %51 : vector<144x50xf32> to vector<1x144x50xf32>
    %cst_14 = arith.constant dense<0xFF800000> : vector<1xf32>
    %53 = vector.multi_reduction <maximumf>, %52, %cst_14 [1, 2] : vector<1x144x50xf32> to vector<1xf32>
    %54 = vector.shape_cast %53 : vector<1xf32> to vector<1x1x1xf32>
    %55 = vector.extract %54[0, 0, 0] : f32 from vector<1x1x1xf32>
    %cst_15 = arith.constant 0.000000e+00 : f32
    %56 = vector.shape_cast %47 : vector<144x1xi1> to vector<144x1xi1>
    %57 = vector.broadcast %56 : vector<144x1xi1> to vector<144x36xi1>
    %58 = vector.broadcast %cst_15 : f32 to vector<144x36xf32>
    %59 = arith.select %57, %0, %58 : vector<144x36xi1>, vector<144x36xf32>
    %60 = vector.shape_cast %59 : vector<144x36xf32> to vector<1x144x36xf32>
    %cst_16 = arith.constant dense<0xFF800000> : vector<1xf32>
    %61 = vector.multi_reduction <maximumf>, %60, %cst_16 [1, 2] : vector<1x144x36xf32> to vector<1xf32>
    %62 = vector.shape_cast %61 : vector<1xf32> to vector<1x1x1xf32>
    %63 = vector.extract %62[0, 0, 0] : f32 from vector<1x1x1xf32>
    %64 = vector.broadcast %55 : f32 to vector<144x1xf32>
    %65 = arith.select %47, %64, %43 : vector<144x1xi1>, vector<144x1xf32>
    %66 = vector.broadcast %63 : f32 to vector<144x1xf32>
    %67 = arith.select %47, %66, %45 : vector<144x1xi1>, vector<144x1xf32>
    %c2_i32 = arith.constant 2 : i32
    %68 = vector.broadcast %c2_i32 : i32 to vector<144x1xi32>
    %69 = arith.cmpi eq, %18, %68 : vector<144x1xi32>
    %cst_17 = arith.constant 0.000000e+00 : f32
    %70 = vector.shape_cast %69 : vector<144x1xi1> to vector<144x1xi1>
    %71 = vector.broadcast %70 : vector<144x1xi1> to vector<144x50xi1>
    %72 = vector.broadcast %cst_17 : f32 to vector<144x50xf32>
    %73 = arith.select %71, %4, %72 : vector<144x50xi1>, vector<144x50xf32>
    %74 = vector.shape_cast %73 : vector<144x50xf32> to vector<1x144x50xf32>
    %cst_18 = arith.constant dense<0xFF800000> : vector<1xf32>
    %75 = vector.multi_reduction <maximumf>, %74, %cst_18 [1, 2] : vector<1x144x50xf32> to vector<1xf32>
    %76 = vector.shape_cast %75 : vector<1xf32> to vector<1x1x1xf32>
    %77 = vector.extract %76[0, 0, 0] : f32 from vector<1x1x1xf32>
    %cst_19 = arith.constant 0.000000e+00 : f32
    %78 = vector.shape_cast %69 : vector<144x1xi1> to vector<144x1xi1>
    %79 = vector.broadcast %78 : vector<144x1xi1> to vector<144x36xi1>
    %80 = vector.broadcast %cst_19 : f32 to vector<144x36xf32>
    %81 = arith.select %79, %0, %80 : vector<144x36xi1>, vector<144x36xf32>
    %82 = vector.shape_cast %81 : vector<144x36xf32> to vector<1x144x36xf32>
    %cst_20 = arith.constant dense<0xFF800000> : vector<1xf32>
    %83 = vector.multi_reduction <maximumf>, %82, %cst_20 [1, 2] : vector<1x144x36xf32> to vector<1xf32>
    %84 = vector.shape_cast %83 : vector<1xf32> to vector<1x1x1xf32>
    %85 = vector.extract %84[0, 0, 0] : f32 from vector<1x1x1xf32>
    %86 = vector.broadcast %77 : f32 to vector<144x1xf32>
    %87 = arith.select %69, %86, %65 : vector<144x1xi1>, vector<144x1xf32>
    %88 = vector.broadcast %85 : f32 to vector<144x1xf32>
    %89 = arith.select %69, %88, %67 : vector<144x1xi1>, vector<144x1xf32>
    %c3_i32 = arith.constant 3 : i32
    %90 = vector.broadcast %c3_i32 : i32 to vector<144x1xi32>
    %91 = arith.cmpi eq, %18, %90 : vector<144x1xi32>
    %cst_21 = arith.constant 0.000000e+00 : f32
    %92 = vector.shape_cast %91 : vector<144x1xi1> to vector<144x1xi1>
    %93 = vector.broadcast %92 : vector<144x1xi1> to vector<144x50xi1>
    %94 = vector.broadcast %cst_21 : f32 to vector<144x50xf32>
    %95 = arith.select %93, %4, %94 : vector<144x50xi1>, vector<144x50xf32>
    %96 = vector.shape_cast %95 : vector<144x50xf32> to vector<1x144x50xf32>
    %cst_22 = arith.constant dense<0xFF800000> : vector<1xf32>
    %97 = vector.multi_reduction <maximumf>, %96, %cst_22 [1, 2] : vector<1x144x50xf32> to vector<1xf32>
    %98 = vector.shape_cast %97 : vector<1xf32> to vector<1x1x1xf32>
    %99 = vector.extract %98[0, 0, 0] : f32 from vector<1x1x1xf32>
    %cst_23 = arith.constant 0.000000e+00 : f32
    %100 = vector.shape_cast %91 : vector<144x1xi1> to vector<144x1xi1>
    %101 = vector.broadcast %100 : vector<144x1xi1> to vector<144x36xi1>
    %102 = vector.broadcast %cst_23 : f32 to vector<144x36xf32>
    %103 = arith.select %101, %0, %102 : vector<144x36xi1>, vector<144x36xf32>
    %104 = vector.shape_cast %103 : vector<144x36xf32> to vector<1x144x36xf32>
    %cst_24 = arith.constant dense<0xFF800000> : vector<1xf32>
    %105 = vector.multi_reduction <maximumf>, %104, %cst_24 [1, 2] : vector<1x144x36xf32> to vector<1xf32>
    %106 = vector.shape_cast %105 : vector<1xf32> to vector<1x1x1xf32>
    %107 = vector.extract %106[0, 0, 0] : f32 from vector<1x1x1xf32>
    %108 = vector.broadcast %99 : f32 to vector<144x1xf32>
    %109 = arith.select %91, %108, %87 : vector<144x1xi1>, vector<144x1xf32>
    %110 = vector.broadcast %107 : f32 to vector<144x1xf32>
    %111 = arith.select %91, %110, %89 : vector<144x1xi1>, vector<144x1xf32>
    %112 = vector.broadcast %2 : f32 to vector<144x1xf32>
    %113 = arith.mulf %111, %112 : vector<144x1xf32>
    %cst_25 = arith.constant 9.99999993E-9 : f32
    %114 = vector.broadcast %cst_25 : f32 to vector<144x1xf32>
    %115 = arith.addf %109, %114 : vector<144x1xf32>
    %116 = tpu.reciprocal %115 {approx = true} : vector<144x1xf32> -> vector<144x1xf32>
    %117 = arith.mulf %113, %116 : vector<144x1xf32>
    %118 = vector.broadcast %117 : vector<144x1xf32> to vector<144x50xf32>
    %119 = arith.mulf %4, %118 : vector<144x50xf32>
    %c0_26 = arith.constant 0 : index
    %c0_27 = arith.constant 0 : index
    %120 = vector.load %arg3[%c0_26, %c0_27] : memref<144x50xf32, #tpu.memory_space<vmem>>, vector<144x50xf32>
    %121 = arith.addf %119, %120 : vector<144x50xf32>
    %cst_28 = arith.constant 0.000000e+00 : f32
    %122 = vector.broadcast %cst_28 : f32 to vector<144x50xf32>
    %123 = arith.maximumf %121, %122 : vector<144x50xf32>
    %c0_29 = arith.constant 0 : index
    %c0_30 = arith.constant 0 : index
    %124 = vector.load %arg8[%c0_29, %c0_30] : memref<144x50xf32, #tpu.memory_space<vmem>>, vector<144x50xf32>
    tpu.vector_store %arg8[%c0_29, %c0_30], %123 {strides = array<i32>} : memref<144x50xf32, #tpu.memory_space<vmem>>, vector<144x50xf32>,
    %c0_31 = arith.constant 0 : index
    %c0_32 = arith.constant 0 : index
    %125 = vector.load %arg4[%c0_31, %c0_32] : memref<50x360xf32, #tpu.memory_space<vmem>>, vector<50x360xf32>
    %cst_33 = arith.constant dense<0.000000e+00> : vector<144x360xf32>
    %126 = tpu.matmul %123, %125, %cst_33 {dimension_numbers = #tpu.dot_dimension_numbers<[1], [0], [0], [1], [0, 0, 1, 1], [], []>} : vector<144x50xf32>, vector<50x360xf32>, vector<144x360xf32> -> vector<144x360xf32>
    %127 = tpu.iota {dimensions = array<i32: 1>} : vector<144x360xi32>
    %c10_i32 = arith.constant 10 : i32
    %128 = vector.broadcast %c10_i32 : i32 to vector<144x1xi32>
    %129 = arith.muli %128, %21 : vector<144x1xi32>
    %130 = vector.broadcast %129 : vector<144x1xi32> to vector<144x360xi32>
    %131 = arith.cmpi sge, %127, %130 : vector<144x360xi32>
    %c10_i32_34 = arith.constant 10 : i32
    %132 = vector.broadcast %c10_i32_34 : i32 to vector<144x1xi32>
    %133 = arith.addi %129, %132 : vector<144x1xi32>
    %134 = vector.broadcast %133 : vector<144x1xi32> to vector<144x360xi32>
    %135 = arith.cmpi slt, %127, %134 : vector<144x360xi32>
    %136 = arith.andi %131, %135 : vector<144x360xi1>
    %cst_35 = arith.constant 0.000000e+00 : f32
    %137 = vector.broadcast %cst_35 : f32 to vector<144x360xf32>
    %138 = arith.select %136, %126, %137 : vector<144x360xi1>, vector<144x360xf32>
    %c0_36 = arith.constant 0 : index
    %c0_37 = arith.constant 0 : index
    %139 = vector.load %arg5[%c0_36, %c0_37] : memref<360x10xf32, #tpu.memory_space<vmem>>, vector<360x10xf32>
    %cst_38 = arith.constant dense<0.000000e+00> : vector<144x10xf32>
    %140 = tpu.matmul %138, %139, %cst_38 {dimension_numbers = #tpu.dot_dimension_numbers<[1], [0], [0], [1], [0, 0, 1, 1], [], []>} : vector<144x360xf32>, vector<360x10xf32>, vector<144x10xf32> -> vector<144x10xf32>
    %c0_39 = arith.constant 0 : index
    %c0_40 = arith.constant 0 : index
    %141 = vector.load %arg6[%c0_39, %c0_40] : memref<4x144xf32, #tpu.memory_space<vmem>>, vector<4x144xf32>
    %cst_41 = arith.constant dense<0.000000e+00> : vector<4x10xf32>
    %142 = tpu.matmul %141, %140, %cst_41 {dimension_numbers = #tpu.dot_dimension_numbers<[1], [0], [0], [1], [0, 0, 1, 1], [], []>} : vector<4x144xf32>, vector<144x10xf32>, vector<4x10xf32> -> vector<4x10xf32>
    %c0_42 = arith.constant 0 : index
    %c0_43 = arith.constant 0 : index
    %143 = vector.load %arg7[%c0_42, %c0_43] : memref<1x10xf32, #tpu.memory_space<vmem>>, vector<1x10xf32>
    %144 = vector.broadcast %143 : vector<1x10xf32> to vector<4x10xf32>
    %145 = arith.addf %142, %144 : vector<4x10xf32>
    %c0_44 = arith.constant 0 : index
    %c0_45 = arith.constant 0 : index
    %146 = vector.load %arg9[%c0_44, %c0_45] : memref<4x10xf32, #tpu.memory_space<vmem>>, vector<4x10xf32>
    tpu.vector_store %arg9[%c0_44, %c0_45], %145 {strides = array<i32>} : memref<4x10xf32, #tpu.memory_space<vmem>>, vector<4x10xf32>,
    return
  }
}

</mosaic_0001>

<bundles_post_ra>
// kernel: squeeze.38
= control target key start
LH: loop header
LB: loop body
LE: loop exit
PB: predicated region body
PF: predicated region fallthrough
CT: control target
= control target key end

     0   :  { %s51_s8 = smov 30   ;;  %s52_s11 = smov 18   ;;  %vm3_vm0 = vcmask 48128   ;;  %vm9_vm1 = vcmask 294128   ;;  %vm15_vm2 = vcmask 244928   ;;  %vm21_vm3 = vcmask 195728   ;;  %s87_s0 = inlined_call_operand.vmem [shape: f32[4,6,6], index: 0, kind: input, shape index: {}]   ;;  %s88_s1 = inlined_call_operand.vmem [shape: f32[4,1,36], index: 1, kind: output, shape index: {}]  }
   0x1   :  { %v41_v0 = vld [vmem:[%s87_s0 + $0x5] ss:$8 sm:$0xf]   ;;  %v43_v1 = vld [vmem:[%s87_s0 + $0x3] ss:$8 sm:$0xf]  }
   0x2   :  { %7 = vrot.lane.b32.xlu0 %v41_v0, %s51_s8  ;;  %19 = vrot.lane.b32.xlu1 %v43_v1, %s52_s11  ;;  %v42_v2 = vld [vmem:[%s87_s0 + $0x4] ss:$8 sm:$0xf]   ;;  %v44_v3 = vld [vmem:[%s87_s0 + $0x2] ss:$8 sm:$0xf]  }
   0x3   :  { %v2_v4 = vld [vmem:[%s87_s0] ss:$8 sm:$0xf]   ;;  %s53_s18 = smov 24   ;;  %s54_s19 = smov 12   ;;  %vm27_vm4 = vcmask 146528  }
   0x4   :  { %4 = vst.msk [vmem:[#allocation0] sm:$0xf] %vm3_vm0, %v2_v4   ;;  %v45_v5 = vld [vmem:[%s87_s0 + $0x1] ss:$8 sm:$0xf]   ;;  %s55_s0 = smov 6  }
   0x5   :  { %vm33_vm5 = vcmask 97328  }
   0x6   :  { %13 = vrot.lane.b32.xlu0 %v42_v2, %s53_s18  ;;  %25 = vrot.lane.b32.xlu1 %v44_v3, %s54_s19 }
   0xa   :  { %31 = vrot.lane.b32.xlu0 %v45_v5, %s55_s0 }
  0x74   :  { %v8_v6 = vpop.permute.xlu0 %7   ;;  %v20_v7 = vpop.permute.xlu1 %19  }
  0x75   :  { %10 = vst.msk [vmem:[#allocation0] sm:$0xf] %vm9_vm1, %v8_v6  }
  0x78   :  { %v14_v8 = vpop.permute.xlu0 %13   ;;  %v26_v9 = vpop.permute.xlu1 %25  }
  0x79   :  { %16 = vst.msk [vmem:[#allocation0] sm:$0xf] %vm15_vm2, %v14_v8  }
  0x7a   :  { %22 = vst.msk [vmem:[#allocation0] sm:$0xf] %vm21_vm3, %v20_v7  }
  0x7b   :  { %28 = vst.msk [vmem:[#allocation0] sm:$0xf] %vm27_vm4, %v26_v9  }
  0x7c   :  { %v32_v10 = vpop.permute.xlu0 %31  }
  0x7d   :  { %34 = vst.msk [vmem:[#allocation0] sm:$0xf] %vm33_vm5, %v32_v10  }
  0x84   :  { %v38_v11 = vld [vmem:[#allocation0] sm:$0xf] }
  0x85   :  { %40 = vst [vmem:[%s88_s1] sm:$0xf] %v38_v11 }

// kernel: tile.12
= control target key start
LH: loop header
LB: loop body
LE: loop exit
PB: predicated region body
PF: predicated region fallthrough
CT: control target
= control target key end

     0   :  { %vm3_vm0 = vcmask 408576   ;;  %s288_s0 = inlined_call_operand.vmem [shape: f32[4,36,50], index: 0, kind: input, shape index: {}]   ;;  %s289_s1 = inlined_call_operand.vmem [shape: f32[144,50], index: 1, kind: output, shape index: {}]  }
   0x1   :  { %v2_v0 = vld [vmem:[%s288_s0] sm:$0xff]   ;;  %v100_v1 = vld [vmem:[%s288_s0 + $0x8] sm:$0xff]   ;;  %v102_v2 = vld [vmem:[%s288_s0 + $0x10] sm:$0xff]  }
   0x2   :  { %4 = vst.msk [vmem:[%s289_s1] sm:$0xff] %vm3_vm0, %v2_v0   ;;  %101 = vst.msk [vmem:[%s289_s1 + $0x8] sm:$0xff] %vm3_vm0, %v100_v1   ;;  %v104_v3 = vld [vmem:[%s288_s0 + $0x18] sm:$0xff]   ;;  %v106_v4 = vld [vmem:[%s288_s0 + $0x20] sm:$0xf]  }
   0x3   :  { %103 = vst.msk [vmem:[%s289_s1 + $0x10] sm:$0xff] %vm3_vm0, %v102_v2   ;;  %v108_v5 = vld [vmem:[%s288_s0 + $0x28] sm:$0xff]   ;;  %105 = vst.msk [vmem:[%s289_s1 + $0x18] sm:$0xff] %vm3_vm0, %v104_v3   ;;  %v110_v6 = vld [vmem:[%s288_s0 + $0x30] sm:$0xff]  }
   0x4   :  { %107 = vst.msk [vmem:[%s289_s1 + $0x20] sm:$0xf] %vm3_vm0, %v106_v4   ;;  %109 = vst.msk [vmem:[%s289_s1 + $0x24] sm:$0xff] %vm3_vm0, %v108_v5   ;;  %v112_v7 = vld [vmem:[%s288_s0 + $0x38] sm:$0xff]   ;;  %v114_v8 = vld [vmem:[%s288_s0 + $0x40] sm:$0xff]  }
   0x5   :  { %111 = vst.msk [vmem:[%s289_s1 + $0x2c] sm:$0xff] %vm3_vm0, %v110_v6   ;;  %113 = vst.msk [vmem:[%s289_s1 + $0x34] sm:$0xff] %vm3_vm0, %v112_v7   ;;  %v116_v9 = vld [vmem:[%s288_s0 + $0x48] sm:$0xf]   ;;  %v118_v10 = vld [vmem:[%s288_s0 + $0x50] sm:$0xff]  }
   0x6   :  { %115 = vst.msk [vmem:[%s289_s1 + $0x3c] sm:$0xff] %vm3_vm0, %v114_v8   ;;  %v120_v11 = vld [vmem:[%s288_s0 + $0x58] sm:$0xff]   ;;  %117 = vst.msk [vmem:[%s289_s1 + $0x44] sm:$0xf] %vm3_vm0, %v116_v9   ;;  %v122_v12 = vld [vmem:[%s288_s0 + $0x60] sm:$0xff]  }
   0x7   :  { %119 = vst.msk [vmem:[%s289_s1 + $0x48] sm:$0xff] %vm3_vm0, %v118_v10   ;;  %121 = vst.msk [vmem:[%s289_s1 + $0x50] sm:$0xff] %vm3_vm0, %v120_v11   ;;  %v124_v13 = vld [vmem:[%s288_s0 + $0x68] sm:$0xff]   ;;  %v126_v14 = vld [vmem:[%s288_s0 + $0x70] sm:$0xf]  }
   0x8   :  { %123 = vst.msk [vmem:[%s289_s1 + $0x58] sm:$0xff] %vm3_vm0, %v122_v12   ;;  %125 = vst.msk [vmem:[%s289_s1 + $0x60] sm:$0xff] %vm3_vm0, %v124_v13   ;;  %v128_v15 = vld [vmem:[%s288_s0 + $0x78] sm:$0xff]   ;;  %v130_v16 = vld [vmem:[%s288_s0 + $0x80] sm:$0xff]  }
   0x9   :  { %127 = vst.msk [vmem:[%s289_s1 + $0x68] sm:$0xf] %vm3_vm0, %v126_v14   ;;  %v132_v17 = vld [vmem:[%s288_s0 + $0x88] sm:$0xff]   ;;  %129 = vst.msk [vmem:[%s289_s1 + $0x6c] sm:$0xff] %vm3_vm0, %v128_v15   ;;  %v134_v18 = vld [vmem:[%s288_s0 + $0x90] sm:$0xff]  }
   0xa   :  { %131 = vst.msk [vmem:[%s289_s1 + $0x74] sm:$0xff] %vm3_vm0, %v130_v16   ;;  %133 = vst.msk [vmem:[%s289_s1 + $0x7c] sm:$0xff] %vm3_vm0, %v132_v17   ;;  %v136_v19 = vld [vmem:[%s288_s0 + $0x98] sm:$0xf]  }
   0xb   :  { %135 = vst.msk [vmem:[%s289_s1 + $0x84] sm:$0xff] %vm3_vm0, %v134_v18   ;;  %137 = vst.msk [vmem:[%s289_s1 + $0x8c] sm:$0xf] %vm3_vm0, %v136_v19  }

// kernel: tile.17
= control target key start
LH: loop header
LB: loop body
LE: loop exit
PB: predicated region body
PF: predicated region fallthrough
CT: control target
= control target key end

     0   :  { %vm86_vm0 = vcmask 64512   ;;  %s98_s6 = smov 3  ;;  %s101_s9 = smov 3  ;;  %vm38_vm1 = vcmask 48128   ;;  %vm4_vm2 = vcmask 1047556   ;;  %vm19_vm3 = vcmask 1045506   ;;  %s2020_s0 = inlined_call_operand.vmem [shape: f32[36,10,10], index: 0, kind: input, shape index: {}]   ;;  %s2021_s1 = inlined_call_operand.vmem [shape: f32[360,10], index: 1, kind: output, shape index: {}]  }
   0x1   :  { %v928_v0 = vld [vmem:[%s2020_s0 + $0xfc] ss:$40 sm:%s98_s6]   ;;  %s53_s12 = smov 3  ;;  %s56_s13 = smov 3  ;;  %vm24_vm4 = vcmask 1047558   ;;  %vm6_vm5 = vcmask 80896  }
   0x2   :  { %v929_v1 = vld [vmem:[%s2020_s0 + $0x14c] ss:$40 sm:%s101_s9]   ;;  %v917_v3 = vld [vmem:[%s2020_s0 + $0x109] ss:$40 sm:%s53_s12]   ;;  %s69_s18 = smov 3  ;;  %s76_s19 = smov 192 }
   0x3   :  { %v104_v2 = vsel %vm86_vm0, %v929_v1, %v928_v0  ;;  %v918_v4 = vld [vmem:[%s2020_s0 + $0x109] ss:$40 sm:%s56_s13]   ;;  %s1165_s20 = smov 120   ;;  %v921_v6 = vld [vmem:[%s2020_s0 + $0x14c] ss:$40 sm:%s69_s18]   ;;  %s15_s25 = smov 3 }
   0x4   :  { %105 = vrot.lane.b32.xlu1 %v104_v2, %s1165_s20  ;;  %v59_v5 = vsel %vm38_vm1, %v918_v4, %v917_v3  ;;  %v922_v7 = vld [vmem:[%s2020_s0 - $0x44] ss:$40 sm:$0x3c]   ;;  %s1166_s26 = smov 122   ;;  %s22_s2 = smov 192  ;;  %vm95_vm6 = vcmask 1048512  }
   0x5   :  { %60 = vrot.lane.b32.xlu0 %v59_v5, %s1166_s26  ;;  %v74_v8 = vsel %vm19_vm3, %v922_v7, %v921_v6  ;;  %v923_v9 = vld [vmem:[%s2020_s0 - $0x44] ss:$40 sm:%s76_s19]   ;;  %s27_s7 = smov 3  ;;  %v908_v15 = vld [vmem:[%s2020_s0 - $0x37] ss:$40 sm:$0x3c]  }
   0x6   :  { %v924_v10 = vld [vmem:[%s2020_s0 + $0xc] ss:$40 sm:$0xf]   ;;  %v79_v11 = vsel %vm24_vm4, %v923_v9, %v74_v8  ;;  %v907_v13 = vld [vmem:[%s2020_s0 + $0x159] ss:$40 sm:%s15_s25]   ;;  %s34_s12 = smov 192 }
   0x7   :  { %v925_v12 = vld [vmem:[%s2020_s0 + $0xc] ss:$40 sm:$0xf0]   ;;  %v909_v16 = vld [vmem:[%s2020_s0 - $0x37] ss:$40 sm:%s22_s2]   ;;  %v20_v18 = vsel %vm19_vm3, %v908_v15, %v907_v13  ;;  %s133_s19 = smov 3 }
   0x8   :  { %v85_v14 = vsel %vm4_vm2, %v925_v12, %v924_v10  ;;  %v910_v19 = vld [vmem:[%s2020_s0 + $0x159] ss:$40 sm:%s27_s7]   ;;  %v25_v21 = vsel %vm24_vm4, %v909_v16, %v20_v18  ;;  %v937_v25 = vld [vmem:[%s2020_s0 + $0x108] ss:$40 sm:%s133_s19]   ;;  %s121_s25 = smov 192  ;;  %s151_s2 = smov 3 }
   0x9   :  { %v87_v17 = vsel %vm86_vm0, %v85_v14, %v79_v11  ;;  %v911_v20 = vld [vmem:[%s2020_s0 - $0x37] ss:$40 sm:$0x3c]   ;;  %v933_v28 = vld [vmem:[%s2020_s0 - $0x38] ss:$40 sm:$0x3c]  }
   0xa   :  { %88 = vrot.lane.b32.xlu1 %v87_v17, %s1165_s20  ;;  %v32_v22 = vsel %vm19_vm3, %v911_v20, %v910_v19  ;;  %v912_v23 = vld [vmem:[%s2020_s0 - $0x37] ss:$40 sm:%s34_s12]   ;;  %s114_s20 = smov 3  ;;  %v939_v32 = vld [vmem:[%s2020_s0 + $0xb] ss:$40 sm:$0xf]  }
   0xb   :  { %v37_v24 = vsel %vm24_vm4, %v912_v23, %v32_v22  ;;  %v932_v26 = vld [vmem:[%s2020_s0 + $0x158] ss:$40 sm:%s114_s20]   ;;  %s159_s5 = smov 3  ;;  %v941_v33 = vld [vmem:[%s2020_s0 + $0x14b] ss:$40 sm:%s151_s2]   ;;  %s178_s10 = smov 3 }
   0xc   :  { %v39_v27 = vsel %vm38_vm1, %v37_v24, %v25_v21  ;;  %v934_v29 = vld [vmem:[%s2020_s0 - $0x38] ss:$40 sm:%s121_s25]   ;;  %v119_v30 = vsel %vm19_vm3, %v933_v28, %v932_v26  ;;  %v940_v34 = vld [vmem:[%s2020_s0 + $0xb] ss:$40 sm:$0xf0]   ;;  %s166_s15 = smov 192 }
   0xd   :  { %40 = vrot.lane.b32.xlu0 %v39_v27, %s1166_s26  ;;  %s1167_s26 = smov 112   ;;  %v124_v31 = vsel %vm24_vm4, %v934_v29, %v119_v30  ;;  %v943_v35 = vld [vmem:[%s2020_s0 + $0x157] ss:$40 sm:%s159_s5]   ;;  %s1168_s16 = smov 110   ;;  %v145_v37 = vsel %vm4_vm2, %v940_v34, %v939_v32  ;;  %vm42_vm7 = vcmask 31744   ;;  %vm47_vm8 = vcmask 1048528  }
   0xe   :  { %135 = vrot.lane.b32.xlu1 %v937_v25, %s1167_s26  ;;  %v944_v36 = vld [vmem:[%s2020_s0 - $0x39] ss:$40 sm:$0x3c]   ;;  %s196_s21 = smov 3  ;;  %s204_s22 = smov 3  ;;  %vm90_vm9 = vcmask 15360  }
   0xf   :  { %v948_v38 = vld [vmem:[%s2020_s0 + $0x107] ss:$40 sm:%s178_s10]   ;;  %v164_v39 = vsel %vm19_vm3, %v944_v36, %v943_v35  ;;  %s1169_s23 = smov 102   ;;  %v950_v42 = vld [vmem:[%s2020_s0 + $0xa] ss:$40 sm:$0xf]  }
  0x10   :  { %v945_v40 = vld [vmem:[%s2020_s0 - $0x39] ss:$40 sm:%s166_s15]   ;;  %v952_v43 = vld [vmem:[%s2020_s0 + $0x14a] ss:$40 sm:%s196_s21]   ;;  %s223_s2 = smov 3  ;;  %s211_s6 = smov 192 }
  0x11   :  { %125 = vrot.lane.b32.xlu0 %v124_v31, %s1167_s26  ;;  %v169_v41 = vsel %vm24_vm4, %v945_v40, %v164_v39  ;;  %v951_v44 = vld [vmem:[%s2020_s0 + $0xa] ss:$40 sm:$0xf0]   ;;  %v954_v45 = vld [vmem:[%s2020_s0 + $0x163] ss:$40 sm:%s204_s22]   ;;  %s231_s7 = smov 3 }
  0x12   :  { %153 = vrot.lane.b32.xlu1 %v941_v33, %s1168_s16  ;;  %v955_v46 = vld [vmem:[%s2020_s0 - $0x2d] ss:$40 sm:$0x3c]   ;;  %s1170_s8 = smov 100   ;;  %v190_v47 = vsel %vm4_vm2, %v951_v44, %v950_v42  ;;  %s250_s13 = smov 3  ;;  %vm127_vm10 = vcmask 999296  }
  0x13   :  { %v959_v48 = vld [vmem:[%s2020_s0 + $0x113] ss:$40 sm:%s223_s2]   ;;  %v209_v49 = vsel %vm19_vm3, %v955_v46, %v954_v45  ;;  %v961_v51 = vld [vmem:[%s2020_s0 + $0x156] ss:$40 sm:%s231_s7]   ;;  %s238_s18 = smov 192  ;;  %s1171_s19 = smov 94  }
  0x14   :  { %v956_v50 = vld [vmem:[%s2020_s0 - $0x2d] ss:$40 sm:%s211_s6]   ;;  %v962_v52 = vld [vmem:[%s2020_s0 - $0x3a] ss:$40 sm:$0x3c]   ;;  %s268_s24 = smov 3 }
  0x15   :  { %146 = vrot.lane.b32.xlu0 %v145_v37, %s1168_s16  ;;  %v214_v53 = vsel %vm24_vm4, %v956_v50, %v209_v49  ;;  %v966_v54 = vld [vmem:[%s2020_s0 + $0x106] ss:$40 sm:%s250_s13]   ;;  %v236_v55 = vsel %vm19_vm3, %v962_v52, %v961_v51  ;;  %s276_s25 = smov 3  ;;  %s1172_s27 = smov 92   ;;  %vm148_vm11 = vcmask 982896   ;;  %vm172_vm12 = vcmask 917296  }
  0x16   :  { %180 = vrot.lane.b32.xlu1 %v948_v38, %s1169_s23  ;;  %v963_v56 = vld [vmem:[%s2020_s0 - $0x3a] ss:$40 sm:%s238_s18]   ;;  %v968_v58 = vld [vmem:[%s2020_s0 + $0x9] ss:$40 sm:$0xf]   ;;  %s295_s4 = smov 3 }
  0x17   :  { %v241_v57 = vsel %vm24_vm4, %v963_v56, %v236_v55  ;;  %v970_v59 = vld [vmem:[%s2020_s0 + $0x149] ss:$40 sm:%s268_s24]   ;;  %v972_v61 = vld [vmem:[%s2020_s0 + $0x162] ss:$40 sm:%s276_s25]   ;;  %s283_s9 = smov 192  ;;  %s303_s10 = smov 3 }
  0x18   :  { %v969_v60 = vld [vmem:[%s2020_s0 + $0x9] ss:$40 sm:$0xf0]   ;;  %v973_v62 = vld [vmem:[%s2020_s0 - $0x2e] ss:$40 sm:$0x3c]  }
  0x19   :  { %170 = vrot.lane.b32.xlu0 %v169_v41, %s1169_s23  ;;  %s1173_s11 = smov 90   ;;  %v262_v63 = vsel %vm4_vm2, %v969_v60, %v968_v58  ;;  %v977_v0 = vld [vmem:[%s2020_s0 + $0x112] ss:$40 sm:%s295_s4]   ;;  %v281_v1 = vsel %vm19_vm3, %v973_v62, %v972_v61  ;;  %s322_s16 = smov 3  ;;  %vm193_vm13 = vcmask 900896   ;;  %vm217_vm14 = vcmask 851696  }
  0x1a   :  { %198 = vrot.lane.b32.xlu1 %v952_v43, %s1170_s8  ;;  %v974_v2 = vld [vmem:[%s2020_s0 - $0x2e] ss:$40 sm:%s283_s9]   ;;  %v980_v4 = vld [vmem:[%s2020_s0 - $0x3b] ss:$40 sm:$0x3c]   ;;  %s310_s21 = smov 192 }
  0x1b   :  { %v979_v3 = vld [vmem:[%s2020_s0 + $0x155] ss:$40 sm:%s303_s10]   ;;  %s1174_s22 = smov 84   ;;  %v286_v5 = vsel %vm24_vm4, %v974_v2, %v281_v1  ;;  %s340_s28 = smov 3  ;;  %vm244_vm15 = vcmask 835296   ;;  %vm265_vm0 = vcmask 818896  }
  0x1c   :  { %v984_v6 = vld [vmem:[%s2020_s0 + $0x105] ss:$40 sm:%s322_s16]   ;;  %v308_v7 = vsel %vm19_vm3, %v980_v4, %v979_v3  ;;  %s348_s29 = smov 3  ;;  %s1175_s30 = smov 82   ;;  %v988_v11 = vld [vmem:[%s2020_s0 + $0x148] ss:$40 sm:%s340_s28]  }
  0x1d   :  { %191 = vrot.lane.b32.xlu0 %v190_v47, %s1170_s8  ;;  %v981_v8 = vld [vmem:[%s2020_s0 - $0x3b] ss:$40 sm:%s310_s21]   ;;  %v986_v10 = vld [vmem:[%s2020_s0 + $0x8] ss:$40 sm:$0xf]   ;;  %s367_s7 = smov 3 }
  0x1e   :  { %225 = vrot.lane.b32.xlu1 %v959_v48, %s1171_s19  ;;  %v313_v9 = vsel %vm24_vm4, %v981_v8, %v308_v7  ;;  %v987_v12 = vld [vmem:[%s2020_s0 + $0x8] ss:$40 sm:$0xf0]   ;;  %v990_v13 = vld [vmem:[%s2020_s0 + $0x161] ss:$40 sm:%s348_s29]   ;;  %s355_s12 = smov 192 }
  0x1f   :  { %v991_v14 = vld [vmem:[%s2020_s0 - $0x2f] ss:$40 sm:$0x3c]   ;;  %s375_s13 = smov 3  ;;  %s1176_s14 = smov 80   ;;  %v334_v15 = vsel %vm4_vm2, %v987_v12, %v986_v10  ;;  %vm289_vm1 = vcmask 769696  }
  0x20   :  { %v995_v16 = vld [vmem:[%s2020_s0 + $0x111] ss:$40 sm:%s367_s7]   ;;  %v353_v17 = vsel %vm19_vm3, %v991_v14, %v990_v13  ;;  %v997_v19 = vld [vmem:[%s2020_s0 + $0x154] ss:$40 sm:%s375_s13]   ;;  %s382_s24 = smov 192  ;;  %s1177_s25 = smov 74  }
  0x21   :  { %215 = vrot.lane.b32.xlu0 %v214_v53, %s1171_s19  ;;  %v992_v18 = vld [vmem:[%s2020_s0 - $0x2f] ss:$40 sm:%s355_s12]   ;;  %s394_s19 = smov 3  ;;  %v998_v20 = vld [vmem:[%s2020_s0 - $0x3c] ss:$40 sm:$0x3c]  }
  0x22   :  { %252 = vrot.lane.b32.xlu1 %v966_v54, %s1172_s27  ;;  %v358_v21 = vsel %vm24_vm4, %v992_v18, %v353_v17  ;;  %v1002_v22 = vld [vmem:[%s2020_s0 + $0x104] ss:$40 sm:%s394_s19]   ;;  %v380_v23 = vsel %vm19_vm3, %v998_v20, %v997_v19  ;;  %s412_s2 = smov 3  ;;  %s420_s26 = smov 3 }
  0x23   :  { %v999_v24 = vld [vmem:[%s2020_s0 - $0x3c] ss:$40 sm:%s382_s24]   ;;  %s1178_s3 = smov 72   ;;  %v1004_v26 = vld [vmem:[%s2020_s0 + $0x7] ss:$40 sm:$0xf]  }
  0x24   :  { %v385_v25 = vsel %vm24_vm4, %v999_v24, %v380_v23  ;;  %v1006_v27 = vld [vmem:[%s2020_s0 + $0x147] ss:$40 sm:%s412_s2]   ;;  %s439_s10 = smov 3  ;;  %v1008_v29 = vld [vmem:[%s2020_s0 + $0x160] ss:$40 sm:%s420_s26]   ;;  %s427_s15 = smov 192 }
  0x25   :  { %242 = vrot.lane.b32.xlu0 %v241_v57, %s1172_s27  ;;  %v1005_v28 = vld [vmem:[%s2020_s0 + $0x7] ss:$40 sm:$0xf0]   ;;  %v1009_v30 = vld [vmem:[%s2020_s0 - $0x30] ss:$40 sm:$0x3c]  }
  0x26   :  { %270 = vrot.lane.b32.xlu1 %v970_v59, %s1173_s11  ;;  %s447_s16 = smov 3  ;;  %s1179_s17 = smov 70   ;;  %v406_v31 = vsel %vm4_vm2, %v1005_v28, %v1004_v26  ;;  %v1013_v32 = vld [vmem:[%s2020_s0 + $0x110] ss:$40 sm:%s439_s10]   ;;  %v425_v33 = vsel %vm19_vm3, %v1009_v30, %v1008_v29 }
  0x27   :  { %v1010_v34 = vld [vmem:[%s2020_s0 - $0x30] ss:$40 sm:%s427_s15]   ;;  %v1015_v35 = vld [vmem:[%s2020_s0 + $0x153] ss:$40 sm:%s447_s16]   ;;  %s454_s28 = smov 192  ;;  %s1180_s29 = smov 64  }
  0x28   :  { %v1016_v36 = vld [vmem:[%s2020_s0 - $0x3d] ss:$40 sm:$0x3c]   ;;  %v430_v37 = vsel %vm24_vm4, %v1010_v34, %v425_v33  ;;  %s492_s5 = smov 3  ;;  %s9_s6 = smov 3 }
  0x29   :  { %263 = vrot.lane.b32.xlu0 %v262_v63, %s1173_s11  ;;  %v452_v39 = vsel %vm19_vm3, %v1016_v36, %v1015_v35  ;;  %v1017_v40 = vld [vmem:[%s2020_s0 - $0x3d] ss:$40 sm:%s454_s28]   ;;  %v1022_v42 = vld [vmem:[%s2020_s0 + $0x6] ss:$40 sm:$0xf]   ;;  %s1181_s11 = smov 62  }
  0x2a   :  { %297 = vrot.lane.b32.xlu1 %v977_v0, %s1174_s22  ;;  %v457_v43 = vsel %vm24_vm4, %v1017_v40, %v452_v39  ;;  %v1023_v44 = vld [vmem:[%s2020_s0 + $0x6] ss:$40 sm:$0xf0]   ;;  %v905_v45 = vld [vmem:[%s2020_s0 + $0x140] ss:$40 sm:%s9_s6]   ;;  %s499_s21 = smov 192 }
  0x2b   :  { %v1026_v46 = vld [vmem:[%s2020_s0 + $0x15f] ss:$40 sm:%s492_s5]   ;;  %906 = vst.msk [vmem:[%s2021_s1 + $0x18] sm:$0x3] %vm6_vm5, %v905_v45   ;;  %v478_v51 = vsel %vm4_vm2, %v1023_v44, %v1022_v42  ;;  %s538_s7 = smov 3  ;;  %s526_s12 = smov 192 }
  0x2c   :  { %v1027_v47 = vld [vmem:[%s2020_s0 - $0x31] ss:$40 sm:$0x3c]   ;;  %v2_v48 = vld [vmem:[%s2020_s0] ss:$40 sm:$0xf]  }
  0x2d   :  { %287 = vrot.lane.b32.xlu0 %v286_v5, %s1174_s22  ;;  %s466_s22 = smov 3  ;;  %v3_v49 = vld [vmem:[%s2020_s0] ss:$40 sm:$0xf0]   ;;  %v497_v53 = vsel %vm19_vm3, %v1027_v47, %v1026_v46  ;;  %v1028_v54 = vld [vmem:[%s2020_s0 - $0x31] ss:$40 sm:%s499_s21]  }
  0x2e   :  { %324 = vrot.lane.b32.xlu1 %v984_v6, %s1175_s30  ;;  %v1020_v38 = vld [vmem:[%s2020_s0 + $0x103] ss:$40 sm:%s466_s22]   ;;  %v5_v50 = vsel %vm4_vm2, %v3_v49, %v2_v48  ;;  %v1034_v56 = vld [vmem:[%s2020_s0 - $0x3e] ss:$40 sm:$0x3c]   ;;  %s1183_s13 = smov 54   ;;  %v502_v57 = vsel %vm24_vm4, %v1028_v54, %v497_v53 }
  0x2f   :  { %7 = vst.msk [vmem:[%s2021_s1] sm:$0xff] %vm6_vm5, %v5_v50   ;;  %v1038_v58 = vld [vmem:[%s2020_s0 + $0x102] ss:$40 sm:%s538_s7]   ;;  %s556_s18 = smov 3  ;;  %s564_s19 = smov 3  ;;  %vm388_vm5 = vcmask 671296  }
  0x30   :  { %v1035_v60 = vld [vmem:[%s2020_s0 - $0x3e] ss:$40 sm:%s526_s12]   ;;  %s1184_s20 = smov 52   ;;  %v1040_v62 = vld [vmem:[%s2020_s0 + $0x5] ss:$40 sm:$0xf]  }
  0x31   :  { %314 = vrot.lane.b32.xlu0 %v313_v9, %s1175_s30  ;;  %s484_s30 = smov 3  ;;  %v1042_v63 = vld [vmem:[%s2020_s0 + $0x145] ss:$40 sm:%s556_s18]   ;;  %s583_s28 = smov 3 }
  0x32   :  { %342 = vrot.lane.b32.xlu1 %v988_v11, %s1176_s14  ;;  %v1024_v41 = vld [vmem:[%s2020_s0 + $0x146] ss:$40 sm:%s484_s30]   ;;  %s1182_s30 = smov 60   ;;  %v1041_v0 = vld [vmem:[%s2020_s0 + $0x5] ss:$40 sm:$0xf0]  }
  0x33   :  { %v1044_v1 = vld [vmem:[%s2020_s0 + $0x15e] ss:$40 sm:%s564_s19]   ;;  %s591_s4 = smov 3  ;;  %s1185_s5 = smov 50   ;;  %v550_v3 = vsel %vm4_vm2, %v1041_v0, %v1040_v62 }
  0x34   :  { %v1045_v2 = vld [vmem:[%s2020_s0 - $0x32] ss:$40 sm:$0x3c]   ;;  %s610_s10 = smov 3  ;;  %v1051_v7 = vld [vmem:[%s2020_s0 + $0x151] ss:$40 sm:%s591_s4]  }
  0x35   :  { %335 = vrot.lane.b32.xlu0 %v334_v15, %s1176_s14  ;;  %s511_s14 = smov 3  ;;  %v1049_v4 = vld [vmem:[%s2020_s0 + $0x10e] ss:$40 sm:%s583_s28]   ;;  %v569_v5 = vsel %vm19_vm3, %v1045_v2, %v1044_v1  ;;  %v1052_v8 = vld [vmem:[%s2020_s0 - $0x3f] ss:$40 sm:$0x3c]  }
  0x36   :  { %369 = vrot.lane.b32.xlu1 %v995_v16, %s1177_s25  ;;  %v1031_v52 = vld [vmem:[%s2020_s0 + $0x10f] ss:$40 sm:%s511_s14]   ;;  %s598_s15 = smov 192  ;;  %s1186_s16 = smov 44   ;;  %v596_v11 = vsel %vm19_vm3, %v1052_v8, %v1051_v7 }
  0x37   :  { %v1056_v10 = vld [vmem:[%s2020_s0 + $0x101] ss:$40 sm:%s610_s10]   ;;  %s628_s21 = smov 3  ;;  %s636_s22 = smov 3 }
  0x38   :  { %v1053_v12 = vld [vmem:[%s2020_s0 - $0x3f] ss:$40 sm:%s598_s15]   ;;  %s1187_s23 = smov 42   ;;  %v1058_v14 = vld [vmem:[%s2020_s0 + $0x4] ss:$40 sm:$0xf]  }
  0x39   :  { %359 = vrot.lane.b32.xlu0 %v358_v21, %s1177_s25  ;;  %v601_v13 = vsel %vm24_vm4, %v1053_v12, %v596_v11  ;;  %v1060_v15 = vld [vmem:[%s2020_s0 + $0x144] ss:$40 sm:%s628_s21]   ;;  %s655_s2 = smov 3  ;;  %v1063_v18 = vld [vmem:[%s2020_s0 - $0x33] ss:$40 sm:$0x3c]  }
  0x3a   :  { %396 = vrot.lane.b32.xlu1 %v1002_v22, %s1178_s3  ;;  %v1059_v16 = vld [vmem:[%s2020_s0 + $0x4] ss:$40 sm:$0xf0]   ;;  %v1062_v17 = vld [vmem:[%s2020_s0 + $0x15d] ss:$40 sm:%s636_s22]   ;;  %s643_s6 = smov 192 }
  0x3b   :  { %s663_s7 = smov 3  ;;  %s1188_s8 = smov 40   ;;  %v622_v19 = vsel %vm4_vm2, %v1059_v16, %v1058_v14  ;;  %v1067_v20 = vld [vmem:[%s2020_s0 + $0x10d] ss:$40 sm:%s655_s2]   ;;  %v641_v21 = vsel %vm19_vm3, %v1063_v18, %v1062_v17 }
  0x3c   :  { %v1064_v22 = vld [vmem:[%s2020_s0 - $0x33] ss:$40 sm:%s643_s6]   ;;  %v1069_v23 = vld [vmem:[%s2020_s0 + $0x150] ss:$40 sm:%s663_s7]   ;;  %s670_s18 = smov 192  ;;  %s1189_s19 = smov 34  }
  0x3d   :  { %386 = vrot.lane.b32.xlu0 %v385_v25, %s1178_s3  ;;  %s571_s3 = smov 192  ;;  %v1070_v24 = vld [vmem:[%s2020_s0 - $0x40] ss:$40 sm:$0x3c]   ;;  %v646_v25 = vsel %vm24_vm4, %v1064_v22, %v641_v21  ;;  %s700_s24 = smov 3 }
  0x3e   :  { %414 = vrot.lane.b32.xlu1 %v1006_v27, %s1179_s17  ;;  %v1046_v6 = vld [vmem:[%s2020_s0 - $0x32] ss:$40 sm:%s571_s3]   ;;  %v668_v27 = vsel %vm19_vm3, %v1070_v24, %v1069_v23  ;;  %s708_s25 = smov 3  ;;  %s1190_s27 = smov 32  }
  0x3f   :  { %v574_v9 = vsel %vm24_vm4, %v1046_v6, %v569_v5  ;;  %v1071_v28 = vld [vmem:[%s2020_s0 - $0x40] ss:$40 sm:%s670_s18]   ;;  %v1078_v30 = vld [vmem:[%s2020_s0 + $0x143] ss:$40 sm:%s700_s24]   ;;  %s715_s9 = smov 192  ;;  %s735_s10 = smov 3 }
  0x40   :  { %v673_v29 = vsel %vm24_vm4, %v1071_v28, %v668_v27  ;;  %v1080_v33 = vld [vmem:[%s2020_s0 + $0x15c] ss:$40 sm:%s708_s25]   ;;  %v1087_v39 = vld [vmem:[%s2020_s0 + $0x14f] ss:$40 sm:%s735_s10]   ;;  %s742_s21 = smov 192  ;;  %s1192_s22 = smov 24  }
  0x41   :  { %407 = vrot.lane.b32.xlu0 %v406_v31, %s1179_s17  ;;  %v1076_v31 = vld [vmem:[%s2020_s0 + $0x3] ss:$40 sm:$0xf]   ;;  %v1081_v34 = vld [vmem:[%s2020_s0 - $0x34] ss:$40 sm:$0x3c]  }
  0x42   :  { %441 = vrot.lane.b32.xlu1 %v1013_v32, %s1180_s29  ;;  %v1077_v32 = vld [vmem:[%s2020_s0 + $0x3] ss:$40 sm:$0xf0]   ;;  %v1088_v40 = vld [vmem:[%s2020_s0 - $0x41] ss:$40 sm:$0x3c]  }
  0x43   :  { %v694_v35 = vsel %vm4_vm2, %v1077_v32, %v1076_v31  ;;  %v1089_v44 = vld [vmem:[%s2020_s0 - $0x41] ss:$40 sm:%s742_s21]   ;;  %s772_s28 = smov 3  ;;  %v1094_v46 = vld [vmem:[%s2020_s0 + $0x2] ss:$40 sm:$0xf]  }
  0x44   :  { %v1096_v48 = vld [vmem:[%s2020_s0 + $0x142] ss:$40 sm:%s772_s28]   ;;  %s799_s7 = smov 3  ;;  %s787_s14 = smov 192 }
  0x45   :  { %431 = vrot.lane.b32.xlu0 %v430_v37, %s1180_s29  ;;  %s519_s29 = smov 3  ;;  %v713_v37 = vsel %vm19_vm3, %v1081_v34, %v1080_v33  ;;  %v1095_v49 = vld [vmem:[%s2020_s0 + $0x2] ss:$40 sm:$0xf0]   ;;  %v1103_v54 = vld [vmem:[%s2020_s0 + $0x10b] ss:$40 sm:%s799_s7]  }
  0x46   :  { %468 = vrot.lane.b32.xlu1 %v1020_v38, %s1181_s11  ;;  %v1033_v55 = vld [vmem:[%s2020_s0 + $0x152] ss:$40 sm:%s519_s29]   ;;  %s780_s29 = smov 3  ;;  %v766_v53 = vsel %vm4_vm2, %v1095_v49, %v1094_v46  ;;  %s826_s28 = smov 3 }
  0x47   :  { %v524_v59 = vsel %vm19_vm3, %v1034_v56, %v1033_v55  ;;  %v1082_v38 = vld [vmem:[%s2020_s0 - $0x34] ss:$40 sm:%s715_s9]   ;;  %v1100_v56 = vld [vmem:[%s2020_s0 - $0x35] ss:$40 sm:%s787_s14]   ;;  %s814_s3 = smov 192  ;;  %s1195_s6 = smov 14  }
  0x48   :  { %v529_v61 = vsel %vm24_vm4, %v1035_v60, %v524_v59  ;;  %v1106_v59 = vld [vmem:[%s2020_s0 - $0x42] ss:$40 sm:$0x3c]   ;;  %v1113_v6 = vld [vmem:[%s2020_s0 + $0x1] ss:$40 sm:$0xf0]  }
  0x49   :  { %458 = vrot.lane.b32.xlu0 %v457_v43, %s1181_s11  ;;  %s1191_s11 = smov 30   ;;  %v740_v43 = vsel %vm19_vm3, %v1088_v40, %v1087_v39  ;;  %v1110_v62 = vld [vmem:[%s2020_s0 + $0xfe] ss:$40 sm:%s826_s28]   ;;  %s1196_s28 = smov 12  }
  0x4a   :  { %486 = vrot.lane.b32.xlu1 %v1024_v41, %s1182_s30  ;;  %v718_v41 = vsel %vm24_vm4, %v1082_v38, %v713_v37  ;;  %v745_v45 = vsel %vm24_vm4, %v1089_v44, %v740_v43  ;;  %v1107_v0 = vld [vmem:[%s2020_s0 - $0x42] ss:$40 sm:%s814_s3]   ;;  %s859_s14 = smov 192  ;;  %s879_s17 = smov 3 }
  0x4b   :  { %s1197_s18 = smov 10   ;;  %v1118_v14 = vld [vmem:[%s2020_s0 - $0x36] ss:$40 sm:%s859_s14]   ;;  %v1123_v16 = vld [vmem:[%s2020_s0 + $0x14d] ss:$40 sm:%s879_s17]   ;;  %s886_s2 = smov 192 }
  0x4c   :  { %v1124_v17 = vld [vmem:[%s2020_s0 - $0x43] ss:$40 sm:$0x3c]   ;;  %s1198_s4 = smov 4   ;;  %s1199_s14 = smov 2  }
  0x4d   :  { %479 = vrot.lane.b32.xlu0 %v478_v51, %s1182_s30  ;;  %s727_s30 = smov 3  ;;  %v1098_v51 = vld [vmem:[%s2020_s0 + $0x15b] ss:$40 sm:%s780_s29]   ;;  %v884_v21 = vsel %vm19_vm3, %v1124_v17, %v1123_v16 }
  0x4e   :  { %513 = vrot.lane.b32.xlu1 %v1031_v52, %s1183_s13  ;;  %v1085_v36 = vld [vmem:[%s2020_s0 + $0x10c] ss:$40 sm:%s727_s30]   ;;  %s1193_s30 = smov 22   ;;  %v1099_v52 = vld [vmem:[%s2020_s0 - $0x35] ss:$40 sm:$0x3c]  }
  0x4f   :  { %v785_v55 = vsel %vm19_vm3, %v1099_v52, %v1098_v51  ;;  %v1125_v22 = vld [vmem:[%s2020_s0 - $0x43] ss:$40 sm:%s886_s2]  }
  0x50   :  { %v790_v60 = vsel %vm24_vm4, %v1100_v56, %v785_v55  ;;  %v889_v24 = vsel %vm24_vm4, %v1125_v22, %v884_v21 }
  0x51   :  { %503 = vrot.lane.b32.xlu0 %v502_v57, %s1183_s13  ;;  %s682_s13 = smov 3 }
  0x52   :  { %540 = vrot.lane.b32.xlu1 %v1038_v58, %s1184_s20  ;;  %v1074_v26 = vld [vmem:[%s2020_s0 + $0x100] ss:$40 sm:%s682_s13]  }
  0x55   :  { %530 = vrot.lane.b32.xlu0 %v529_v61, %s1184_s20  ;;  %s1194_s20 = smov 20  }
  0x56   :  { %558 = vrot.lane.b32.xlu1 %v1042_v63, %s1185_s5 }
  0x59   :  { %551 = vrot.lane.b32.xlu0 %v550_v3, %s1185_s5  ;;  %v1112_v3 = vld [vmem:[%s2020_s0 + $0x1] ss:$40 sm:$0xf]   ;;  %s871_s5 = smov 3 }
  0x5a   :  { %585 = vrot.lane.b32.xlu1 %v1049_v4, %s1186_s16  ;;  %v1121_v12 = vld [vmem:[%s2020_s0 + $0x10a] ss:$40 sm:%s871_s5]  }
  0x5d   :  { %575 = vrot.lane.b32.xlu0 %v574_v9, %s1186_s16  ;;  %s754_s16 = smov 3  ;;  %v1117_v9 = vld [vmem:[%s2020_s0 - $0x36] ss:$40 sm:$0x3c]  }
  0x5e   :  { %612 = vrot.lane.b32.xlu1 %v1056_v10, %s1187_s23  ;;  %v1092_v42 = vld [vmem:[%s2020_s0 + $0xff] ss:$40 sm:%s754_s16]   ;;  %v838_v10 = vsel %vm4_vm2, %v1113_v6, %v1112_v3  ;;  %vm316_vm2 = vcmask 753296  }
  0x61   :  { %602 = vrot.lane.b32.xlu0 %v601_v13, %s1187_s23  ;;  %s898_s23 = smov 3 }
  0x62   :  { %630 = vrot.lane.b32.xlu1 %v1060_v15, %s1188_s8 }
  0x65   :  { %623 = vrot.lane.b32.xlu0 %v622_v19, %s1188_s8 }
  0x66   :  { %657 = vrot.lane.b32.xlu1 %v1067_v20, %s1189_s19  ;;  %v1128_v20 = vld [vmem:[%s2020_s0 + $0xfd] ss:$40 sm:%s898_s23]  }
  0x69   :  { %647 = vrot.lane.b32.xlu0 %v646_v25, %s1189_s19  ;;  %s807_s19 = smov 3 }
  0x6a   :  { %684 = vrot.lane.b32.xlu1 %v1074_v26, %s1190_s27  ;;  %v1105_v58 = vld [vmem:[%s2020_s0 + $0x14e] ss:$40 sm:%s807_s19]   ;;  %s844_s19 = smov 3 }
  0x6b   :  { %v812_v63 = vsel %vm19_vm3, %v1106_v59, %v1105_v58  ;;  %v1114_v5 = vld [vmem:[%s2020_s0 + $0x141] ss:$40 sm:%s844_s19]  }
  0x6c   :  { %v817_v2 = vsel %vm24_vm4, %v1107_v0, %v812_v63 }
  0x6d   :  { %674 = vrot.lane.b32.xlu0 %v673_v29, %s1190_s27  ;;  %s852_s27 = smov 3 }
  0x6e   :  { %702 = vrot.lane.b32.xlu1 %v1078_v30, %s1191_s11  ;;  %v1116_v8 = vld [vmem:[%s2020_s0 + $0x15a] ss:$40 sm:%s852_s27]  }
  0x6f   :  { %v857_v13 = vsel %vm19_vm3, %v1117_v9, %v1116_v8  ;;  %vm337_vm3 = vcmask 736896  }
  0x70   :  { %v862_v18 = vsel %vm24_vm4, %v1118_v14, %v857_v13  ;;  %vm361_vm4 = vcmask 687696  }
  0x71   :  { %695 = vrot.lane.b32.xlu0 %v694_v35, %s1191_s11 }
  0x72   :  { %729 = vrot.lane.b32.xlu1 %v1085_v36, %s1192_s22 }
  0x75   :  { %719 = vrot.lane.b32.xlu0 %v718_v41, %s1192_s22 }
  0x76   :  { %756 = vrot.lane.b32.xlu1 %v1092_v42, %s1193_s30  ;;  %v106_v47 = vpop.permute.xlu1 %105  }
  0x77   :  { %931 = vst.msk [vmem:[%s2021_s1 + $0x18] sm:$0x3] %vm95_vm6, %v106_v47   ;;  %v61_v50 = vpop.permute.xlu0 %60  }
  0x78   :  { %919 = vst.msk [vmem:[%s2021_s1 + $0x16] sm:$0x3] %vm42_vm7, %v61_v50  }
  0x79   :  { %746 = vrot.lane.b32.xlu0 %v745_v45, %s1193_s30  ;;  %920 = vst.msk [vmem:[%s2021_s1 + $0xe] sm:$0x3] %vm47_vm8, %v61_v50  }
  0x7a   :  { %774 = vrot.lane.b32.xlu1 %v1096_v48, %s1194_s20  ;;  %930 = vst.msk [vmem:[%s2021_s1 + $0xe] sm:$0x3] %vm90_vm9, %v106_v47  }
  0x7c   :  { %v89_v57 = vpop.permute.xlu1 %88  }
  0x7d   :  { %767 = vrot.lane.b32.xlu0 %v766_v53, %s1194_s20  ;;  %96 = vst.msk [vmem:[%s2021_s1] sm:$0xff] %vm95_vm6, %v89_v57   ;;  %vm409_vm6 = vcmask 654896  }
  0x7e   :  { %801 = vrot.lane.b32.xlu1 %v1103_v54, %s1195_s6 }
  0x7f   :  { %v41_v61 = vpop.permute.xlu0 %40  }
  0x80   :  { %913 = vst.msk [vmem:[%s2021_s1 + $0x28] sm:$0x3] %vm42_vm7, %v41_v61   ;;  %914 = vst.msk [vmem:[%s2021_s1 + $0xe] sm:$0xfc] %vm42_vm7, %v41_v61   ;;  %v136_v1 = vpop.permute.xlu1 %135   ;;  %vm433_vm7 = vcmask 605696  }
  0x81   :  { %915 = vst.msk [vmem:[%s2021_s1 + $0x20] sm:$0x3] %vm47_vm8, %v41_v61   ;;  %916 = vst.msk [vmem:[%s2021_s1 + $0x6] sm:$0xfc] %vm47_vm8, %v41_v61   ;;  %791 = vrot.lane.b32.xlu0 %v790_v60, %s1195_s6  ;;  %vm460_vm8 = vcmask 589296  }
  0x82   :  { %926 = vst.msk [vmem:[%s2021_s1 + $0x20] sm:$0x3] %vm90_vm9, %v89_v57   ;;  %927 = vst.msk [vmem:[%s2021_s1 + $0x6] sm:$0xfc] %vm90_vm9, %v89_v57   ;;  %828 = vrot.lane.b32.xlu1 %v1110_v62, %s1196_s28  ;;  %vm481_vm9 = vcmask 572896  }
  0x83   :  { %938 = vst.msk [vmem:[%s2021_s1 + $0xe] sm:$0x3] %vm127_vm10, %v136_v1   ;;  %v126_v4 = vpop.permute.xlu0 %125  }
  0x84   :  { %935 = vst.msk [vmem:[%s2021_s1 + $0x20] sm:$0x3] %vm127_vm10, %v126_v4   ;;  %936 = vst.msk [vmem:[%s2021_s1 + $0x6] sm:$0xfc] %vm127_vm10, %v126_v4   ;;  %v154_v7 = vpop.permute.xlu1 %153   ;;  %vm505_vm10 = vcmask 523696  }
  0x85   :  { %818 = vrot.lane.b32.xlu0 %v817_v2, %s1196_s28  ;;  %942 = vst.msk [vmem:[%s2021_s1 + $0x18] sm:$0x3] %vm148_vm11, %v154_v7  }
  0x86   :  { %846 = vrot.lane.b32.xlu1 %v1114_v5, %s1197_s18 }
  0x87   :  { %v147_v11 = vpop.permute.xlu0 %146  }
  0x88   :  { %149 = vst.msk [vmem:[%s2021_s1] sm:$0xff] %vm148_vm11, %v147_v11   ;;  %v181_v15 = vpop.permute.xlu1 %180   ;;  %vm532_vm11 = vcmask 507296  }
  0x89   :  { %839 = vrot.lane.b32.xlu0 %v838_v10, %s1197_s18  ;;  %949 = vst.msk [vmem:[%s2021_s1 + $0xe] sm:$0x3] %vm172_vm12, %v181_v15  }
  0x8a   :  { %873 = vrot.lane.b32.xlu1 %v1121_v12, %s1198_s4 }
  0x8b   :  { %v171_v19 = vpop.permute.xlu0 %170  }
  0x8c   :  { %946 = vst.msk [vmem:[%s2021_s1 + $0x20] sm:$0x3] %vm172_vm12, %v171_v19   ;;  %947 = vst.msk [vmem:[%s2021_s1 + $0x6] sm:$0xfc] %vm172_vm12, %v171_v19   ;;  %v199_v23 = vpop.permute.xlu1 %198   ;;  %vm553_vm12 = vcmask 490896  }
  0x8d   :  { %863 = vrot.lane.b32.xlu0 %v862_v18, %s1198_s4  ;;  %953 = vst.msk [vmem:[%s2021_s1 + $0x18] sm:$0x3] %vm193_vm13, %v199_v23  }
  0x8e   :  { %900 = vrot.lane.b32.xlu1 %v1128_v20, %s1199_s14 }
  0x8f   :  { %v192_v25 = vpop.permute.xlu0 %191  }
  0x90   :  { %194 = vst.msk [vmem:[%s2021_s1] sm:$0xff] %vm193_vm13, %v192_v25   ;;  %v226_v26 = vpop.permute.xlu1 %225   ;;  %vm577_vm13 = vcmask 441696  }
  0x91   :  { %890 = vrot.lane.b32.xlu0 %v889_v24, %s1199_s14  ;;  %960 = vst.msk [vmem:[%s2021_s1 + $0x16] sm:$0x3] %vm217_vm14, %v226_v26  }
  0x93   :  { %v216_v27 = vpop.permute.xlu0 %215  }
  0x94   :  { %957 = vst.msk [vmem:[%s2021_s1 + $0x28] sm:$0x3] %vm217_vm14, %v216_v27   ;;  %958 = vst.msk [vmem:[%s2021_s1 + $0xe] sm:$0xfc] %vm217_vm14, %v216_v27   ;;  %v253_v28 = vpop.permute.xlu1 %252   ;;  %vm604_vm14 = vcmask 425296  }
  0x95   :  { %967 = vst.msk [vmem:[%s2021_s1 + $0xe] sm:$0x3] %vm244_vm15, %v253_v28  }
  0x97   :  { %v243_v29 = vpop.permute.xlu0 %242  }
  0x98   :  { %964 = vst.msk [vmem:[%s2021_s1 + $0x20] sm:$0x3] %vm244_vm15, %v243_v29   ;;  %965 = vst.msk [vmem:[%s2021_s1 + $0x6] sm:$0xfc] %vm244_vm15, %v243_v29   ;;  %v271_v30 = vpop.permute.xlu1 %270   ;;  %vm625_vm15 = vcmask 408896  }
  0x99   :  { %971 = vst.msk [vmem:[%s2021_s1 + $0x18] sm:$0x3] %vm265_vm0, %v271_v30  }
  0x9b   :  { %v264_v31 = vpop.permute.xlu0 %263  }
  0x9c   :  { %266 = vst.msk [vmem:[%s2021_s1] sm:$0xff] %vm265_vm0, %v264_v31   ;;  %v298_v32 = vpop.permute.xlu1 %297   ;;  %vm649_vm0 = vcmask 359696  }
  0x9d   :  { %978 = vst.msk [vmem:[%s2021_s1 + $0x16] sm:$0x3] %vm289_vm1, %v298_v32  }
  0x9f   :  { %v288_v33 = vpop.permute.xlu0 %287  }
  0xa0   :  { %975 = vst.msk [vmem:[%s2021_s1 + $0x28] sm:$0x3] %vm289_vm1, %v288_v33   ;;  %976 = vst.msk [vmem:[%s2021_s1 + $0xe] sm:$0xfc] %vm289_vm1, %v288_v33   ;;  %v325_v34 = vpop.permute.xlu1 %324   ;;  %vm676_vm1 = vcmask 343296  }
  0xa1   :  { %985 = vst.msk [vmem:[%s2021_s1 + $0xe] sm:$0x3] %vm316_vm2, %v325_v34  }
  0xa3   :  { %v315_v35 = vpop.permute.xlu0 %314  }
  0xa4   :  { %982 = vst.msk [vmem:[%s2021_s1 + $0x20] sm:$0x3] %vm316_vm2, %v315_v35   ;;  %983 = vst.msk [vmem:[%s2021_s1 + $0x6] sm:$0xfc] %vm316_vm2, %v315_v35   ;;  %v343_v36 = vpop.permute.xlu1 %342   ;;  %vm697_vm2 = vcmask 326896  }
  0xa5   :  { %989 = vst.msk [vmem:[%s2021_s1 + $0x18] sm:$0x3] %vm337_vm3, %v343_v36  }
  0xa7   :  { %v336_v37 = vpop.permute.xlu0 %335  }
  0xa8   :  { %338 = vst.msk [vmem:[%s2021_s1] sm:$0xff] %vm337_vm3, %v336_v37   ;;  %v370_v38 = vpop.permute.xlu1 %369   ;;  %vm721_vm3 = vcmask 277696  }
  0xa9   :  { %996 = vst.msk [vmem:[%s2021_s1 + $0x16] sm:$0x3] %vm361_vm4, %v370_v38  }
  0xab   :  { %v360_v39 = vpop.permute.xlu0 %359  }
  0xac   :  { %993 = vst.msk [vmem:[%s2021_s1 + $0x28] sm:$0x3] %vm361_vm4, %v360_v39   ;;  %994 = vst.msk [vmem:[%s2021_s1 + $0xe] sm:$0xfc] %vm361_vm4, %v360_v39   ;;  %v397_v40 = vpop.permute.xlu1 %396   ;;  %vm748_vm4 = vcmask 261296  }
  0xad   :  { %1003 = vst.msk [vmem:[%s2021_s1 + $0xe] sm:$0x3] %vm388_vm5, %v397_v40  }
  0xaf   :  { %v387_v41 = vpop.permute.xlu0 %386  }
  0xb0   :  { %1000 = vst.msk [vmem:[%s2021_s1 + $0x20] sm:$0x3] %vm388_vm5, %v387_v41   ;;  %1001 = vst.msk [vmem:[%s2021_s1 + $0x6] sm:$0xfc] %vm388_vm5, %v387_v41   ;;  %v415_v42 = vpop.permute.xlu1 %414   ;;  %vm769_vm5 = vcmask 244896  }
  0xb1   :  { %1007 = vst.msk [vmem:[%s2021_s1 + $0x18] sm:$0x3] %vm409_vm6, %v415_v42  }
  0xb3   :  { %v408_v43 = vpop.permute.xlu0 %407  }
  0xb4   :  { %410 = vst.msk [vmem:[%s2021_s1] sm:$0xff] %vm409_vm6, %v408_v43   ;;  %v442_v44 = vpop.permute.xlu1 %441   ;;  %vm793_vm6 = vcmask 195696  }
  0xb5   :  { %1014 = vst.msk [vmem:[%s2021_s1 + $0x16] sm:$0x3] %vm433_vm7, %v442_v44  }
  0xb7   :  { %v432_v45 = vpop.permute.xlu0 %431  }
  0xb8   :  { %1011 = vst.msk [vmem:[%s2021_s1 + $0x28] sm:$0x3] %vm433_vm7, %v432_v45   ;;  %1012 = vst.msk [vmem:[%s2021_s1 + $0xe] sm:$0xfc] %vm433_vm7, %v432_v45   ;;  %v469_v46 = vpop.permute.xlu1 %468   ;;  %vm820_vm7 = vcmask 179296  }
  0xb9   :  { %1021 = vst.msk [vmem:[%s2021_s1 + $0xe] sm:$0x3] %vm460_vm8, %v469_v46  }
  0xbb   :  { %v459_v47 = vpop.permute.xlu0 %458  }
  0xbc   :  { %1018 = vst.msk [vmem:[%s2021_s1 + $0x20] sm:$0x3] %vm460_vm8, %v459_v47   ;;  %1019 = vst.msk [vmem:[%s2021_s1 + $0x6] sm:$0xfc] %vm460_vm8, %v459_v47   ;;  %v487_v48 = vpop.permute.xlu1 %486   ;;  %vm841_vm8 = vcmask 162896  }
  0xbd   :  { %1025 = vst.msk [vmem:[%s2021_s1 + $0x18] sm:$0x3] %vm481_vm9, %v487_v48  }
  0xbf   :  { %v480_v49 = vpop.permute.xlu0 %479  }
  0xc0   :  { %482 = vst.msk [vmem:[%s2021_s1] sm:$0xff] %vm481_vm9, %v480_v49   ;;  %v514_v50 = vpop.permute.xlu1 %513   ;;  %vm865_vm9 = vcmask 113696  }
  0xc1   :  { %1032 = vst.msk [vmem:[%s2021_s1 + $0x16] sm:$0x3] %vm505_vm10, %v514_v50  }
  0xc3   :  { %v504_v51 = vpop.permute.xlu0 %503  }
  0xc4   :  { %1029 = vst.msk [vmem:[%s2021_s1 + $0x28] sm:$0x3] %vm505_vm10, %v504_v51   ;;  %1030 = vst.msk [vmem:[%s2021_s1 + $0xe] sm:$0xfc] %vm505_vm10, %v504_v51   ;;  %v541_v52 = vpop.permute.xlu1 %540   ;;  %vm892_vm10 = vcmask 97296  }
  0xc5   :  { %1039 = vst.msk [vmem:[%s2021_s1 + $0xe] sm:$0x3] %vm532_vm11, %v541_v52  }
  0xc7   :  { %v531_v53 = vpop.permute.xlu0 %530  }
  0xc8   :  { %1036 = vst.msk [vmem:[%s2021_s1 + $0x20] sm:$0x3] %vm532_vm11, %v531_v53   ;;  %1037 = vst.msk [vmem:[%s2021_s1 + $0x6] sm:$0xfc] %vm532_vm11, %v531_v53   ;;  %v559_v54 = vpop.permute.xlu1 %558  }
  0xc9   :  { %1043 = vst.msk [vmem:[%s2021_s1 + $0x18] sm:$0x3] %vm553_vm12, %v559_v54  }
  0xcb   :  { %v552_v55 = vpop.permute.xlu0 %551  }
  0xcc   :  { %554 = vst.msk [vmem:[%s2021_s1] sm:$0xff] %vm553_vm12, %v552_v55   ;;  %v586_v56 = vpop.permute.xlu1 %585  }
  0xcd   :  { %1050 = vst.msk [vmem:[%s2021_s1 + $0x16] sm:$0x3] %vm577_vm13, %v586_v56  }
  0xcf   :  { %v576_v57 = vpop.permute.xlu0 %575  }
  0xd0   :  { %1047 = vst.msk [vmem:[%s2021_s1 + $0x28] sm:$0x3] %vm577_vm13, %v576_v57   ;;  %1048 = vst.msk [vmem:[%s2021_s1 + $0xe] sm:$0xfc] %vm577_vm13, %v576_v57   ;;  %v613_v58 = vpop.permute.xlu1 %612  }
  0xd1   :  { %1057 = vst.msk [vmem:[%s2021_s1 + $0xe] sm:$0x3] %vm604_vm14, %v613_v58  }
  0xd3   :  { %v603_v59 = vpop.permute.xlu0 %602  }
  0xd4   :  { %1054 = vst.msk [vmem:[%s2021_s1 + $0x20] sm:$0x3] %vm604_vm14, %v603_v59   ;;  %1055 = vst.msk [vmem:[%s2021_s1 + $0x6] sm:$0xfc] %vm604_vm14, %v603_v59   ;;  %v631_v60 = vpop.permute.xlu1 %630  }
  0xd5   :  { %1061 = vst.msk [vmem:[%s2021_s1 + $0x18] sm:$0x3] %vm625_vm15, %v631_v60  }
  0xd7   :  { %v624_v61 = vpop.permute.xlu0 %623  }
  0xd8   :  { %626 = vst.msk [vmem:[%s2021_s1] sm:$0xff] %vm625_vm15, %v624_v61   ;;  %v658_v62 = vpop.permute.xlu1 %657  }
  0xd9   :  { %1068 = vst.msk [vmem:[%s2021_s1 + $0x16] sm:$0x3] %vm649_vm0, %v658_v62  }
  0xdb   :  { %v648_v63 = vpop.permute.xlu0 %647  }
  0xdc   :  { %1065 = vst.msk [vmem:[%s2021_s1 + $0x28] sm:$0x3] %vm649_vm0, %v648_v63   ;;  %1066 = vst.msk [vmem:[%s2021_s1 + $0xe] sm:$0xfc] %vm649_vm0, %v648_v63   ;;  %v685_v0 = vpop.permute.xlu1 %684  }
  0xdd   :  { %1075 = vst.msk [vmem:[%s2021_s1 + $0xe] sm:$0x3] %vm676_vm1, %v685_v0  }
  0xdf   :  { %v675_v1 = vpop.permute.xlu0 %674  }
  0xe0   :  { %1072 = vst.msk [vmem:[%s2021_s1 + $0x20] sm:$0x3] %vm676_vm1, %v675_v1   ;;  %1073 = vst.msk [vmem:[%s2021_s1 + $0x6] sm:$0xfc] %vm676_vm1, %v675_v1   ;;  %v703_v2 = vpop.permute.xlu1 %702  }
  0xe1   :  { %1079 = vst.msk [vmem:[%s2021_s1 + $0x18] sm:$0x3] %vm697_vm2, %v703_v2  }
  0xe3   :  { %v696_v3 = vpop.permute.xlu0 %695  }
  0xe4   :  { %698 = vst.msk [vmem:[%s2021_s1] sm:$0xff] %vm697_vm2, %v696_v3   ;;  %v730_v4 = vpop.permute.xlu1 %729  }
  0xe5   :  { %1086 = vst.msk [vmem:[%s2021_s1 + $0x16] sm:$0x3] %vm721_vm3, %v730_v4  }
  0xe7   :  { %v720_v5 = vpop.permute.xlu0 %719  }
  0xe8   :  { %1083 = vst.msk [vmem:[%s2021_s1 + $0x28] sm:$0x3] %vm721_vm3, %v720_v5   ;;  %1084 = vst.msk [vmem:[%s2021_s1 + $0xe] sm:$0xfc] %vm721_vm3, %v720_v5   ;;  %v757_v6 = vpop.permute.xlu1 %756  }
  0xe9   :  { %1093 = vst.msk [vmem:[%s2021_s1 + $0xe] sm:$0x3] %vm748_vm4, %v757_v6  }
  0xeb   :  { %v747_v7 = vpop.permute.xlu0 %746  }
  0xec   :  { %1090 = vst.msk [vmem:[%s2021_s1 + $0x20] sm:$0x3] %vm748_vm4, %v747_v7   ;;  %1091 = vst.msk [vmem:[%s2021_s1 + $0x6] sm:$0xfc] %vm748_vm4, %v747_v7   ;;  %v775_v8 = vpop.permute.xlu1 %774  }
  0xed   :  { %1097 = vst.msk [vmem:[%s2021_s1 + $0x18] sm:$0x3] %vm769_vm5, %v775_v8  }
  0xef   :  { %v768_v9 = vpop.permute.xlu0 %767  }
  0xf0   :  { %770 = vst.msk [vmem:[%s2021_s1] sm:$0xff] %vm769_vm5, %v768_v9   ;;  %v802_v10 = vpop.permute.xlu1 %801  }
  0xf1   :  { %1104 = vst.msk [vmem:[%s2021_s1 + $0x16] sm:$0x3] %vm793_vm6, %v802_v10  }
  0xf3   :  { %v792_v11 = vpop.permute.xlu0 %791  }
  0xf4   :  { %1101 = vst.msk [vmem:[%s2021_s1 + $0x28] sm:$0x3] %vm793_vm6, %v792_v11   ;;  %1102 = vst.msk [vmem:[%s2021_s1 + $0xe] sm:$0xfc] %vm793_vm6, %v792_v11   ;;  %v829_v12 = vpop.permute.xlu1 %828  }
  0xf5   :  { %1111 = vst.msk [vmem:[%s2021_s1 + $0xe] sm:$0x3] %vm820_vm7, %v829_v12  }
  0xf7   :  { %v819_v13 = vpop.permute.xlu0 %818  }
  0xf8   :  { %1108 = vst.msk [vmem:[%s2021_s1 + $0x20] sm:$0x3] %vm820_vm7, %v819_v13   ;;  %1109 = vst.msk [vmem:[%s2021_s1 + $0x6] sm:$0xfc] %vm820_vm7, %v819_v13   ;;  %v847_v14 = vpop.permute.xlu1 %846  }
  0xf9   :  { %1115 = vst.msk [vmem:[%s2021_s1 + $0x18] sm:$0x3] %vm841_vm8, %v847_v14  }
  0xfb   :  { %v840_v15 = vpop.permute.xlu0 %839  }
  0xfc   :  { %842 = vst.msk [vmem:[%s2021_s1] sm:$0xff] %vm841_vm8, %v840_v15   ;;  %v874_v16 = vpop.permute.xlu1 %873  }
  0xfd   :  { %1122 = vst.msk [vmem:[%s2021_s1 + $0x16] sm:$0x3] %vm865_vm9, %v874_v16  }
  0xff   :  { %v864_v17 = vpop.permute.xlu0 %863  }
 0x100   :  { %1119 = vst.msk [vmem:[%s2021_s1 + $0x28] sm:$0x3] %vm865_vm9, %v864_v17   ;;  %1120 = vst.msk [vmem:[%s2021_s1 + $0xe] sm:$0xfc] %vm865_vm9, %v864_v17   ;;  %v901_v18 = vpop.permute.xlu1 %900  }
 0x101   :  { %1129 = vst.msk [vmem:[%s2021_s1 + $0xe] sm:$0x3] %vm892_vm10, %v901_v18  }
 0x103   :  { %v891_v19 = vpop.permute.xlu0 %890  }
 0x104   :  { %1126 = vst.msk [vmem:[%s2021_s1 + $0x20] sm:$0x3] %vm892_vm10, %v891_v19   ;;  %1127 = vst.msk [vmem:[%s2021_s1 + $0x6] sm:$0xfc] %vm892_vm10, %v891_v19  }

// kernel: cnn_fc_forward.1
= control target key start
LH: loop header
LB: loop body
LE: loop exit
PB: predicated region body
PF: predicated region fallthrough
CT: control target
= control target key end

     0   :  { %vm57_vm0 = vcmask 293888   ;;  %v5094_v3 = vlaneseq  ;;  %vm112_vm1 = vcmask 1043456   ;;  %v3232_v12 = vmov -inf   ;;  %s5083_s0 = inlined_call_operand.vmem [shape: f32[144,36], index: 0, kind: input, shape index: {}]   ;;  %s5084_s1 = inlined_call_operand.vmem [shape: f32[36,50], index: 1, kind: input, shape index: {}]   ;;  %s5085_s2 = inlined_call_operand.<no memory space> [shape: f32[1,1], index: 2, kind: input, shape index: {}]   ;;  %s5086_s3 = inlined_call_operand.vmem [shape: f32[144,50], index: 3, kind: input, shape index: {}]   ;;  %s5087_s4 = inlined_call_operand.vmem [shape: f32[50,360], index: 4, kind: input, shape index: {}]   ;;  %s5088_s5 = inlined_call_operand.vmem [shape: f32[360,10], index: 5, kind: input, shape index: {}]   ;;  %s5089_s6 = inlined_call_operand.vmem [shape: f32[4,144], index: 6, kind: input, shape index: {}]   ;;  %s5090_s7 = inlined_call_operand.vmem [shape: f32[1,10], index: 7, kind: input, shape index: {}]   ;;  %s5091_s8 = inlined_call_operand.vmem [shape: f32[144,50], index: 8, kind: output, shape index: {0}]   ;;  %s5092_s9 = inlined_call_operand.hbm [shape: f32[4,10], index: 9, kind: output, shape index: {1}]  }
   0x1   :  { %v51_v0 = vld [vmem:[%s5084_s1] sm:$0xff]  ;;  %v52_v1 = vld [vmem:[%s5084_s1 + $0x8] sm:$0xff]  ;;  %v53_v2 = vld [vmem:[%s5084_s1 + $0x10] sm:$0xff]  ;;  %v3318_v13 = vsel %vm57_vm0, 0.0, %v3232_v12 }
   0x2   :  { %v3035_v4 = vpack.c.bf16 %v52_v1, %v51_v0  ;;  %v54_v5 = vld [vmem:[%s5084_s1 + $0x18] sm:$0xff]  ;;  %v33_v6 = vld [vmem:[%s5083_s0] sm:$0xff]  ;;  %v3304_v8 = vshrl.u32 %v5094_v3, 7 }
   0x3   :  { %v3039_v7 = vpack.c.bf16 %v54_v5, %v53_v2  ;;  %2914 = vmatprep.mubr.msk.f32.mxu0 %vm57_vm0, %v33_v6  ;;  %v55_v10 = vld [vmem:[%s5084_s1 + $0x20] sm:$0xf]  ;;  %v623_v15 = vsel %vm57_vm0, %v33_v6, -inf }
   0x4   :  { %3036 = vmatprep.subr.bf16.mxu0 %v3035_v4  ;;  %v3307_v9 = vadd.s32 32, %v3304_v8  ;;  %v37_v11 = vld [vmem:[%s5083_s0 + $0x20] sm:$0xff] }
   0x5   :  { %3038 = vmatpush3.bf16.msra.mxu0 %v3035_v4  ;;  %v41_v17 = vld [vmem:[%s5083_s0 + $0x40] sm:$0xff] }
   0x6   :  { %3040 = vmatprep.subr.bf16.mxu0 %v3039_v7  ;;  %vm312_vm2 = vcmp.ge.s32.totalorder %v3307_v9, 36  ;;  %v851_v20 = vsel %vm57_vm0, %v41_v17, -inf }
   0x7   :  { %vm3322_vm3 = vmneg %vm312_vm2  ;;  %v825_v16 = vsel %vm312_vm2, %v37_v11, 0.0 }
   0x8   :  { %v609_v18 = vsel %vm3322_vm3, %v37_v11, 0.0  ;;  %v843_v19 = vsel %vm57_vm0, %v825_v16, -inf }
   0x9   :  { %3042 = vmatpush3.bf16.msra.mxu0 %v3039_v7 }
   0xa   :  { %16 = vsyncpa [#allocation4], 0  ;;  %2912 = vmatprep.subr.msk.mxu0 %vm112_vm1, %v55_v10  ;;  %v627_v21 = vsel %vm57_vm0, %v609_v18, -inf  ;;  %v844_v22 = vmax.f32 %v3318_v13, %v843_v19  ;;  %v34_v24 = vld [vmem:[%s5083_s0 + $0x8] sm:$0xff]  ;;  %v35_v25 = vld [vmem:[%s5083_s0 + $0x10] sm:$0xff]  ;;  %v3420_v40 = vadd.s32 104, %v3304_v8 }
   0xb   :  { %v628_v23 = vmax.f32 %v623_v15, %v627_v21  ;;  %v36_v27 = vld [vmem:[%s5083_s0 + $0x18] sm:$0xff]  ;;  %v38_v28 = vld [vmem:[%s5083_s0 + $0x28] sm:$0xff]  ;;  %v39_v29 = vld [vmem:[%s5083_s0 + $0x30] sm:$0xff]  ;;  %v624_v42 = vsel %vm57_vm0, %v34_v24, -inf  ;;  %v5093_v43 = vmov 0   ;;  %v625_v45 = vsel %vm57_vm0, %v35_v25, -inf }
   0xc   :  { %v3345_v26 = vmax.f32 %v844_v22, %v851_v20  ;;  %v40_v30 = vld [vmem:[%s5083_s0 + $0x38] sm:$0xff]  ;;  %v42_v31 = vld [vmem:[%s5083_s0 + $0x48] sm:$0xff]  ;;  %v43_v32 = vld [vmem:[%s5083_s0 + $0x50] sm:$0xff]  ;;  %vm411_vm4 = vcmp.ge.s32.totalorder %v3420_v40, 108  ;;  %v845_v41 = vsel %vm57_vm0, %v38_v28, -inf  ;;  %v626_v46 = vsel %vm57_vm0, %v36_v27, -inf }
   0xd   :  { %2913 = vmatpush3.msk.msra.mxu0 %vm112_vm1, %v55_v10  ;;  %v44_v33 = vld [vmem:[%s5083_s0 + $0x58] sm:$0xff]  ;;  %v45_v34 = vld [vmem:[%s5083_s0 + $0x60] sm:$0xff]  ;;  %v3387_v35 = vld [vmem:[%s5083_s0 + $0x68] sm:$0xff]  ;;  %v429_v44 = vsel %vm411_vm4, 1, %v5093_v43  ;;  %v846_v47 = vmax.f32 %v3318_v13, %v845_v41  ;;  %v630_v48 = vmax.f32 %v624_v42, %v3318_v13  ;;  %v847_v49 = vsel %vm57_vm0, %v39_v29, -inf }
   0xe   :  { %2915 = vmatmul.mubr.msk.f32.vlgmr.msra.gmra.mrb[0].mxu0 %vm57_vm0, %v34_v24  ;;  %v3392_v36 = vld [vmem:[%s5083_s0 + $0x70] sm:$0xff]  ;;  %v3401_v37 = vld [vmem:[%s5083_s0 + $0x78] sm:$0xff]  ;;  %v3406_v38 = vld [vmem:[%s5083_s0 + $0x80] sm:$0xff]  ;;  %v849_v50 = vsel %vm57_vm0, %v40_v30, -inf  ;;  %v3432_v51 = vadd.s32 2, %v429_v44  ;;  %v632_v52 = vmax.f32 %v625_v45, %v3318_v13  ;;  %v1069_v53 = vsel %vm57_vm0, %v42_v31, -inf }
   0xf   :  { %2917 = vmatprep.mubr.msk.f32.mxu0 %vm57_vm0, %v35_v25  ;;  %v3415_v39 = vld [vmem:[%s5083_s0 + $0x88] sm:$0xff]  ;;  %v636_v54 = vmax.f32 %v628_v23, %v3318_v13  ;;  %v634_v55 = vmax.f32 %v626_v46, %v3318_v13  ;;  %v1071_v56 = vsel %vm57_vm0, %v43_v32, -inf  ;;  %v1073_v57 = vsel %vm57_vm0, %v44_v33, -inf }
  0x10   :  { %v854_v58 = vmax.f32 %v846_v47, %v3318_v13  ;;  %v848_v59 = vmax.f32 %v3318_v13, %v847_v49  ;;  %v850_v60 = vmax.f32 %v3318_v13, %v849_v50  ;;  %v1075_v61 = vsel %vm57_vm0, %v45_v34, -inf }
  0x11   :  { %v638_v62 = vmax.f32 %v630_v48, %v3318_v13  ;;  %v1070_v63 = vmax.f32 %v3318_v13, %v1069_v53  ;;  %vm718_vm5 = vcmp.eq.s32.totalorder %v3432_v51, 1  ;;  %vm501_vm6 = vcmp.eq.s32.totalorder %v3432_v51, 0 }
  0x12   :  { %2918 = vmatmul.mubr.msk.f32.gmra.mrb[2].mxu0 %vm57_vm0, %v36_v27  ;;  %v1072_v0 = vmax.f32 %v3318_v13, %v1071_v56  ;;  %v1074_v1 = vmax.f32 %v3318_v13, %v1073_v57  ;;  %v834_v2 = vsel %vm718_vm5, %v3387_v35, 0.0  ;;  %v618_v4 = vsel %vm501_vm6, %v3387_v35, 0.0 }
  0x13   :  { %2920 = vmatprep.mubr.msk.f32.mxu0 %vm57_vm0, %v37_v11  ;;  %v644_v5 = vmax.f32 %v636_v54, %v3318_v13  ;;  %v1076_v6 = vmax.f32 %v3318_v13, %v1075_v61  ;;  %v861_v7 = vsel %vm57_vm0, %v834_v2, -inf  ;;  %v645_v10 = vsel %vm57_vm0, %v618_v4, -inf }
  0x14   :  { %v856_v11 = vmax.f32 %v848_v59, %v3318_v13  ;;  %v858_v15 = vmax.f32 %v850_v60, %v3318_v13  ;;  %v860_v16 = vmax.f32 %v3345_v26, %v3318_v13  ;;  %v640_v18 = vmax.f32 %v632_v52, %v3318_v13 }
  0x15   :  { %v642_v19 = vmax.f32 %v634_v55, %v3318_v13  ;;  %v646_v20 = vmax.f32 %v638_v62, %v645_v10  ;;  %vm934_vm7 = vcmp.eq.s32.totalorder %v3432_v51, 2  ;;  %v652_v27 = vmax.f32 %v644_v5, %v3318_v13 }
  0x16   :  { %2921 = vmatmul.mubr.msk.f32.gmra.mrb[4].mxu0 %vm57_vm0, %v38_v28  ;;  %v864_v21 = vmax.f32 %v856_v11, %v3318_v13  ;;  %v866_v22 = vmax.f32 %v858_v15, %v3318_v13  ;;  %v868_v23 = vmax.f32 %v860_v16, %v3318_v13  ;;  %v648_v25 = vmax.f32 %v640_v18, %v3318_v13 }
  0x17   :  { %2923 = vmatprep.mubr.msk.f32.mxu0 %vm57_vm0, %v39_v29  ;;  %v650_v26 = vmax.f32 %v642_v19, %v3318_v13  ;;  %v654_v28 = vmax.f32 %v646_v20, %v3318_v13  ;;  %v1080_v44 = vmax.f32 %v1072_v0, %v3318_v13  ;;  %v1082_v45 = vmax.f32 %v1074_v1, %v3318_v13 }
  0x18   :  { %vm1150_vm8 = vcmp.eq.s32.totalorder %v3432_v51, 3  ;;  %v1084_v47 = vmax.f32 %v1076_v6, %v3318_v13  ;;  %v1295_v52 = vsel %vm57_vm0, %v3392_v36, -inf  ;;  %v1297_v53 = vsel %vm57_vm0, %v3401_v37, -inf }
  0x19   :  { %v1088_v49 = vmax.f32 %v1080_v44, %v1082_v45  ;;  %v1266_v50 = vsel %vm1150_vm8, %v3387_v35, 0.0  ;;  %v1299_v54 = vsel %vm57_vm0, %v3406_v38, -inf  ;;  %v1301_v56 = vsel %vm57_vm0, %v3415_v39, -inf }
  0x1a   :  { %2924 = vmatmul.mubr.msk.f32.gmra.mrb[6].mxu0 %vm57_vm0, %v40_v30  ;;  %v872_v30 = vmax.f32 %v864_v21, %v866_v22  ;;  %v1293_v55 = vsel %vm57_vm0, %v1266_v50, -inf  ;;  %v1300_v60 = vmax.f32 %v3318_v13, %v1299_v54  ;;  %vm560_vm9 = vcmask 408576  }
  0x1b   :  { %2926 = vmatprep.mubr.msk.f32.mxu0 %vm57_vm0, %v41_v17  ;;  %v862_v17 = vmax.f32 %v854_v58, %v861_v7  ;;  %v1294_v58 = vmax.f32 %v3318_v13, %v1293_v55  ;;  %vm1591_vm10 = vcmask 1041408  }
  0x1d   :  { %v870_v24 = vmax.f32 %v862_v17, %v3318_v13 }
  0x1e   :  { %2927 = vmatmul.mubr.msk.f32.gmra.mrb[8].mxu0 %vm57_vm0, %v42_v31  ;;  %v1050_v31 = vsel %vm934_vm7, %v3387_v35, 0.0 }
  0x1f   :  { %2929 = vmatprep.mubr.msk.f32.mxu0 %vm57_vm0, %v43_v32  ;;  %v871_v29 = vmax.f32 %v868_v23, %v870_v24  ;;  %v655_v32 = vmax.f32 %v652_v27, %v654_v28  ;;  %v3549_v23 = vsel %vm560_vm9, 0.0, %v3232_v12 }
  0x21   :  { %v3479_v41 = vmax.f32 %v871_v29, %v872_v30 }
  0x22   :  { %2930 = vmatmul.mubr.msk.f32.gmra.mrb[10].mxu0 %vm57_vm0, %v44_v33  ;;  %v656_v33 = vmax.f32 %v648_v25, %v650_v26 }
  0x23   :  { %2932 = vmatprep.mubr.msk.f32.mxu0 %vm57_vm0, %v45_v34  ;;  %v1077_v34 = vsel %vm57_vm0, %v1050_v31, -inf }
  0x24   :  { %v1078_v42 = vmax.f32 %v1070_v63, %v1077_v34  ;;  %v3484_v46 = vmax.f32 %v655_v32, %v656_v33 }
  0x26   :  { %2933 = vmatmul.mubr.msk.f32.gmra.mrb[12].mxu0 %vm57_vm0, %v3387_v35  ;;  %v1086_v48 = vmax.f32 %v1078_v42, %v3318_v13  ;;  %v1296_v35 = vmax.f32 %v3318_v13, %v1295_v52 }
  0x27   :  { %2935 = vmatprep.mubr.msk.f32.mxu0 %vm57_vm0, %v3392_v36  ;;  %v1298_v36 = vmax.f32 %v3318_v13, %v1297_v53 }
  0x28   :  { %v1087_v57 = vmax.f32 %v1084_v47, %v1086_v48 }
  0x29   :  { %v3506_v61 = vmax.f32 %v1296_v35, %v1298_v36 }
  0x2a   :  { %2936 = vmatmul.mubr.msk.f32.gmra.mrb[14].mxu0 %vm57_vm0, %v3401_v37  ;;  %v3501_v59 = vmax.f32 %v1087_v57, %v1088_v49  ;;  %v1302_v37 = vmax.f32 %v1294_v58, %v1301_v56 }
  0x2b   :  { %2938 = vmatprep.mubr.msk.f32.mxu0 %vm57_vm0, %v3406_v38 }
  0x2c   :  { %v3508_v38 = vmax.f32 %v1300_v60, %v1302_v37 }
  0x2e   :  { %2939 = vmatmul.mubr.msk.f32.gmra.mrb[16].mxu0 %vm57_vm0, %v3415_v39  ;;  %v1305_v62 = vmax.f32 %v3508_v38, %v3506_v61  ;;  %v1523_v61 = vld [vmem:[%s5087_s4 + $0x38] sm:$0xff]  ;;  %v1526_v38 = vld [vmem:[%s5087_s4 + $0x50] sm:$0xff] }
  0xe1   :  { %v3512_v39 = vpop.f32.mrb[0].mxu0 }
  0xe2   :  { %v3514_v63 = vpop.f32.mrb[1].mxu0  ;;  %v272_v7 = vand.u32 2147483647, %v3512_v39 }
  0xe3   :  { %v271_v10 = vand.u32 2147483647, %v3514_v63 }
  0xe4   :  { %v562_v25 = vsel %vm560_vm9, %v272_v7, -inf }
  0xe5   :  { %v3516_v0 = vpop.f32.mrb[2].mxu0  ;;  %v561_v29 = vsel %vm560_vm9, %v271_v10, -inf  ;;  %v568_v44 = vmax.f32 %v562_v25, %v3549_v23 }
  0xe6   :  { %v3518_v1 = vpop.f32.mrb[3].mxu0  ;;  %v274_v13 = vand.u32 2147483647, %v3516_v0 }
  0xe7   :  { %v273_v4 = vand.u32 2147483647, %v3518_v1  ;;  %v576_v35 = vmax.f32 %v568_v44, %v3549_v23 }
  0xe8   :  { %v564_v16 = vsel %vm560_vm9, %v274_v13, -inf }
  0xe9   :  { %v3520_v2 = vpop.f32.mrb[4].mxu0  ;;  %v563_v17 = vsel %vm560_vm9, %v273_v4, -inf  ;;  %v572_v26 = vmax.f32 %v564_v16, %v3549_v23 }
  0xea   :  { %v202_v5 = vpop.f32.mrb[5].mxu0  ;;  %v276_v18 = vand.u32 2147483647, %v3520_v2  ;;  %v570_v27 = vmax.f32 %v563_v17, %v3549_v23 }
  0xeb   :  { %v3524_v6 = vand.u32 2147483647, %v202_v5  ;;  %v580_v45 = vmax.f32 %v572_v26, %v3549_v23 }
  0xec   :  { %v783_v12 = vsel %vm560_vm9, %v276_v18, -inf  ;;  %v578_v47 = vmax.f32 %v570_v27, %v3549_v23 }
  0xed   :  { %v546_v11 = vsel %vm3322_vm3, %v3524_v6, 0.0  ;;  %v3531_v15 = vpop.f32.mrb[6].mxu0  ;;  %v763_v20 = vsel %vm312_vm2, %v3524_v6, 0.0  ;;  %v784_v48 = vmax.f32 %v3549_v23, %v783_v12  ;;  %v588_v5 = vmax.f32 %v580_v45, %v3549_v23 }
  0xee   :  { %v3540_v19 = vpop.f32.mrb[7].mxu0  ;;  %v278_v21 = vand.u32 2147483647, %v3531_v15  ;;  %v565_v24 = vsel %vm560_vm9, %v546_v11, -inf  ;;  %v781_v30 = vsel %vm560_vm9, %v763_v20, -inf  ;;  %v586_v37 = vmax.f32 %v578_v47, %v3549_v23 }
  0xef   :  { %v277_v22 = vand.u32 2147483647, %v3540_v19  ;;  %v566_v32 = vmax.f32 %v561_v29, %v565_v24  ;;  %v782_v55 = vmax.f32 %v3549_v23, %v781_v30  ;;  %v792_v36 = vmax.f32 %v784_v48, %v3549_v23  ;;  %v1453_v19 = vld [vmem:[%s5086_s3 + $0x48] sm:$0xff] }
  0xf0   :  { %v787_v33 = vsel %vm560_vm9, %v278_v21, -inf  ;;  %v594_v48 = vmax.f32 %v586_v37, %v588_v5 }
  0xf1   :  { %v3557_v28 = vpop.f32.mrb[8].mxu0  ;;  %v785_v34 = vsel %vm560_vm9, %v277_v22, -inf  ;;  %v788_v52 = vmax.f32 %v3549_v23, %v787_v33  ;;  %v574_v57 = vmax.f32 %v566_v32, %v3549_v23 }
  0xf2   :  { %v3566_v31 = vpop.f32.mrb[9].mxu0  ;;  %v786_v53 = vmax.f32 %v3549_v23, %v785_v34  ;;  %v5098_v54 = vand.u32 2147483647, %v3557_v28 }
  0xf3   :  { %v279_v42 = vand.u32 2147483647, %v3566_v31  ;;  %v796_v11 = vmax.f32 %v788_v52, %v3549_v23  ;;  %v582_v29 = vmax.f32 %v574_v57, %v3549_v23  ;;  %v5104_v31 = vand.u32 2147483647, %v3557_v28 }
  0xf4   :  { %v794_v16 = vmax.f32 %v786_v53, %v3549_v23  ;;  %v1007_v17 = vsel %vm560_vm9, %v5098_v54, -inf }
  0xf5   :  { %v789_v49 = vsel %vm560_vm9, %v279_v42, -inf  ;;  %v3582_v50 = vpop.f32.mrb[10].mxu0  ;;  %v1008_v34 = vmax.f32 %v3549_v23, %v1007_v17  ;;  %v804_v57 = vmax.f32 %v796_v11, %v3549_v23  ;;  %v590_v17 = vmax.f32 %v582_v29, %v3549_v23 }
  0xf6   :  { %v3588_v56 = vpop.f32.mrb[11].mxu0  ;;  %v790_v58 = vmax.f32 %v782_v55, %v789_v49  ;;  %v5096_v25 = vand.u32 2147483647, %v3582_v50  ;;  %v802_v55 = vmax.f32 %v794_v16, %v3549_v23 }
  0xf7   :  { %v5097_v26 = vand.u32 2147483647, %v3588_v56 }
  0xf8   :  { %v798_v12 = vmax.f32 %v790_v58, %v3549_v23  ;;  %v1011_v58 = vsel %vm560_vm9, %v5096_v25, -inf }
  0xf9   :  { %v2934_v60 = vpop.f32.mrb[12].mxu0  ;;  %v1009_v5 = vsel %vm560_vm9, %v5097_v26, -inf }
  0xfa   :  { %v3600_v20 = vand.u32 2147483647, %v2934_v60  ;;  %v3602_v24 = vpop.f32.mrb[13].mxu0  ;;  %v806_v16 = vmax.f32 %v798_v12, %v3549_v23  ;;  %v1012_v12 = vmax.f32 %v3549_v23, %v1011_v58 }
  0xfb   :  { %v5095_v27 = vand.u32 2147483647, %v3602_v24 }
  0xfc   :  { %v772_v30 = vsel %vm718_vm5, %v3600_v20, 0.0  ;;  %v555_v32 = vsel %vm501_vm6, %v3600_v20, 0.0  ;;  %v988_v33 = vsel %vm934_vm7, %v3600_v20, 0.0 }
  0xfd   :  { %v3619_v44 = vpop.f32.mrb[14].mxu0  ;;  %v799_v45 = vsel %vm560_vm9, %v772_v30, -inf  ;;  %v583_v47 = vsel %vm560_vm9, %v555_v32, -inf  ;;  %v1013_v49 = vsel %vm560_vm9, %v5095_v27, -inf  ;;  %v1015_v37 = vsel %vm560_vm9, %v988_v33, -inf }
  0xfe   :  { %v3626_v52 = vpop.f32.mrb[15].mxu0  ;;  %v800_v53 = vmax.f32 %v792_v36, %v799_v45  ;;  %v584_v60 = vmax.f32 %v576_v35, %v583_v47  ;;  %v1204_v36 = vsel %vm1150_vm8, %v3600_v20, 0.0  ;;  %v1014_v30 = vmax.f32 %v3549_v23, %v1013_v49 }
  0xff   :  { %v5101_v35 = vand.u32 2147483647, %v3619_v44  ;;  %v1016_v33 = vmax.f32 %v1008_v34, %v1015_v37  ;;  %v285_v45 = vand.u32 2147483647, %v3626_v52  ;;  %v810_v27 = vmax.f32 %v802_v55, %v804_v57 }
 0x100   :  { %v808_v11 = vmax.f32 %v800_v53, %v3549_v23  ;;  %v592_v29 = vmax.f32 %v584_v60, %v3549_v23  ;;  %v1010_v53 = vmax.f32 %v3549_v23, %v1009_v5  ;;  %v1231_v26 = vsel %vm560_vm9, %v1204_v36, -inf }
 0x101   :  { %v3645_v32 = vpop.f32.mrb[16].mxu0  ;;  %v1235_v34 = vsel %vm560_vm9, %v5101_v35, -inf  ;;  %v1022_v37 = vmax.f32 %v1014_v30, %v3549_v23  ;;  %v1233_v55 = vsel %vm560_vm9, %v285_v45, -inf }
 0x102   :  { %v5099_v47 = vand.u32 2147483647, %v3645_v32  ;;  %v3650_v43 = vpop.f32.mrb[17].mxu0  ;;  %v809_v3 = vmax.f32 %v806_v16, %v808_v11  ;;  %v593_v25 = vmax.f32 %v590_v17, %v592_v29  ;;  %v1024_v16 = vmax.f32 %v1016_v33, %v3549_v23 }
 0x103   :  { %v5100_v49 = vand.u32 2147483647, %v3650_v43  ;;  %v1236_v58 = vmax.f32 %v3549_v23, %v1235_v34  ;;  %v1234_v17 = vmax.f32 %v3549_v23, %v1233_v55  ;;  %v1522_v34 = vld [vmem:[%s5087_s4 + $0x30] sm:$0xff]  ;;  %v1532_v55 = vld [vmem:[%s5087_s4 + $0x80] sm:$0xff] }
 0x104   :  { %v811_v54 = vmax.f32 %v809_v3, %v810_v27  ;;  %v595_v60 = vmax.f32 %v593_v25, %v594_v48  ;;  %v1239_v57 = vsel %vm560_vm9, %v5099_v47, -inf  ;;  %v1232_v27 = vmax.f32 %v3549_v23, %v1231_v26 }
 0x105   :  { %v1237_v3 = vsel %vm560_vm9, %v5100_v49, -inf  ;;  %v1018_v25 = vmax.f32 %v1010_v53, %v3549_v23  ;;  %v1020_v48 = vmax.f32 %v1012_v12, %v3549_v23  ;;  %v1025_v11 = vmax.f32 %v1022_v37, %v1024_v16  ;;  %v1519_v12 = vld [vmem:[%s5087_s4 + $0x18] sm:$0xff]  ;;  %v1529_v16 = vld [vmem:[%s5087_s4 + $0x68] sm:$0xff] }
 0x106   :  { %812 = vmax.xlane.f32.xlu1 %v811_v54  ;;  %596 = vmax.xlane.f32.xlu0 %v595_v60  ;;  %v1240_v5 = vmax.f32 %v1232_v27, %v1239_v57  ;;  %v1238_v36 = vmax.f32 %v3549_v23, %v1237_v3  ;;  %v1242_v29 = vmax.f32 %v1234_v17, %v1236_v58  ;;  %v1517_v23 = vld [vmem:[%s5087_s4 + $0x8] sm:$0xff]  ;;  %v1528_v3 = vld [vmem:[%s5087_s4 + $0x60] sm:$0xff]  ;;  %v1531_v27 = vld [vmem:[%s5087_s4 + $0x78] sm:$0xff] }
 0x107   :  { %v1026_v54 = vmax.f32 %v1018_v25, %v1020_v48  ;;  %v3047_v53 = vpack.c.bf16 %v1526_v38, %v1523_v61  ;;  %v1525_v60 = vld [vmem:[%s5087_s4 + $0x48] sm:$0xff]  ;;  %v3051_v57 = vpack.c.bf16 %v1532_v55, %v1529_v16  ;;  %v3053_v25 = vpack.c.bf16 %v1531_v27, %v1528_v3  ;;  %v1535_v48 = vld [vmem:[%s5087_s4 + $0x98] sm:$0x3]  ;;  %v1518_v58 = vld [vmem:[%s5087_s4 + $0x10] sm:$0xff] }
 0x108   :  { %v1241_v26 = vmax.f32 %v1238_v36, %v1240_v5  ;;  %v3049_v37 = vpack.c.bf16 %v1525_v60, %v1522_v34  ;;  %v1521_v17 = vld [vmem:[%s5087_s4 + $0x28] sm:$0xff]  ;;  %v1534_v5 = vld [vmem:[%s5087_s4 + $0x90] sm:$0x3] }
 0x109   :  { %v1027_v30 = vmax.f32 %v1025_v11, %v1026_v54  ;;  %v3732_v36 = vpack.c.bf16 %v1521_v17, %v1518_v58  ;;  %v3234_v11 = vmov 0.0  }
 0x10a   :  { %874 = vmax.xlane.f32.xlu1 %v3479_v41  ;;  %658 = vmax.xlane.f32.xlu0 %v3484_v46  ;;  %v1243_v33 = vmax.f32 %v1241_v26, %v1242_v29  ;;  %v1520_v41 = vld [vmem:[%s5087_s4 + $0x20] sm:$0xff] }
 0x10b   :  { %v1516_v46 = vld [vmem:[%s5087_s4] sm:$0xff]  ;;  %1665 = vmatprep.mubr.f32.mxu0 %v3234_v11  ;;  %1677 = vmatprep.mubr.f32.mxu1 %v3234_v11 }
 0x10e   :  { %1090 = vmax.xlane.f32.xlu1 %v3501_v59  ;;  %1028 = vmax.xlane.f32.xlu0 %v1027_v30  ;;  %v3043_v59 = vpack.c.bf16 %v1520_v41, %v1517_v23 }
 0x110   :  { %3044 = vmatprep.subr.bf16.mxu0 %v3043_v59  ;;  %3166 = vmatprep.subr.bf16.mxu1 %v3043_v59 }
 0x112   :  { %1306 = vmax.xlane.f32.xlu1 %v1305_v62  ;;  %1244 = vmax.xlane.f32.xlu0 %v1243_v33  ;;  %v3045_v62 = vpack.c.bf16 %v1519_v12, %v1516_v46 }
 0x114   :  { %3046 = vmatpush1.bf16.msra.mxu0 %v3045_v62  ;;  %3170 = vmatpush1.bf16.msra.mxu1 %v3045_v62 }
 0x115   :  { %3048 = vmatprep.subr.bf16.mxu0 %v3047_v53  ;;  %3167 = vmatprep.subr.bf16.mxu1 %v3047_v53 }
 0x118   :  { %3050 = vmatpush1.bf16.msra.mxu0 %v3049_v37  ;;  %3171 = vmatpush1.bf16.msra.mxu1 %v3049_v37 }
 0x119   :  { %3052 = vmatprep.subr.bf16.mxu0 %v3051_v57  ;;  %3168 = vmatprep.subr.bf16.mxu1 %v3051_v57 }
 0x11c   :  { %3054 = vmatpush1.bf16.msra.mxu0 %v3053_v25  ;;  %3172 = vmatpush1.bf16.msra.mxu1 %v3053_v25 }
 0x11d   :  { %2730 = vmatprep.subr.msk.mxu0 %vm1591_vm10, %v1535_v48  ;;  %3169 = vmatprep.subr.msk.mxu1 %vm1591_vm10, %v1535_v48 }
 0x120   :  { %2731 = vmatpush1.msk.msra.mxu0 %vm1591_vm10, %v1534_v5  ;;  %3173 = vmatpush1.msk.msra.mxu1 %vm1591_vm10, %v1534_v5 }
 0x121   :  { %3056 = vmatprep.subr.bf16.mxu0 %v3732_v36 }
 0x193   :  { %v813_v54 = vpop.xlane.xlu1 %812  ;;  %v597_v26 = vpop.xlane.xlu0 %596 }
 0x194   :  { %v814_v30 = vrot.slane %v813_v54, 4  ;;  %v598_v29 = vrot.slane %v597_v26, 4 }
 0x196   :  { %v815_v33 = vmax.f32 %v813_v54, %v814_v30  ;;  %v599_v23 = vmax.f32 %v597_v26, %v598_v29 }
 0x197   :  { %v875_v41 = vpop.xlane.xlu1 %874  ;;  %v659_v12 = vpop.xlane.xlu0 %658 }
 0x198   :  { %v816_v46 = vrot.slane %v815_v33, 2  ;;  %v876_v59 = vrot.slane %v875_v41, 4  ;;  %v600_v61 = vrot.slane %v599_v23, 2  ;;  %v660_v38 = vrot.slane %v659_v12, 4 }
 0x19a   :  { %v877_v62 = vmax.f32 %v875_v41, %v876_v59  ;;  %v661_v53 = vmax.f32 %v659_v12, %v660_v38  ;;  %v601_v60 = vmax.f32 %v599_v23, %v600_v61  ;;  %v817_v57 = vmax.f32 %v815_v33, %v816_v46 }
 0x19b   :  { %v1091_v34 = vpop.xlane.xlu1 %1090  ;;  %v1029_v55 = vpop.xlane.xlu0 %1028 }
 0x19c   :  { %v878_v37 = vrot.slane %v877_v62, 2  ;;  %v1092_v16 = vrot.slane %v1091_v34, 4  ;;  %v662_v3 = vrot.slane %v661_v53, 2  ;;  %v1030_v27 = vrot.slane %v1029_v55, 4 }
 0x19d   :  { %v602_v25 = vrot.slane %v601_v60, 1  ;;  %v818_v41 = vrot.slane %v817_v57, 1 }
 0x19e   :  { %v1093_v48 = vmax.f32 %v1091_v34, %v1092_v16  ;;  %v879_v58 = vmax.f32 %v877_v62, %v878_v37  ;;  %v1031_v17 = vmax.f32 %v1029_v55, %v1030_v27  ;;  %v663_v30 = vmax.f32 %v661_v53, %v662_v3 }
 0x19f   :  { %v1307_v5 = vpop.xlane.xlu1 %1306  ;;  %v603_v54 = vmax.f32 %v601_v60, %v602_v25  ;;  %v1245_v47 = vpop.xlane.xlu0 %1244  ;;  %v819_v37 = vmax.f32 %v817_v57, %v818_v41  ;;  %v3235_v27 = vmov 0.0|0.0  }
 0x1a0   :  { %v1094_v26 = vrot.slane %v1093_v48, 2  ;;  %v1308_v29 = vrot.slane %v1307_v5, 4  ;;  %v880_v59 = vrot.slane %v879_v58, 1  ;;  %v1032_v12 = vrot.slane %v1031_v17, 2  ;;  %3067 = vmatprep.subr.bf16.mxu1 %v3235_v27 }
 0x1a1   :  { %v1246_v23 = vrot.slane %v1245_v47, 4  ;;  %3174 = vpush %v603_v54  ;;  %v664_v61 = vrot.slane %v663_v30, 1 }
 0x1a2   :  { %v1309_v38 = vmax.f32 %v1307_v5, %v1308_v29  ;;  %v1095_v33 = vmax.f32 %v1093_v48, %v1094_v26  ;;  %v881_v35 = vmax.f32 %v879_v58, %v880_v59  ;;  %v1033_v34 = vmax.f32 %v1031_v17, %v1032_v12 }
 0x1a3   :  { %v1247_v46 = vmax.f32 %v1245_v47, %v1246_v23  ;;  %v665_v49 = vmax.f32 %v663_v30, %v664_v61  ;;  %v1353_v61 = vstv %s5085_s2 }
 0x1a4   :  { %v1310_v62 = vrot.slane %v1309_v38, 2  ;;  %v1096_v16 = vrot.slane %v1095_v33, 1  ;;  %v1034_v53 = vrot.slane %v1033_v34, 1 }
 0x1a5   :  { %v1248_v60 = vrot.slane %v1247_v46, 2  ;;  %3176 = vpush %v665_v49 }
 0x1a6   :  { %v1311_v55 = vmax.f32 %v1309_v38, %v1310_v62  ;;  %3178 = vpush %v819_v37  ;;  %v1097_v3 = vmax.f32 %v1095_v33, %v1096_v16  ;;  %v1035_v5 = vmax.f32 %v1033_v34, %v1034_v53  ;;  %v1524_v34 = vld [vmem:[%s5087_s4 + $0x40] sm:$0xff]  ;;  %v1527_v62 = vld [vmem:[%s5087_s4 + $0x58] sm:$0xff] }
 0x1a7   :  { %v1249_v25 = vmax.f32 %v1247_v46, %v1248_v60  ;;  %3180 = vpush %v881_v35 }
 0x1a8   :  { %v1312_v48 = vrot.slane %v1311_v55, 1  ;;  %3182 = vpush %v1035_v5 }
 0x1a9   :  { %v1250_v47 = vrot.slane %v1249_v25, 1  ;;  %3184 = vpush %v1097_v3  ;;  %v1530_v3 = vld [vmem:[%s5087_s4 + $0x70] sm:$0xff] }
 0x1aa   :  { %v1313_v58 = vmax.f32 %v1311_v55, %v1312_v48 }
 0x1ab   :  { %v1251_v17 = vmax.f32 %v1249_v25, %v1250_v47  ;;  %v1533_v25 = vld [vmem:[%s5087_s4 + $0x88] sm:$0xff] }
 0x1ad   :  { %3186 = vpush %v1251_v17  ;;  %v3779_v17 = vpack.c.bf16 %v1527_v62, %v1524_v34  ;;  %v3816_v34 = vpack.c.bf16 %v1533_v25, %v1530_v3 }
 0x1ae   :  { %3188 = vpush %v1313_v58 }
 0x1d2   :  { %s3175_s19 = spop %3174 }
 0x1d3   :  { %v667_v49 = vstv %s3175_s19 }
 0x1d4   :  { %v1372_v57 = vadd.f32 1e-08, %v667_v49  ;;  %v672_v54 = vsel %vm3322_vm3, %v667_v49, 0.0  ;;  %v681_v33 = vsel %vm501_vm6, %v667_v49, 0.0  ;;  %v3784_v49 = vld [vmem:[%s5088_s5] sm:$0xff] }
 0x1d6   :  { %3196 = vrcp.f32 %v1372_v57  ;;  %s3177_s20 = spop %3176 }
 0x1d7   :  { %s3179_s21 = spop %3178  ;;  %v686_v30 = vstv %s3177_s20 }
 0x1d8   :  { %v883_v35 = vstv %s3179_s21  ;;  %s3181_s22 = spop %3180  ;;  %v700_v59 = vsel %vm501_vm6, %v686_v30, 0.0  ;;  %v691_v46 = vsel %vm3322_vm3, %v686_v30, 0.0  ;;  %v1354_v53 = vmul.f32 %v1353_v61, %v686_v30 }
 0x1d9   :  { %v888_v26 = vsel %vm312_vm2, %v883_v35, %v672_v54  ;;  %v1377_v29 = vadd.f32 1e-08, %v883_v35  ;;  %s3183_s1 = spop %3182  ;;  %v902_v12 = vstv %s3181_s22  ;;  %v897_v37 = vsel %vm718_vm5, %v883_v35, %v681_v33  ;;  %v1446_v33 = vld [vmem:[%s5086_s3 + $0x10] sm:$0xff] }
 0x1da   :  { %v1376_v41 = vadd.f32 1e-08, %v888_v26  ;;  %v1099_v23 = vstv %s3183_s1  ;;  %s3746_s23 = spop %3184  ;;  %v916_v16 = vsel %vm718_vm5, %v902_v12, %v700_v59  ;;  %v907_v54 = vsel %vm312_vm2, %v902_v12, %v691_v46  ;;  %v3793_v26 = vld [vmem:[%s5088_s5 + $0x8] sm:$0xff]  ;;  %v1444_v59 = vld [vmem:[%s5086_s3] sm:$0xff] }
 0x1db   :  { %3198 = vrcp.f32 %v1377_v29  ;;  %v1381_v38 = vadd.f32 1e-08, %v1099_v23  ;;  %v1118_v60 = vstv %s3746_s23  ;;  %v1113_v14 = vsel %vm934_vm7, %v1099_v23, %v897_v37  ;;  %v3798_v29 = vld [vmem:[%s5088_s5 + $0x10] sm:$0xff]  ;;  %v1445_v46 = vld [vmem:[%s5086_s3 + $0x8] sm:$0xff]  ;;  %s3236_s23 = smov [#allocation3]  }
 0x1dc   :  { %3200 = vrcp.f32 %v1376_v41  ;;  %v1132_v30 = vsel %vm934_vm7, %v1118_v60, %v916_v16  ;;  %v3803_v41 = vld [vmem:[%s5088_s5 + $0x18] sm:$0xff]  ;;  %v1359_v23 = vmul.f32 %v1353_v61, %v902_v12  ;;  %s2688_s24 = sshll.u32 %s3236_s23, 4  ;;  %s2689_s24 = int_to_ptr.vmem [resolvable:$true] %s2688_s24 }
 0x1dd   :  { %3202 = vrcp.f32 %v1381_v38  ;;  %v1447_v16 = vld [vmem:[%s5086_s3 + $0x18] sm:$0xff]  ;;  %v3071_v63 = vpack.c.bf16 %v3803_v41, %v3798_v29  ;;  %s3208_s25 = scalar_lea.vmem %s2689_s24, 64  ;;  %p3213_p1 = scmp.lt.s32.totalorder %s2689_s24, %s2689_s24 }
 0x1de   :  { %s3187_s2 = spop %3186  ;;  %v2192_v29 = vld [vmem:[%s5088_s5 + $0x38] sm:$0xff]  ;;  %p3209_p0 = scmp.ne.s32.totalorder %s2689_s24, %s3208_s25 }
 0x1df   :  { %v1315_v55 = vstv %s3187_s2  ;;  %s3768_s30 = spop %3188  ;;  %p3214_p2 = scmp.lt.s32.totalorder %s3208_s25, %s3208_s25 }
 0x1e0   :  { %v3197_v5 = vpop.eup %3196  ;;  %v1329_v48 = vsel %vm1150_vm8, %v1315_v55, %v1113_v14  ;;  %v1386_v47 = vadd.f32 1e-08, %v1315_v55  ;;  %v1334_v58 = vstv %s3768_s30  ;;  %v3068_v55 = vpack.c.bf16 %v3793_v26, %v3784_v49  ;;  %v1449_v49 = vld [vmem:[%s5086_s3 + $0x28] sm:$0xff] }
 0x1e1   :  { %v1408_v57 = vmul.f32 %v3197_v5, %v1354_v53  ;;  %v1385_v35 = vadd.f32 1e-08, %v1329_v48  ;;  %v1348_v38 = vsel %vm1150_vm8, %v1334_v58, %v1132_v30  ;;  %v1358_v53 = vmul.f32 %v1353_v61, %v907_v54  ;;  %p3215_p3 = por %p3214_p2, %p3213_p1 }
 0x1e2   :  { %3204 = vrcp.f32 %v1386_v47  ;;  %v1367_v5 = vmul.f32 %v1353_v61, %v1348_v38  ;;  %v1368_v48 = vmul.f32 %v1353_v61, %v1334_v58  ;;  %v1452_v38 = vld [vmem:[%s5086_s3 + $0x40] sm:$0xff] }
 0x1e3   :  { %v1426_v62 = vmul.f32 %v1408_v57, %v271_v10  ;;  %3206 = vrcp.f32 %v1385_v35  ;;  %v1428_v12 = vmul.f32 %v1408_v57, %v273_v4  ;;  %v1427_v37 = vmul.f32 %v1408_v57, %v272_v7  ;;  %v1448_v35 = vld [vmem:[%s5086_s3 + $0x20] sm:$0xff]  ;;  %p3216_p4 = pnand %p3215_p3, %p3209_p0 }
 0x1e4   :  { %v1429_v14 = vmul.f32 %v1408_v57, %v274_v13  ;;  %v1363_v4 = vmul.f32 %v1353_v61, %v1118_v60  ;;  %v1450_v60 = vld [vmem:[%s5086_s3 + $0x30] sm:$0xff]  ;;  %v1451_v57 = vld [vmem:[%s5086_s3 + $0x38] sm:$0xff] }
 0x1e5   :  { %v3199_v10 = vpop.eup %3198  ;;  %v1462_v1 = vadd.f32 %v1444_v59, %v1426_v62  ;;  %v1464_v3 = vadd.f32 %v1446_v33, %v1428_v12  ;;  %v1463_v39 = vadd.f32 %v1445_v46, %v1427_v37 }
 0x1e6   :  { %v3201_v7 = vpop.eup %3200  ;;  %v1413_v25 = vmul.f32 %v3199_v10, %v1359_v23  ;;  %v1465_v47 = vadd.f32 %v1447_v16, %v1429_v14 }
 0x1e7   :  { %v1480_v54 = vmax.f32 %v1462_v1, 0.0  ;;  %v1412_v30 = vmul.f32 %v3201_v7, %v1358_v53  ;;  %v3833_v0 = vmax.f32 %v1464_v3, 0.0  ;;  %v3835_v13 = vmax.f32 %v1463_v39, 0.0  ;;  %v3203_v61 = vpop.eup %3202  ;;  %v1455_v39 = vld [vmem:[%s5086_s3 + $0x58] sm:$0xff] }
 0x1e8   :  { %v3846_v58 = vmax.f32 %v1465_v47, 0.0  ;;  %v1431_v26 = vmul.f32 %v1413_v25, %v276_v18  ;;  %v1432_v59 = vmul.f32 %v1413_v25, %v277_v22  ;;  %v1433_v23 = vmul.f32 %v1413_v25, %v278_v21  ;;  %v1460_v47 = vld [vmem:[%s5086_s3 + $0x80] sm:$0xff] }
 0x1e9   :  { %1498 = vst.msk [vmem:[%s5091_s8] sm:$0xff] %vm560_vm9, %v1480_v54  ;;  %v1430_v33 = vmul.f32 %v1412_v30, %v3524_v6  ;;  %v1417_v46 = vmul.f32 %v3203_v61, %v1363_v4  ;;  %2732 = vmatmul.mubr.msk.f32.vlgmr.msra.gmra.mrb[18].mxu0 %vm560_vm9, %v1480_v54  ;;  %1500 = vst.msk [vmem:[%s5091_s8 + $0x10] sm:$0xff] %vm560_vm9, %v3833_v0  ;;  %2734 = vmatmul.mubr.msk.f32.vlgmr.msra.gmra.mrb[0].mxu1 %vm560_vm9, %v3833_v0  ;;  %v5105_v53 = vand.u32 2147483647, %v3588_v56  ;;  %v1456_v56 = vld [vmem:[%s5086_s3 + $0x60] sm:$0xff] }
 0x1ea   :  { %1499 = vst.msk [vmem:[%s5091_s8 + $0x8] sm:$0xff] %vm560_vm9, %v3835_v13  ;;  %v1434_v2 = vmul.f32 %v1413_v25, %v279_v42  ;;  %3058 = vmatpush3.bf16.msra.mxu0 %v3732_v36  ;;  %1671 = vmatprep.mubr.f32.mxu0 %v3234_v11  ;;  %1501 = vst.msk [vmem:[%s5091_s8 + $0x18] sm:$0xff] %vm560_vm9, %v3846_v58  ;;  %v1467_v6 = vadd.f32 %v1449_v49, %v1431_v26  ;;  %v1454_v36 = vld [vmem:[%s5086_s3 + $0x50] sm:$0xff]  ;;  %v5106_v7 = vand.u32 2147483647, %v3582_v50  ;;  %v1457_v49 = vld [vmem:[%s5086_s3 + $0x68] sm:$0xff] }
 0x1eb   :  { %v1468_v15 = vadd.f32 %v1450_v60, %v1432_v59  ;;  %v1469_v18 = vadd.f32 %v1451_v57, %v1433_v23  ;;  %1683 = vmatprep.mubr.f32.mxu1 %v3234_v11  ;;  %3060 = vmatprep.subr.bf16.mxu0 %v3779_v17  ;;  %v1466_v21 = vadd.f32 %v1448_v35, %v1430_v33  ;;  %v5108_v57 = vand.u32 2147483647, %v3619_v44  ;;  %v2189_v35 = vld [vmem:[%s5088_s5 + $0x20] sm:$0xff]  ;;  %v2190_v26 = vld [vmem:[%s5088_s5 + $0x28] sm:$0xff] }
 0x1ec   :  { %v1470_v22 = vadd.f32 %v1452_v38, %v1434_v2  ;;  %v1435_v42 = vmul.f32 %v1417_v46, %v5104_v31  ;;  %v3205_v62 = vpop.eup %3204  ;;  %v3897_v12 = vmax.f32 %v1467_v6, 0.0  ;;  %v1436_v14 = vmul.f32 %v1417_v46, %v5105_v53  ;;  %3069 = vmatpush1.bf16.msra.mxu1 %v3068_v55  ;;  %v1536_v59 = vld [vmem:[%s5087_s4 + $0xa0] sm:$0x3]  ;;  %v1461_v38 = vld [vmem:[%s5086_s3 + $0x88] sm:$0xff]  ;;  %v2191_v53 = vld [vmem:[%s5088_s5 + $0x30] sm:$0xff] }
 0x1ed   :  { %v3899_v37 = vmax.f32 %v1468_v15, 0.0  ;;  %v3901_v16 = vmax.f32 %v1469_v18, 0.0  ;;  %v3207_v10 = vpop.eup %3206  ;;  %v1422_v1 = vmul.f32 %v3205_v62, %v1368_v48  ;;  %2733 = vmatmul.mubr.msk.f32.gmra.mrb[20].mxu0 %vm560_vm9, %v3835_v13  ;;  %2735 = vmatmul.mubr.msk.f32.gmra.mrb[2].mxu1 %vm560_vm9, %v3846_v58  ;;  %v3909_v28 = vmax.f32 %v1466_v21, 0.0  ;;  %v1459_v48 = vld [vmem:[%s5086_s3 + $0x78] sm:$0xff] }
 0x1ee   :  { %v3911_v4 = vmax.f32 %v1470_v22, 0.0  ;;  %v1471_v3 = vadd.f32 %v1453_v19, %v1435_v42  ;;  %v1421_v55 = vmul.f32 %v3207_v10, %v1367_v5  ;;  %3062 = vmatpush3.bf16.msra.mxu0 %v3779_v17  ;;  %2955 = vmatprep.mubr.msk.f32.mxu0 %vm560_vm9, %v1480_v54  ;;  %1503 = vst.msk [vmem:[%s5091_s8 + $0x28] sm:$0xff] %vm560_vm9, %v3897_v12  ;;  %v1458_v5 = vld [vmem:[%s5086_s3 + $0x70] sm:$0xff]  ;;  %v5107_v54 = vand.u32 2147483647, %v3602_v24  ;;  %v2220_v10 = vld [vmem:[%s5088_s5 + $0x118] sm:$0xff] }
 0x1ef   :  { %1504 = vst.msk [vmem:[%s5091_s8 + $0x30] sm:$0xff] %vm560_vm9, %v3899_v37  ;;  %1505 = vst.msk [vmem:[%s5091_s8 + $0x38] sm:$0xff] %vm560_vm9, %v3901_v16  ;;  %v1472_v17 = vadd.f32 %v1454_v36, %v1436_v14  ;;  %v1437_v25 = vmul.f32 %v1417_v46, %v5106_v7  ;;  %1689 = vmatprep.mubr.f32.mxu1 %v3234_v11  ;;  %3064 = vmatprep.subr.bf16.mxu0 %v3816_v34  ;;  %v5109_v44 = vand.u32 2147483647, %v3650_v43  ;;  %v2219_v14 = vld [vmem:[%s5088_s5 + $0x110] sm:$0xff]  ;;  %v2196_v7 = vld [vmem:[%s5088_s5 + $0x58] sm:$0xff] }
 0x1f0   :  { %1502 = vst.msk [vmem:[%s5091_s8 + $0x20] sm:$0xff] %vm560_vm9, %v3909_v28  ;;  %1506 = vst.msk [vmem:[%s5091_s8 + $0x40] sm:$0xff] %vm560_vm9, %v3911_v4  ;;  %v3959_v50 = vmax.f32 %v1471_v3, 0.0  ;;  %v1438_v30 = vmul.f32 %v1417_v46, %v5107_v54  ;;  %v1440_v60 = vmul.f32 %v1422_v1, %v285_v45  ;;  %v1441_v61 = vmul.f32 %v1422_v1, %v5108_v57  ;;  %v2193_v3 = vld [vmem:[%s5088_s5 + $0x40] sm:$0xff]  ;;  %v2203_v54 = vld [vmem:[%s5088_s5 + $0x90] sm:$0xff] }
 0x1f1   :  { %v1439_v24 = vmul.f32 %v1421_v55, %v3600_v20  ;;  %v3980_v23 = vmax.f32 %v1472_v17, 0.0  ;;  %v1473_v52 = vadd.f32 %v1455_v39, %v1437_v25  ;;  %v1442_v45 = vmul.f32 %v1422_v1, %v5109_v44  ;;  %3070 = vmatprep.subr.bf16.mxu1 %v3235_v27  ;;  %2736 = vmatmul.mubr.msk.f32.gmra.mrb[4].mxu1 %vm560_vm9, %v3909_v28  ;;  %v2195_v17 = vld [vmem:[%s5088_s5 + $0x50] sm:$0xff]  ;;  %v2197_v25 = vld [vmem:[%s5088_s5 + $0x60] sm:$0xff]  ;;  %v2206_v57 = vld [vmem:[%s5088_s5 + $0xa8] sm:$0xff] }
 0x1f2   :  { %1507 = vst.msk [vmem:[%s5091_s8 + $0x48] sm:$0xff] %vm560_vm9, %v3959_v50  ;;  %v1474_v20 = vadd.f32 %v1456_v56, %v1438_v30  ;;  %v1476_v33 = vadd.f32 %v1458_v5, %v1440_v60  ;;  %v1477_v46 = vadd.f32 %v1459_v48, %v1441_v61  ;;  %v5110_v43 = vand.u32 2147483647, %v3645_v32  ;;  %3066 = vmatpush3.bf16.msra.mxu0 %v3816_v34  ;;  %v2217_v32 = vld [vmem:[%s5088_s5 + $0x100] sm:$0xff]  ;;  %v2218_v34 = vld [vmem:[%s5088_s5 + $0x108] sm:$0xff]  ;;  %v2200_v48 = vld [vmem:[%s5088_s5 + $0x78] sm:$0xff] }
 0x1f3   :  { %1695 = vmatprep.mubr.f32.mxu1 %v3234_v11  ;;  %1508 = vst.msk [vmem:[%s5091_s8 + $0x50] sm:$0xff] %vm560_vm9, %v3980_v23  ;;  %v4004_v6 = vmax.f32 %v1473_v52, 0.0  ;;  %v1475_v15 = vadd.f32 %v1457_v49, %v1439_v24  ;;  %v1478_v18 = vadd.f32 %v1460_v47, %v1442_v45  ;;  %v3074_v19 = vpack.c.bf16 %v2190_v26, %v2189_v35  ;;  %v2222_v56 = vld [vmem:[%s5088_s5 + $0x128] sm:$0xff]  ;;  %v2204_v30 = vld [vmem:[%s5088_s5 + $0x98] sm:$0xff]  ;;  %v2205_v60 = vld [vmem:[%s5088_s5 + $0xa0] sm:$0xff] }
 0x1f4   :  { %v1443_v2 = vmul.f32 %v1422_v1, %v5110_v43  ;;  %2953 = vmatprep.subr.msk.mxu0 %vm1591_vm10, %v1536_v59  ;;  %v4013_v21 = vmax.f32 %v1474_v20, 0.0  ;;  %v4015_v22 = vmax.f32 %v1476_v33, 0.0  ;;  %v4017_v31 = vmax.f32 %v1477_v46, 0.0  ;;  %3072 = vmatpush1.bf16.msra.mxu1 %v3071_v63  ;;  %v2198_v5 = vld [vmem:[%s5088_s5 + $0x68] sm:$0xff]  ;;  %v2207_v35 = vld [vmem:[%s5088_s5 + $0xb0] sm:$0xff]  ;;  %v2208_v26 = vld [vmem:[%s5088_s5 + $0xb8] sm:$0xff] }
 0x1f5   :  { %1509 = vst.msk [vmem:[%s5091_s8 + $0x58] sm:$0xff] %vm560_vm9, %v4004_v6  ;;  %v4027_v36 = vmax.f32 %v1475_v15, 0.0  ;;  %v4029_v62 = vmax.f32 %v1478_v18, 0.0  ;;  %3073 = vmatprep.subr.bf16.mxu1 %v3235_v27  ;;  %2737 = vmatmul.mubr.msk.f32.gmra.mrb[6].mxu1 %vm560_vm9, %v3897_v12  ;;  %v3115_v63 = vpack.c.bf16 %v2218_v34, %v2217_v32  ;;  %v3077_v1 = vpack.c.bf16 %v2192_v29, %v2191_v53  ;;  %v2202_v47 = vld [vmem:[%s5088_s5 + $0x88] sm:$0xff]  ;;  %v2211_v44 = vld [vmem:[%s5088_s5 + $0xd0] sm:$0xff]  ;;  %v2212_v45 = vld [vmem:[%s5088_s5 + $0xd8] sm:$0xff] }
 0x1f6   :  { %v1479_v42 = vadd.f32 %v1461_v38, %v1443_v2  ;;  %1510 = vst.msk [vmem:[%s5091_s8 + $0x60] sm:$0xff] %vm560_vm9, %v4013_v21  ;;  %1512 = vst.msk [vmem:[%s5091_s8 + $0x70] sm:$0xff] %vm560_vm9, %v4015_v22  ;;  %2954 = vmatpush3.msk.msra.mxu0 %vm1591_vm10, %v1536_v59  ;;  %1701 = vmatprep.mubr.f32.mxu1 %v3234_v11  ;;  %v3119_v39 = vpack.c.bf16 %v2220_v10, %v2219_v14  ;;  %v2209_v59 = vld [vmem:[%s5088_s5 + $0xc0] sm:$0xff]  ;;  %v2214_v33 = vld [vmem:[%s5088_s5 + $0xe8] sm:$0xff]  ;;  %v4266_v53 = vmul.u32 10, %v3304_v8 }
 0x1f7   :  { %1513 = vst.msk [vmem:[%s5091_s8 + $0x78] sm:$0xff] %vm560_vm9, %v4017_v31  ;;  %1511 = vst.msk [vmem:[%s5091_s8 + $0x68] sm:$0xff] %vm560_vm9, %v4027_v36  ;;  %2956 = vmatmul.mubr.msk.f32.vlgmr.msra.gmra.mrb[22].mxu0 %vm560_vm9, %v3835_v13  ;;  %v2194_v13 = vld [vmem:[%s5088_s5 + $0x48] sm:$0xff]  ;;  %3116 = vmatprep.subr.bf16.mxu0 %v3115_v63  ;;  %v3095_v49 = vpack.c.bf16 %v2204_v30, %v2203_v54  ;;  %v3098_v61 = vpack.c.bf16 %v2206_v57, %v2205_v60  ;;  %v2213_v20 = vld [vmem:[%s5088_s5 + $0xe0] sm:$0xff]  ;;  %v291_v29 = vadd.s32 8, %v3304_v8 }
 0x1f8   :  { %v4055_v41 = vmax.f32 %v1479_v42, 0.0  ;;  %1514 = vst.msk [vmem:[%s5091_s8 + $0x80] sm:$0xff] %vm560_vm9, %v4029_v62  ;;  %3075 = vmatpush1.bf16.msra.mxu1 %v3074_v19  ;;  %2958 = vmatprep.mubr.msk.f32.mxu0 %vm560_vm9, %v3833_v0  ;;  %v2221_v0 = vld [vmem:[%s5088_s5 + $0x120] sm:$0xff]  ;;  %v3080_v55 = vpack.c.bf16 %v2194_v13, %v2193_v3  ;;  %v3101_v24 = vpack.c.bf16 %v2208_v26, %v2207_v35  ;;  %v2215_v43 = vld [vmem:[%s5088_s5 + $0xf0] sm:$0xff]  ;;  %v2216_v2 = vld [vmem:[%s5088_s5 + $0xf8] sm:$0xff]  ;;  %v297_v60 = vadd.s32 56, %v3304_v8 }
 0x1f9   :  { %3076 = vmatprep.subr.bf16.mxu1 %v3235_v27  ;;  %2738 = vmatmul.mubr.msk.f32.gmra.mrb[8].mxu1 %vm560_vm9, %v3899_v37  ;;  %v3107_v38 = vpack.c.bf16 %v2212_v45, %v2211_v44  ;;  %v3110_v46 = vpack.c.bf16 %v2214_v33, %v2213_v20  ;;  %v2224_v15 = vld [vmem:[%s5088_s5 + $0x138] sm:$0xff]  ;;  %v2225_v19 = vld [vmem:[%s5088_s5 + $0x140] sm:$0xff]  ;;  %v2226_v32 = vld [vmem:[%s5088_s5 + $0x148] sm:$0xff]  ;;  %v4279_v3 = vmul.u32 10, %v291_v29  ;;  %v299_v45 = vadd.s32 72, %v3304_v8 }
 0x1fa   :  { %1515 = vst.msk [vmem:[%s5091_s8 + $0x88] sm:$0xff] %vm560_vm9, %v4055_v41  ;;  %1707 = vmatprep.mubr.f32.mxu1 %v3234_v11  ;;  %3118 = vmatpush3.bf16.msra.mxu0 %v3115_v63  ;;  %v3131_v34 = vpack.c.bf16 %v2226_v32, %v2225_v19  ;;  %v2229_v42 = vld [vmem:[%s5088_s5 + $0x160] sm:$0xff]  ;;  %v5112_v63 = vmov 0   ;;  %v306_v33 = vadd.s32 128, %v3304_v8 }
 0x1fb   :  { %2959 = vmatmul.mubr.msk.f32.gmra.mrb[24].mxu0 %vm560_vm9, %v3846_v58  ;;  %3120 = vmatprep.subr.bf16.mxu0 %v3119_v39  ;;  %v3123_v58 = vpack.c.bf16 %v2222_v56, %v2221_v0  ;;  %v330_v14 = vsel %vm312_vm2, 1, %v5112_v63  ;;  %v4289_v56 = vadd.s32 10, %v4279_v3  ;;  %v2721_v32 = vadd.s32 4294967224, %v299_v45 }
 0x1fc   :  { %3078 = vmatpush1.bf16.msra.mxu1 %v3077_v1  ;;  %2961 = vmatprep.mubr.msk.f32.mxu0 %vm560_vm9, %v3909_v28  ;;  %v3083_v28 = vpack.c.bf16 %v2196_v7, %v2195_v17  ;;  %v4277_v1 = vadd.s32 10, %v4266_v53  ;;  %v456_v0 = vmul.u32 36, %v330_v14 }
 0x1fd   :  { %3079 = vmatprep.subr.bf16.mxu1 %v3235_v27  ;;  %2739 = vmatmul.mubr.msk.f32.gmra.mrb[10].mxu1 %vm560_vm9, %v3901_v16 }
 0x1fe   :  { %1713 = vmatprep.mubr.f32.mxu1 %v3234_v11  ;;  %3122 = vmatpush3.bf16.msra.mxu0 %v3119_v39  ;;  %v293_v39 = vadd.s32 24, %v3304_v8  ;;  %v474_v7 = vsub.s32 %v3307_v9, %v456_v0  ;;  %v296_v9 = vadd.s32 48, %v3304_v8  ;;  %v302_v0 = vadd.s32 96, %v3304_v8 }
 0x1ff   :  { %2962 = vmatmul.mubr.msk.f32.gmra.mrb[26].mxu0 %vm560_vm9, %v3897_v12  ;;  %3124 = vmatprep.subr.bf16.mxu0 %v3123_v58  ;;  %v3086_v12 = vpack.c.bf16 %v2198_v5, %v2197_v25 }
 0x200   :  { %3081 = vmatpush1.bf16.msra.mxu1 %v3080_v55  ;;  %2964 = vmatprep.mubr.msk.f32.mxu0 %vm560_vm9, %v3899_v37  ;;  %v2199_v37 = vld [vmem:[%s5088_s5 + $0x70] sm:$0xff]  ;;  %v4298_v17 = vmul.u32 10, %v293_v39  ;;  %v4507_v39 = vmul.u32 10, %v2721_v32 }
 0x201   :  { %3082 = vmatprep.subr.bf16.mxu1 %v3235_v27  ;;  %2740 = vmatmul.mubr.msk.f32.gmra.mrb[12].mxu1 %vm560_vm9, %v3911_v4 }
 0x202   :  { %1719 = vmatprep.mubr.f32.mxu1 %v3234_v11  ;;  %3126 = vmatpush3.bf16.msra.mxu0 %v3123_v58  ;;  %v295_v58 = vadd.s32 40, %v3304_v8 }
 0x203   :  { %2965 = vmatmul.mubr.msk.f32.gmra.mrb[28].mxu0 %vm560_vm9, %v3901_v16  ;;  %v3089_v16 = vpack.c.bf16 %v2200_v48, %v2199_v37  ;;  %v4316_v37 = vadd.s32 10, %v4298_v17  ;;  %v4318_v48 = vmul.u32 10, %v474_v7  ;;  %v465_v7 = vmul.u32 36, %v3432_v51 }
 0x204   :  { %3084 = vmatpush1.bf16.msra.mxu1 %v3083_v28  ;;  %2967 = vmatprep.mubr.msk.f32.mxu0 %vm560_vm9, %v3911_v4  ;;  %v2201_v4 = vld [vmem:[%s5088_s5 + $0x80] sm:$0xff] }
 0x205   :  { %3085 = vmatprep.subr.bf16.mxu1 %v3235_v27  ;;  %2741 = vmatmul.mubr.msk.f32.gmra.mrb[14].mxu1 %vm560_vm9, %v3959_v50  ;;  %v4336_v57 = vadd.s32 10, %v4318_v48 }
 0x206   :  { %1725 = vmatprep.mubr.f32.mxu1 %v3234_v11 }
 0x207   :  { %2968 = vmatmul.mubr.msk.f32.gmra.mrb[30].mxu0 %vm560_vm9, %v3959_v50  ;;  %v3092_v50 = vpack.c.bf16 %v2202_v47, %v2201_v4 }
 0x208   :  { %3087 = vmatpush1.bf16.msra.mxu1 %v3086_v12  ;;  %2970 = vmatprep.mubr.msk.f32.mxu0 %vm560_vm9, %v3980_v23 }
 0x209   :  { %3088 = vmatprep.subr.bf16.mxu1 %v3235_v27  ;;  %2742 = vmatmul.mubr.msk.f32.gmra.mrb[16].mxu1 %vm560_vm9, %v3980_v23  ;;  %v2210_v23 = vld [vmem:[%s5088_s5 + $0xc8] sm:$0xff] }
 0x20a   :  { %1731 = vmatprep.mubr.f32.mxu1 %v3234_v11  ;;  %v3104_v52 = vpack.c.bf16 %v2210_v23, %v2209_v59  ;;  %v2719_v23 = vadd.s32 4294967260, %v297_v60 }
 0x20b   :  { %2971 = vmatmul.mubr.msk.f32.gmra.mrb[32].mxu0 %vm560_vm9, %v4004_v6 }
 0x20c   :  { %3090 = vmatpush1.bf16.msra.mxu1 %v3089_v16  ;;  %2973 = vmatprep.mubr.msk.f32.mxu0 %vm560_vm9, %v4013_v21  ;;  %v2717_v16 = vadd.s32 4294967260, %v295_v58 }
 0x20d   :  { %3091 = vmatprep.subr.bf16.mxu1 %v3235_v27  ;;  %2743 = vmatmul.mubr.msk.f32.gmra.mrb[18].mxu1 %vm560_vm9, %v4004_v6  ;;  %v3113_v6 = vpack.c.bf16 %v2216_v2, %v2215_v43 }
 0x20e   :  { %1737 = vmatprep.mubr.f32.mxu1 %v3234_v11 }
 0x20f   :  { %2974 = vmatmul.mubr.msk.f32.gmra.mrb[34].mxu0 %vm560_vm9, %v4027_v36 }
 0x210   :  { %3093 = vmatpush1.bf16.msra.mxu1 %v3092_v50  ;;  %2976 = vmatprep.mubr.msk.f32.mxu0 %vm560_vm9, %v4015_v22 }
 0x211   :  { %3094 = vmatprep.subr.bf16.mxu1 %v3235_v27  ;;  %2744 = vmatmul.mubr.msk.f32.gmra.mrb[20].mxu1 %vm560_vm9, %v4013_v21  ;;  %v2227_v21 = vld [vmem:[%s5088_s5 + $0x150] sm:$0xff] }
 0x212   :  { %1743 = vmatprep.mubr.f32.mxu1 %v3234_v11 }
 0x213   :  { %2977 = vmatmul.mubr.msk.f32.gmra.mrb[36].mxu0 %vm560_vm9, %v4017_v31 }
 0x214   :  { %3096 = vmatpush1.bf16.msra.mxu1 %v3095_v49  ;;  %2979 = vmatprep.mubr.msk.f32.mxu0 %vm560_vm9, %v4029_v62  ;;  %v2718_v49 = vadd.s32 4294967260, %v296_v9 }
 0x215   :  { %3097 = vmatprep.subr.bf16.mxu1 %v3235_v27  ;;  %2745 = vmatmul.mubr.msk.f32.gmra.mrb[22].mxu1 %vm560_vm9, %v4027_v36  ;;  %v5111_v36 = vlaneseq }
 0x216   :  { %1749 = vmatprep.mubr.f32.mxu1 %v3234_v11  ;;  %v4358_v59 = vmul.u32 10, %v2718_v49 }
 0x217   :  { %2980 = vmatmul.mubr.msk.f32.gmra.mrb[38].mxu0 %vm560_vm9, %v4055_v41 }
 0x218   :  { %3099 = vmatpush1.bf16.msra.mxu1 %v3098_v61  ;;  %v4338_v61 = vmul.u32 10, %v2717_v16 }
 0x219   :  { %3100 = vmatprep.subr.bf16.mxu1 %v3235_v27  ;;  %2746 = vmatmul.mubr.msk.f32.gmra.mrb[24].mxu1 %vm560_vm9, %v4015_v22  ;;  %v2228_v22 = vld [vmem:[%s5088_s5 + $0x158] sm:$0xff] }
 0x21a   :  { %1755 = vmatprep.mubr.f32.mxu1 %v3234_v11  ;;  %v4366_v44 = vadd.s32 10, %v4338_v61 }
 0x21c   :  { %3102 = vmatpush1.bf16.msra.mxu1 %v3101_v24 }
 0x21d   :  { %3103 = vmatprep.subr.bf16.mxu1 %v3235_v27  ;;  %2747 = vmatmul.mubr.msk.f32.gmra.mrb[26].mxu1 %vm560_vm9, %v4017_v31  ;;  %v3135_v31 = vpack.c.bf16 %v2228_v22, %v2227_v21  ;;  %v301_v22 = vadd.s32 88, %v3304_v8 }
 0x21e   :  { %1761 = vmatprep.mubr.f32.mxu1 %v3234_v11 }
 0x220   :  { %3105 = vmatpush1.bf16.msra.mxu1 %v3104_v52  ;;  %v298_v52 = vadd.s32 64, %v3304_v8 }
 0x221   :  { %3106 = vmatprep.subr.bf16.mxu1 %v3235_v27  ;;  %2748 = vmatmul.mubr.msk.f32.gmra.mrb[28].mxu1 %vm560_vm9, %v4029_v62  ;;  %v4263_v62 = vand.u32 127, %v5111_v36 }
 0x222   :  { %1767 = vmatprep.mubr.f32.mxu1 %v3234_v11  ;;  %v2223_v11 = vld [vmem:[%s5088_s5 + $0x130] sm:$0xff] }
 0x223   :  { %v3127_v18 = vpack.c.bf16 %v2224_v15, %v2223_v11  ;;  %v4274_v10 = vadd.s32 128, %v4263_v62  ;;  %vm1951_vm13 = vcmp.ge.s32.totalorder %v4263_v62, %v4266_v53  ;;  %vm2023_vm14 = vcmp.lt.s32.totalorder %v4263_v62, %v4277_v1 }
 0x224   :  { %3108 = vmatpush1.bf16.msra.mxu1 %v3107_v38  ;;  %vm2077_vm0 = vmand %vm1951_vm13, %vm2023_vm14  ;;  %vm1954_vm3 = vcmp.ge.s32.totalorder %v4263_v62, %v4279_v3  ;;  %vm2026_vm4 = vcmp.lt.s32.totalorder %v4263_v62, %v4289_v56  ;;  %v4321_v4 = vadd.s32 256, %v4263_v62  ;;  %v4415_v11 = vmul.u32 10, %v2719_v23 }
 0x225   :  { %3109 = vmatprep.subr.bf16.mxu1 %v3235_v27  ;;  %2749 = vmatmul.mubr.msk.f32.gmra.mrb[30].mxu1 %vm560_vm9, %v4055_v41  ;;  %v292_v41 = vadd.s32 16, %v3304_v8  ;;  %vm1952_vm11 = vcmp.ge.s32.totalorder %v4274_v10, %v4266_v53  ;;  %vm2024_vm12 = vcmp.lt.s32.totalorder %v4274_v10, %v4277_v1  ;;  %vm1955_vm1 = vcmp.ge.s32.totalorder %v4274_v10, %v4279_v3  ;;  %vm2080_vm8 = vmand %vm1954_vm3, %vm2026_vm4 }
 0x226   :  { %3128 = vmatprep.subr.bf16.mxu0 %v3127_v18  ;;  %vm2078_vm15 = vmand %vm1952_vm11, %vm2024_vm12  ;;  %vm2027_vm2 = vcmp.lt.s32.totalorder %v4274_v10, %v4289_v56  ;;  %vm1961_vm12 = vcmp.ge.s32.totalorder %v4274_v10, %v4298_v17  ;;  %vm2033_vm13 = vcmp.lt.s32.totalorder %v4274_v10, %v4316_v37  ;;  %vm1956_vm14 = vcmp.ge.s32.totalorder %v4321_v4, %v4279_v3 }
 0x227   :  { %3130 = vmatpush3.bf16.msra.mxu0 %v3127_v18  ;;  %v4281_v13 = vmul.u32 10, %v292_v41  ;;  %vm2081_vm7 = vmand %vm1955_vm1, %vm2027_vm2  ;;  %vm1953_vm1 = vcmp.ge.s32.totalorder %v4321_v4, %v4266_v53  ;;  %vm2025_vm2 = vcmp.lt.s32.totalorder %v4321_v4, %v4277_v1  ;;  %vm1960_vm3 = vcmp.ge.s32.totalorder %v4263_v62, %v4298_v17 }
 0x228   :  { %3111 = vmatpush1.bf16.msra.mxu1 %v3110_v46  ;;  %3132 = vmatprep.subr.bf16.mxu0 %v3131_v34  ;;  %vm4352_vm4 = vmand %vm1961_vm12, %vm2033_vm13  ;;  %v300_v46 = vadd.s32 80, %v3304_v8  ;;  %v2720_v15 = vadd.s32 4294967260, %v298_v52  ;;  %v4488_v14 = vadd.s32 10, %v4415_v11 }
 0x229   :  { %3112 = vmatprep.subr.bf16.mxu1 %v3235_v27  ;;  %v4296_v55 = vadd.s32 10, %v4281_v13  ;;  %vm1958_vm5 = vcmp.ge.s32.totalorder %v4274_v10, %v4281_v13  ;;  %vm1957_vm10 = vcmp.ge.s32.totalorder %v4263_v62, %v4281_v13  ;;  %vm1959_vm12 = vcmp.ge.s32.totalorder %v4321_v4, %v4281_v13 }
 0x22a   :  { %v2722_v53 = vadd.s32 4294967224, %v300_v46  ;;  %v4490_v1 = vmul.u32 10, %v2720_v15 }
 0x22b   :  { %3134 = vmatpush3.bf16.msra.mxu0 %v3131_v34  ;;  %vm2030_vm6 = vcmp.lt.s32.totalorder %v4274_v10, %v4296_v55  ;;  %vm2029_vm11 = vcmp.lt.s32.totalorder %v4263_v62, %v4296_v55 }
 0x22c   :  { %3114 = vmatpush1.bf16.msra.mxu1 %v3113_v6  ;;  %3136 = vmatprep.subr.bf16.mxu0 %v3135_v31  ;;  %vm2084_vm9 = vmand %vm1958_vm5, %vm2030_vm6  ;;  %vm2032_vm5 = vcmp.lt.s32.totalorder %v4263_v62, %v4316_v37  ;;  %vm1964_vm6 = vcmp.ge.s32.totalorder %v4274_v10, %v4318_v48  ;;  %v4413_v6 = vadd.s32 10, %v4358_v59  ;;  %v4548_v51 = vmul.u32 10, %v2722_v53 }
 0x22d   :  { %vm4389_vm13 = vmand %vm1960_vm3, %vm2032_vm5  ;;  %v2727_v53 = vadd.s32 4294967188, %v306_v33 }
 0x22f   :  { %3138 = vmatpush3.bf16.msra.mxu0 %v3135_v31 }
 0x230   :  { %3006 = vmatprep.subr.mxu0 %v2229_v42 }
 0x233   :  { %3007 = vmatpush3.msra.mxu0 %v2229_v42 }
 0x234   :  { %3139 = vmatprep.subr.bf16.mxu0 %v3235_v27 }
 0x2bc   :  { %v1667_v28 = vpop.f32.mrb[18].mxu0  ;;  %v1679_v25 = vpop.f32.mrb[0].mxu1 }
 0x2bd   :  { %v1669_v5 = vpop.f32.mrb[19].mxu0  ;;  %v1681_v12 = vpop.f32.mrb[1].mxu1 }
 0x2be   :  { %2769 = vmatprep.mubr.msk.f32.mxu1 %vm2078_vm15, %v1669_v5  ;;  %vm2083_vm15 = vmand %vm1957_vm10, %vm2029_vm11  ;;  %vm2034_vm11 = vcmp.lt.s32.totalorder %v4321_v4, %v4316_v37  ;;  %vm1966_vm10 = vcmp.ge.s32.totalorder %v4263_v62, %v4338_v61  ;;  %v4566_v37 = vadd.s32 10, %v4490_v1 }
 0x2bf   :  { %2770 = vmatmul.mubr.msk.f32.vlgmr.msra.gmra.mrb[32].mxu1 %vm2077_vm0, %v1667_v28  ;;  %vm2028_vm0 = vcmp.lt.s32.totalorder %v4321_v4, %v4289_v56 }
 0x2c0   :  { %v1673_v47 = vpop.f32.mrb[20].mxu0  ;;  %v1685_v50 = vpop.f32.mrb[2].mxu1  ;;  %vm4423_vm5 = vmand %vm1956_vm14, %vm2028_vm0  ;;  %vm2040_vm0 = vcmp.lt.s32.totalorder %v4321_v4, %v4366_v44 }
 0x2c1   :  { %v1675_v54 = vpop.f32.mrb[21].mxu0  ;;  %v1687_v30 = vpop.f32.mrb[3].mxu1 }
 0x2c2   :  { %2771 = vmatprep.mubr.msk.f32.mxu1 %vm2081_vm7, %v1675_v54  ;;  %vm2036_vm7 = vcmp.lt.s32.totalorder %v4274_v10, %v4336_v57  ;;  %v2724_v54 = vadd.s32 4294967224, %v302_v0 }
 0x2c3   :  { %2772 = vmatmul.mubr.msk.f32.gmra.mrb[34].mxu1 %vm2080_vm8, %v1673_v47  ;;  %vm4369_vm8 = vmand %vm1953_vm1, %vm2025_vm2  ;;  %vm1963_vm1 = vcmp.ge.s32.totalorder %v4263_v62, %v4318_v48  ;;  %vm2035_vm2 = vcmp.lt.s32.totalorder %v4263_v62, %v4336_v57 }
 0x2c4   :  { %v4342_v35 = vpop.f32.mrb[4].mxu1  ;;  %2773 = vmatprep.mubr.msk.f32.mxu1 %vm2084_vm9, %v1681_v12  ;;  %vm2230_vm9 = vcmask 850944   ;;  %vm4406_vm3 = vmand %vm1964_vm6, %vm2036_vm7  ;;  %vm2039_vm6 = vcmp.lt.s32.totalorder %v4274_v10, %v4366_v44  ;;  %vm2037_vm7 = vcmp.lt.s32.totalorder %v4321_v4, %v4336_v57  ;;  %v483_v57 = vsub.s32 %v3420_v40, %v465_v7 }
 0x2c5   :  { %v1693_v26 = vpop.f32.mrb[5].mxu1  ;;  %v4627_v40 = vadd.s32 10, %v4548_v51 }
 0x2c7   :  { %2774 = vmatmul.mubr.msk.f32.gmra.mrb[36].mxu1 %vm2083_vm15, %v1679_v25  ;;  %vm2031_vm15 = vcmp.lt.s32.totalorder %v4321_v4, %v4296_v55  ;;  %v4817_v25 = vmul.u32 10, %v2727_v53 }
 0x2c8   :  { %v4379_v20 = vpop.f32.mrb[6].mxu1  ;;  %2775 = vmatprep.mubr.msk.f32.mxu1 %vm4352_vm4, %v1687_v30  ;;  %vm1967_vm4 = vcmp.ge.s32.totalorder %v4274_v10, %v4338_v61  ;;  %vm4441_vm14 = vmand %vm1959_vm12, %vm2031_vm15 }
 0x2c9   :  { %v1699_v43 = vpop.f32.mrb[7].mxu1  ;;  %vm4464_vm12 = vmand %vm1963_vm1, %vm2035_vm2  ;;  %vm2042_vm1 = vcmp.lt.s32.totalorder %v4274_v10, %v4413_v6  ;;  %vm5129_vm2 = vcmp.ge.s32.totalorder %v4321_v4, %v4298_v17  ;;  %v2723_v17 = vadd.s32 4294967224, %v301_v22 }
 0x2ca   :  { %v2957_v18 = vpop.f32.mrb[22].mxu0  ;;  %vm4481_vm15 = vmand %vm1967_vm4, %vm2039_vm6  ;;  %vm1969_vm4 = vcmp.ge.s32.totalorder %v4263_v62, %v4358_v59 }
 0x2cb   :  { %v1840_v34 = vpop.f32.mrb[23].mxu0  ;;  %2776 = vmatmul.mubr.msk.f32.gmra.mrb[38].mxu1 %vm4389_vm13, %v1685_v50  ;;  %vm2038_vm13 = vcmp.lt.s32.totalorder %v4263_v62, %v4366_v44  ;;  %v2136_v29 = vsel %vm4423_vm5, %v2957_v18, 0.0  ;;  %vm1971_vm5 = vcmp.ge.s32.totalorder %v4321_v4, %v4358_v59  ;;  %v4583_v50 = vadd.s32 10, %v4507_v39 }
 0x2cc   :  { %v2133_v31 = vsel %vm4369_vm8, %v1840_v34, 0.0  ;;  %v4454_v42 = vpop.f32.mrb[8].mxu1  ;;  %2777 = vmatprep.mubr.msk.f32.mxu1 %vm4406_vm3, %v1693_v26  ;;  %vm1970_vm8 = vcmp.ge.s32.totalorder %v4274_v10, %v4358_v59  ;;  %vm4498_vm3 = vmand %vm5129_vm2, %vm2034_vm11  ;;  %vm5132_vm11 = vcmp.ge.s32.totalorder %v4321_v4, %v4318_v48  ;;  %vm2043_vm2 = vcmp.lt.s32.totalorder %v4321_v4, %v4413_v6 }
 0x2cd   :  { %3008 = vmatprep.mubr.msk.f32.mxu0 %vm2230_vm9, %v2133_v31  ;;  %v1705_v41 = vpop.f32.mrb[9].mxu1  ;;  %vm4519_vm6 = vmand %vm5132_vm11, %vm2037_vm7  ;;  %v304_v48 = vadd.s32 112, %v3304_v8  ;;  %vm2044_vm11 = vcmp.lt.s32.totalorder %v4263_v62, %v4488_v14  ;;  %v4602_v60 = vmul.u32 10, %v2723_v17  ;;  %v307_v18 = vadd.s32 136, %v3304_v8 }
 0x2ce   :  { %v2960_v3 = vpop.f32.mrb[24].mxu0  ;;  %3009 = vmatmul.mubr.msk.f32.vlgmr.msra.gmra.mrb[40].mxu0 %vm2230_vm9, %v2136_v29  ;;  %vm4540_vm7 = vmand %vm1966_vm10, %vm2038_vm13  ;;  %vm2046_vm13 = vcmp.lt.s32.totalorder %v4321_v4, %v4488_v14 }
 0x2cf   :  { %v1850_v56 = vpop.f32.mrb[25].mxu0  ;;  %2778 = vmatmul.mubr.msk.f32.gmra.mrb[40].mxu1 %vm4464_vm12, %v4342_v35  ;;  %vm2041_vm12 = vcmp.lt.s32.totalorder %v4263_v62, %v4413_v6  ;;  %v2142_v5 = vsel %vm4498_vm3, %v2960_v3, 0.0  ;;  %vm4559_vm10 = vmand %vm1970_vm8, %vm2042_vm1  ;;  %vm2045_vm8 = vcmp.lt.s32.totalorder %v4274_v10, %v4488_v14  ;;  %vm1972_vm1 = vcmp.ge.s32.totalorder %v4263_v62, %v4415_v11 }
 0x2d0   :  { %v2139_v58 = vsel %vm4441_vm14, %v1850_v56, 0.0  ;;  %v4530_v28 = vpop.f32.mrb[10].mxu1  ;;  %2779 = vmatprep.mubr.msk.f32.mxu1 %vm4481_vm15, %v1699_v43  ;;  %vm1973_vm14 = vcmp.ge.s32.totalorder %v4274_v10, %v4415_v11  ;;  %vm5139_vm15 = vcmp.ge.s32.totalorder %v4321_v4, %v4338_v61  ;;  %v305_v61 = vadd.s32 120, %v3304_v8 }
 0x2d1   :  { %3011 = vmatprep.mubr.msk.f32.mxu0 %vm2230_vm9, %v2139_v58  ;;  %v1711_v12 = vpop.f32.mrb[11].mxu1  ;;  %vm4575_vm3 = vmand %vm5139_vm15, %vm2040_vm0  ;;  %v2725_v44 = vadd.s32 4294967188, %v304_v48  ;;  %v4678_v2 = vadd.s32 10, %v4602_v60  ;;  %v4680_v6 = vmul.u32 10, %v483_v57  ;;  %v2728_v3 = vadd.s32 4294967188, %v307_v18 }
 0x2d2   :  { %v2963_v16 = vpop.f32.mrb[26].mxu0  ;;  %3012 = vmatmul.mubr.msk.f32.gmra.mrb[42].mxu0 %vm2230_vm9, %v2142_v5  ;;  %vm4596_vm0 = vmand %vm1971_vm5, %vm2043_vm2  ;;  %vm1980_vm2 = vcmp.ge.s32.totalorder %v4321_v4, %v4507_v39  ;;  %v2726_v15 = vadd.s32 4294967188, %v305_v61  ;;  %v4892_v57 = vadd.s32 10, %v4817_v25 }
 0x2d3   :  { %v1860_v30 = vpop.f32.mrb[27].mxu0  ;;  %2780 = vmatmul.mubr.msk.f32.gmra.mrb[42].mxu1 %vm4540_vm7, %v4379_v20  ;;  %vm4618_vm5 = vmand %vm1969_vm4, %vm2041_vm12  ;;  %v2148_v23 = vsel %vm4575_vm3, %v2963_v16, 0.0  ;;  %vm2049_vm7 = vcmp.lt.s32.totalorder %v4321_v4, %v4566_v37  ;;  %vm1976_vm12 = vcmp.ge.s32.totalorder %v4274_v10, %v4490_v1  ;;  %vm2048_vm3 = vcmp.lt.s32.totalorder %v4274_v10, %v4566_v37 }
 0x2d4   :  { %v2145_v35 = vsel %vm4519_vm6, %v1860_v30, 0.0  ;;  %v4608_v26 = vpop.f32.mrb[12].mxu1  ;;  %2781 = vmatprep.mubr.msk.f32.mxu1 %vm4559_vm10, %v1705_v41  ;;  %vm1977_vm6 = vcmp.ge.s32.totalorder %v4321_v4, %v4490_v1  ;;  %vm4638_vm4 = vmand %vm1973_vm14, %vm2045_vm8  ;;  %vm5148_vm10 = vcmp.ge.s32.totalorder %v4321_v4, %v4415_v11  ;;  %vm2052_vm14 = vcmp.lt.s32.totalorder %v4321_v4, %v4583_v50 }
 0x2d5   :  { %3014 = vmatprep.mubr.msk.f32.mxu0 %vm2230_vm9, %v2145_v35  ;;  %v1717_v52 = vpop.f32.mrb[13].mxu1  ;;  %vm4652_vm15 = vmand %vm5148_vm10, %vm2046_vm13  ;;  %v4661_v20 = vmul.u32 10, %v2724_v54  ;;  %v4722_v22 = vmul.u32 10, %v2725_v44  ;;  %vm2051_vm10 = vcmp.lt.s32.totalorder %v4274_v10, %v4583_v50  ;;  %v4758_v63 = vadd.s32 10, %v4680_v6 }
 0x2d6   :  { %v2966_v45 = vpop.f32.mrb[28].mxu0  ;;  %3015 = vmatmul.mubr.msk.f32.gmra.mrb[44].mxu0 %vm2230_vm9, %v2148_v23  ;;  %vm4673_vm13 = vmand %vm1972_vm1, %vm2044_vm11  ;;  %vm1986_vm1 = vcmp.ge.s32.totalorder %v4321_v4, %v4602_v60  ;;  %vm2055_vm11 = vcmp.lt.s32.totalorder %v4321_v4, %v4627_v40  ;;  %v4760_v14 = vmul.u32 10, %v2726_v15 }
 0x2d7   :  { %v1870_v46 = vpop.f32.mrb[29].mxu0  ;;  %2782 = vmatmul.mubr.msk.f32.gmra.mrb[44].mxu1 %vm4618_vm5, %v4454_v42  ;;  %vm4695_vm8 = vmand %vm1977_vm6, %vm2049_vm7  ;;  %v2154_v8 = vsel %vm4652_vm15, %v2966_v45, 0.0  ;;  %vm1975_vm6 = vcmp.ge.s32.totalorder %v4263_v62, %v4490_v1  ;;  %v4740_v36 = vadd.s32 10, %v4661_v20  ;;  %v4800_v7 = vadd.s32 10, %v4722_v22 }
 0x2d8   :  { %v2151_v19 = vsel %vm4596_vm0, %v1870_v46, 0.0  ;;  %v4685_v32 = vpop.f32.mrb[14].mxu1  ;;  %2783 = vmatprep.mubr.msk.f32.mxu1 %vm4638_vm4, %v1711_v12  ;;  %vm1983_vm0 = vcmp.ge.s32.totalorder %v4321_v4, %v4548_v51  ;;  %vm4714_vm5 = vmand %vm1976_vm12, %vm2048_vm3  ;;  %vm2047_vm4 = vcmp.lt.s32.totalorder %v4263_v62, %v4566_v37  ;;  %vm1979_vm12 = vcmp.ge.s32.totalorder %v4274_v10, %v4507_v39 }
 0x2d9   :  { %3017 = vmatprep.mubr.msk.f32.mxu0 %vm2230_vm9, %v2151_v19  ;;  %v1723_v34 = vpop.f32.mrb[15].mxu1  ;;  %vm4730_vm7 = vmand %vm1980_vm2, %vm2052_vm14  ;;  %vm2058_vm2 = vcmp.lt.s32.totalorder %v4321_v4, %v4678_v2  ;;  %vm1978_vm3 = vcmp.ge.s32.totalorder %v4263_v62, %v4507_v39  ;;  %v4837_v9 = vadd.s32 10, %v4760_v14  ;;  %v4839_v37 = vmul.u32 10, %v2728_v3 }
 0x2da   :  { %v2969_v31 = vpop.f32.mrb[30].mxu0  ;;  %3018 = vmatmul.mubr.msk.f32.gmra.mrb[46].mxu0 %vm2230_vm9, %v2154_v8  ;;  %vm4753_vm15 = vmand %vm1983_vm0, %vm2055_vm11  ;;  %vm1982_vm0 = vcmp.ge.s32.totalorder %v4274_v10, %v4548_v51  ;;  %vm2054_vm11 = vcmp.lt.s32.totalorder %v4274_v10, %v4627_v40 }
 0x2db   :  { %v1880_v29 = vpop.f32.mrb[31].mxu0  ;;  %2784 = vmatmul.mubr.msk.f32.gmra.mrb[46].mxu1 %vm4673_vm13, %v4530_v28  ;;  %vm4774_vm14 = vmand %vm1975_vm6, %vm2047_vm4  ;;  %vm2050_vm13 = vcmp.lt.s32.totalorder %v4263_v62, %v4583_v50  ;;  %v2160_v55 = vsel %vm4730_vm7, %v2969_v31, 0.0  ;;  %vm1989_vm6 = vcmp.ge.s32.totalorder %v4321_v4, %v4661_v20  ;;  %vm2061_vm4 = vcmp.lt.s32.totalorder %v4321_v4, %v4740_v36 }
 0x2dc   :  { %v2157_v13 = vsel %vm4695_vm8, %v1880_v29, 0.0  ;;  %v4764_v0 = vpop.f32.mrb[16].mxu1  ;;  %2785 = vmatprep.mubr.msk.f32.mxu1 %vm4714_vm5, %v1717_v52  ;;  %vm4791_vm8 = vmand %vm1979_vm12, %vm2051_vm10  ;;  %vm2064_vm7 = vcmp.lt.s32.totalorder %v4321_v4, %v4758_v63 }
 0x2dd   :  { %3020 = vmatprep.mubr.msk.f32.mxu0 %vm2230_vm9, %v2157_v13  ;;  %v1729_v17 = vpop.f32.mrb[17].mxu1  ;;  %vm4808_vm5 = vmand %vm1986_vm1, %vm2058_vm2  ;;  %vm1992_vm1 = vcmp.ge.s32.totalorder %v4321_v4, %v4680_v6  ;;  %vm1981_vm2 = vcmp.ge.s32.totalorder %v4263_v62, %v4548_v51 }
 0x2de   :  { %v2972_v58 = vpop.f32.mrb[32].mxu0  ;;  %3021 = vmatmul.mubr.msk.f32.gmra.mrb[48].mxu0 %vm2230_vm9, %v2160_v55  ;;  %vm4832_vm12 = vmand %vm1978_vm3, %vm2050_vm13  ;;  %vm1995_vm3 = vcmp.ge.s32.totalorder %v4321_v4, %v4722_v22  ;;  %vm2067_vm13 = vcmp.lt.s32.totalorder %v4321_v4, %v4800_v7 }
 0x2df   :  { %v1890_v5 = vpop.f32.mrb[33].mxu0  ;;  %2786 = vmatmul.mubr.msk.f32.gmra.mrb[48].mxu1 %vm4774_vm14, %v4608_v26  ;;  %vm4851_vm10 = vmand %vm1982_vm0, %vm2054_vm11  ;;  %v2166_v47 = vsel %vm4808_vm5, %v2972_v58, 0.0  ;;  %vm1985_vm0 = vcmp.ge.s32.totalorder %v4274_v10, %v4602_v60  ;;  %vm2057_vm11 = vcmp.lt.s32.totalorder %v4274_v10, %v4678_v2  ;;  %vm1998_vm5 = vcmp.ge.s32.totalorder %v4321_v4, %v4760_v14 }
 0x2e0   :  { %v2163_v48 = vsel %vm4753_vm15, %v1890_v5, 0.0  ;;  %v1733_v16 = vpop.f32.mrb[18].mxu1  ;;  %2787 = vmatprep.mubr.msk.f32.mxu1 %vm4791_vm8, %v1723_v34  ;;  %vm2053_vm15 = vcmp.lt.s32.totalorder %v4263_v62, %v4627_v40  ;;  %vm4868_vm14 = vmand %vm1989_vm6, %vm2061_vm4  ;;  %vm2070_vm6 = vcmp.lt.s32.totalorder %v4321_v4, %v4837_v9  ;;  %v4912_v26 = vadd.s32 10, %v4839_v37 }
 0x2e1   :  { %3023 = vmatprep.mubr.msk.f32.mxu0 %vm2230_vm9, %v2163_v48  ;;  %v1735_v50 = vpop.f32.mrb[19].mxu1  ;;  %vm4882_vm8 = vmand %vm1992_vm1, %vm2064_vm7  ;;  %vm1984_vm7 = vcmp.ge.s32.totalorder %v4263_v62, %v4602_v60 }
 0x2e2   :  { %v2975_v30 = vpop.f32.mrb[34].mxu0  ;;  %3024 = vmatmul.mubr.msk.f32.gmra.mrb[50].mxu0 %vm2230_vm9, %v2166_v47  ;;  %vm4907_vm4 = vmand %vm1981_vm2, %vm2053_vm15  ;;  %vm1988_vm2 = vcmp.ge.s32.totalorder %v4274_v10, %v4661_v20  ;;  %vm2060_vm15 = vcmp.lt.s32.totalorder %v4274_v10, %v4740_v36 }
 0x2e3   :  { %v1900_v61 = vpop.f32.mrb[35].mxu0  ;;  %2788 = vmatmul.mubr.msk.f32.gmra.mrb[50].mxu1 %vm4832_vm12, %v4685_v32  ;;  %vm4924_vm1 = vmand %vm1995_vm3, %vm2067_vm13  ;;  %vm2056_vm12 = vcmp.lt.s32.totalorder %v4263_v62, %v4678_v2  ;;  %v2172_v40 = vsel %vm4882_vm8, %v2975_v30, 0.0  ;;  %vm2001_vm3 = vcmp.ge.s32.totalorder %v4321_v4, %v4817_v25  ;;  %vm2073_vm13 = vcmp.lt.s32.totalorder %v4321_v4, %v4892_v57 }
 0x2e4   :  { %v2169_v24 = vsel %vm4868_vm14, %v1900_v61, 0.0  ;;  %v1739_v23 = vpop.f32.mrb[20].mxu1  ;;  %2789 = vmatprep.mubr.msk.f32.mxu1 %vm4851_vm10, %v1729_v17  ;;  %vm2111_vm10 = vmand %vm1985_vm0, %vm2057_vm11  ;;  %vm2004_vm8 = vcmp.ge.s32.totalorder %v4321_v4, %v4839_v37  ;;  %vm2076_vm0 = vcmp.lt.s32.totalorder %v4321_v4, %v4912_v26 }
 0x2e5   :  { %3026 = vmatprep.mubr.msk.f32.mxu0 %vm2230_vm9, %v2169_v24  ;;  %v1741_v52 = vpop.f32.mrb[21].mxu1  ;;  %vm4951_vm14 = vmand %vm1998_vm5, %vm2070_vm6 }
 0x2e6   :  { %v2978_v59 = vpop.f32.mrb[36].mxu0  ;;  %3027 = vmatmul.mubr.msk.f32.gmra.mrb[52].mxu0 %vm2230_vm9, %v2172_v40  ;;  %vm4973_vm11 = vmand %vm1984_vm7, %vm2056_vm12  ;;  %vm1991_vm12 = vcmp.ge.s32.totalorder %v4274_v10, %v4680_v6 }
 0x2e7   :  { %v1910_v45 = vpop.f32.mrb[37].mxu0  ;;  %2790 = vmatmul.mubr.msk.f32.gmra.mrb[52].mxu1 %vm4907_vm4, %v4764_v0  ;;  %vm4982_vm5 = vmand %vm1988_vm2, %vm2060_vm15  ;;  %v2178_v43 = vsel %vm4951_vm14, %v2978_v59, 0.0  ;;  %vm1987_vm4 = vcmp.ge.s32.totalorder %v4263_v62, %v4661_v20  ;;  %vm1990_vm14 = vcmp.ge.s32.totalorder %v4263_v62, %v4680_v6 }
 0x2e8   :  { %v2175_v33 = vsel %vm4924_vm1, %v1910_v45, 0.0  ;;  %v1745_v46 = vpop.f32.mrb[22].mxu1  ;;  %2791 = vmatprep.mubr.msk.f32.mxu1 %vm2111_vm10, %v1735_v50  ;;  %vm4989_vm6 = vmand %vm2001_vm3, %vm2073_vm13  ;;  %vm2059_vm1 = vcmp.lt.s32.totalorder %v4263_v62, %v4740_v36  ;;  %vm2063_vm10 = vcmp.lt.s32.totalorder %v4274_v10, %v4758_v63  ;;  %vm2062_vm3 = vcmp.lt.s32.totalorder %v4263_v62, %v4758_v63  ;;  %v5055_v36 = vld [vmem:[%s5089_s6] sm:$0xff] }
 0x2e9   :  { %3029 = vmatprep.mubr.msk.f32.mxu0 %vm2230_vm9, %v2175_v33  ;;  %v1747_v60 = vpop.f32.mrb[23].mxu1  ;;  %vm4997_vm7 = vmand %vm2004_vm8, %vm2076_vm0  ;;  %vm1994_vm13 = vcmp.ge.s32.totalorder %v4274_v10, %v4722_v22  ;;  %vm2066_vm8 = vcmp.lt.s32.totalorder %v4274_v10, %v4800_v7 }
 0x2ea   :  { %v2981_v15 = vpop.f32.mrb[38].mxu0  ;;  %3030 = vmatmul.mubr.msk.f32.gmra.mrb[54].mxu0 %vm2230_vm9, %v2178_v43  ;;  %vm2113_vm2 = vmand %vm1987_vm4, %vm2059_vm1  ;;  %vm2069_vm4 = vcmp.lt.s32.totalorder %v4274_v10, %v4837_v9 }
 0x2eb   :  { %v1920_v19 = vpop.f32.mrb[39].mxu0  ;;  %2792 = vmatmul.mubr.msk.f32.gmra.mrb[54].mxu1 %vm4973_vm11, %v1733_v16  ;;  %v2184_v11 = vsel %vm4997_vm7, %v2981_v15, 0.0  ;;  %vm2117_vm15 = vmand %vm1991_vm12, %vm2063_vm10  ;;  %vm1996_vm12 = vcmp.ge.s32.totalorder %v4263_v62, %v4760_v14  ;;  %vm2068_vm10 = vcmp.lt.s32.totalorder %v4263_v62, %v4837_v9 }
 0x2ec   :  { %v2181_v20 = vsel %vm4989_vm6, %v1920_v19, 0.0  ;;  %v1751_v32 = vpop.f32.mrb[24].mxu1  ;;  %2793 = vmatprep.mubr.msk.f32.mxu1 %vm4982_vm5, %v1741_v52  ;;  %vm2116_vm0 = vmand %vm1990_vm14, %vm2062_vm3  ;;  %vm1993_vm5 = vcmp.ge.s32.totalorder %v4263_v62, %v4722_v22  ;;  %vm2065_vm6 = vcmp.lt.s32.totalorder %v4263_v62, %v4800_v7 }
 0x2ed   :  { %3032 = vmatprep.mubr.msk.f32.mxu0 %vm2230_vm9, %v2181_v20  ;;  %v1753_v8 = vpop.f32.mrb[25].mxu1  ;;  %vm2120_vm11 = vmand %vm1994_vm13, %vm2066_vm8  ;;  %vm1999_vm13 = vcmp.ge.s32.totalorder %v4263_v62, %v4817_v25  ;;  %vm2071_vm8 = vcmp.lt.s32.totalorder %v4263_v62, %v4892_v57 }
 0x2ee   :  { %3033 = vmatmul.mubr.msk.f32.gmra.mrb[56].mxu0 %vm2230_vm9, %v2184_v11  ;;  %vm1997_vm9 = vcmp.ge.s32.totalorder %v4274_v10, %v4760_v14  ;;  %vm2119_vm1 = vmand %vm1993_vm5, %vm2065_vm6 }
 0x2ef   :  { %2794 = vmatmul.mubr.msk.f32.gmra.mrb[56].mxu1 %vm2113_vm2, %v1739_v23  ;;  %vm2123_vm7 = vmand %vm1997_vm9, %vm2069_vm4  ;;  %vm2000_vm2 = vcmp.ge.s32.totalorder %v4274_v10, %v4817_v25  ;;  %vm2002_vm9 = vcmp.ge.s32.totalorder %v4263_v62, %v4839_v37  ;;  %vm2074_vm4 = vcmp.lt.s32.totalorder %v4263_v62, %v4912_v26 }
 0x2f0   :  { %v1757_v34 = vpop.f32.mrb[26].mxu1  ;;  %2795 = vmatprep.mubr.msk.f32.mxu1 %vm2117_vm15, %v1747_v60  ;;  %vm2072_vm15 = vcmp.lt.s32.totalorder %v4274_v10, %v4892_v57  ;;  %vm2122_vm14 = vmand %vm1996_vm12, %vm2068_vm10  ;;  %vm2678_vm12 = vcmask 76800  }
 0x2f1   :  { %v1759_v21 = vpop.f32.mrb[27].mxu1  ;;  %vm2126_vm3 = vmand %vm2000_vm2, %vm2072_vm15 }
 0x2f2   :  { %vm2125_vm5 = vmand %vm1999_vm13, %vm2071_vm8 }
 0x2f3   :  { %2796 = vmatmul.mubr.msk.f32.gmra.mrb[58].mxu1 %vm2116_vm0, %v1745_v46  ;;  %vm2003_vm0 = vcmp.ge.s32.totalorder %v4274_v10, %v4839_v37 }
 0x2f4   :  { %v1763_v6 = vpop.f32.mrb[28].mxu1  ;;  %2797 = vmatprep.mubr.msk.f32.mxu1 %vm2120_vm11, %v1753_v8  ;;  %vm2075_vm11 = vcmp.lt.s32.totalorder %v4274_v10, %v4912_v26  ;;  %v2604_v10 = vcombine.high %v5055_v36, %v5055_v36 }
 0x2f5   :  { %v1765_v31 = vpop.f32.mrb[29].mxu1  ;;  %vm2129_vm6 = vmand %vm2003_vm0, %vm2075_vm11 }
 0x2f7   :  { %2798 = vmatmul.mubr.msk.f32.gmra.mrb[60].mxu1 %vm2119_vm1, %v1751_v32  ;;  %vm2128_vm1 = vmand %vm2002_vm9, %vm2074_vm4 }
 0x2f8   :  { %v1769_v22 = vpop.f32.mrb[30].mxu1  ;;  %2799 = vmatprep.mubr.msk.f32.mxu1 %vm2123_vm7, %v1759_v21  ;;  %vm2605_vm7 = vcmask 130048  }
 0x2f9   :  { %v1771_v42 = vpop.f32.mrb[31].mxu1  ;;  %2824 = vmatprep.mubr.msk.f32.mxu0 %vm2605_vm7, %v2604_v10 }
 0x2fb   :  { %2800 = vmatmul.mubr.msk.f32.gmra.mrb[62].mxu1 %vm2122_vm14, %v1757_v34 }
 0x2fc   :  { %2801 = vmatprep.mubr.msk.f32.mxu1 %vm2126_vm3, %v1765_v31 }
 0x2ff   :  { %2802 = vmatmul.mubr.msk.f32.gmra.mrb[64].mxu1 %vm2125_vm5, %v1763_v6 }
 0x300   :  { %2803 = vmatprep.mubr.msk.f32.mxu1 %vm2129_vm6, %v1771_v42 }
 0x303   :  { %2804 = vmatmul.mubr.msk.f32.gmra.mrb[66].mxu1 %vm2128_vm1, %v1769_v22 }
 0x392   :  { %v2351_v53 = vpop.f32.mrb[32].mxu1 }
 0x393   :  { %v2353_v29 = vpop.f32.mrb[33].mxu1 }
 0x396   :  { %v2356_v41 = vpop.f32.mrb[34].mxu1 }
 0x397   :  { %v2358_v63 = vpop.f32.mrb[35].mxu1 }
 0x39a   :  { %v2361_v14 = vpop.f32.mrb[36].mxu1 }
 0x39b   :  { %v2363_v62 = vpop.f32.mrb[37].mxu1 }
 0x39e   :  { %v2366_v3 = vpop.f32.mrb[38].mxu1 }
 0x39f   :  { %v2368_v13 = vpop.f32.mrb[39].mxu1 }
 0x3a1   :  { %v3010_v0 = vpop.f32.mrb[40].mxu0 }
 0x3a2   :  { %v2512_v56 = vadd.f32 %v3010_v0, %v2356_v41  ;;  %v2506_v55 = vpop.f32.mrb[41].mxu0  ;;  %v2371_v17 = vpop.f32.mrb[40].mxu1 }
 0x3a3   :  { %v2507_v1 = vadd.f32 %v2506_v55, %v2351_v53  ;;  %v2373_v7 = vpop.f32.mrb[41].mxu1 }
 0x3a5   :  { %v3140_v58 = vpack.c.bf16 %v2512_v56, %v2507_v1  ;;  %v3013_v28 = vpop.f32.mrb[42].mxu0 }
 0x3a6   :  { %v2522_v25 = vadd.f32 %v3013_v28, %v2366_v3  ;;  %v2516_v5 = vpop.f32.mrb[43].mxu0  ;;  %v2376_v12 = vpop.f32.mrb[42].mxu1 }
 0x3a7   :  { %v2517_v9 = vadd.f32 %v2516_v5, %v2361_v14  ;;  %3141 = vmatpush1.bf16.msra.mxu0 %v3140_v58  ;;  %v2378_v37 = vpop.f32.mrb[43].mxu1 }
 0x3a8   :  { %3142 = vmatprep.subr.bf16.mxu0 %v3235_v27 }
 0x3a9   :  { %v3143_v48 = vpack.c.bf16 %v2522_v25, %v2517_v9  ;;  %v3016_v16 = vpop.f32.mrb[44].mxu0  ;;  %v2823_v9 = vld [vmem:[%s5090_s7] ss:$0 sm:$0xff] }
 0x3aa   :  { %v2532_v39 = vadd.f32 %v3016_v16, %v2376_v12  ;;  %v2526_v47 = vpop.f32.mrb[45].mxu0  ;;  %v2381_v50 = vpop.f32.mrb[44].mxu1 }
 0x3ab   :  { %v2527_v54 = vadd.f32 %v2526_v47, %v2371_v17  ;;  %3144 = vmatpush1.bf16.msra.mxu0 %v3143_v48  ;;  %v2383_v30 = vpop.f32.mrb[45].mxu1 }
 0x3ac   :  { %3145 = vmatprep.subr.bf16.mxu0 %v3235_v27 }
 0x3ad   :  { %v3146_v49 = vpack.c.bf16 %v2532_v39, %v2527_v54  ;;  %v3019_v57 = vpop.f32.mrb[46].mxu0 }
 0x3ae   :  { %v2536_v61 = vpop.f32.mrb[47].mxu0  ;;  %v2386_v35 = vpop.f32.mrb[46].mxu1 }
 0x3af   :  { %v2537_v26 = vadd.f32 %v2536_v61, %v2381_v50  ;;  %v2542_v24 = vadd.f32 %v3019_v57, %v2386_v35  ;;  %3147 = vmatpush1.bf16.msra.mxu0 %v3146_v49  ;;  %v2388_v23 = vpop.f32.mrb[47].mxu1 }
 0x3b0   :  { %3148 = vmatprep.subr.bf16.mxu0 %v3235_v27 }
 0x3b1   :  { %v3149_v51 = vpack.c.bf16 %v2542_v24, %v2537_v26  ;;  %v3022_v40 = vpop.f32.mrb[48].mxu0 }
 0x3b2   :  { %v2546_v52 = vpop.f32.mrb[49].mxu0  ;;  %v2391_v59 = vpop.f32.mrb[48].mxu1 }
 0x3b3   :  { %v2547_v44 = vadd.f32 %v2546_v52, %v2391_v59  ;;  %v2393_v45 = vpop.f32.mrb[49].mxu1  ;;  %3150 = vmatpush1.bf16.msra.mxu0 %v3149_v51 }
 0x3b4   :  { %3151 = vmatprep.subr.bf16.mxu0 %v3235_v27 }
 0x3b5   :  { %v3025_v38 = vpop.f32.mrb[50].mxu0 }
 0x3b6   :  { %v2556_v33 = vpop.f32.mrb[51].mxu0  ;;  %v2396_v46 = vpop.f32.mrb[50].mxu1 }
 0x3b7   :  { %v2552_v4 = vadd.f32 %v3022_v40, %v2396_v46  ;;  %v2398_v43 = vpop.f32.mrb[51].mxu1 }
 0x3b9   :  { %v3152_v60 = vpack.c.bf16 %v2552_v4, %v2547_v44  ;;  %v3028_v2 = vpop.f32.mrb[52].mxu0 }
 0x3ba   :  { %v2566_v15 = vpop.f32.mrb[53].mxu0  ;;  %v2401_v18 = vpop.f32.mrb[52].mxu1 }
 0x3bb   :  { %v2557_v19 = vadd.f32 %v2556_v33, %v2401_v18  ;;  %v2403_v20 = vpop.f32.mrb[53].mxu1  ;;  %3153 = vmatpush1.bf16.msra.mxu0 %v3152_v60 }
 0x3bc   :  { %3154 = vmatprep.subr.bf16.mxu0 %v3235_v27 }
 0x3bd   :  { %v3031_v32 = vpop.f32.mrb[54].mxu0 }
 0x3be   :  { %v2576_v11 = vpop.f32.mrb[55].mxu0  ;;  %v2406_v8 = vpop.f32.mrb[54].mxu1 }
 0x3bf   :  { %v2562_v34 = vadd.f32 %v3025_v38, %v2406_v8  ;;  %v2408_v21 = vpop.f32.mrb[55].mxu1 }
 0x3c1   :  { %v3155_v6 = vpack.c.bf16 %v2562_v34, %v2557_v19  ;;  %v3034_v31 = vpop.f32.mrb[56].mxu0 }
 0x3c2   :  { %v2586_v22 = vpop.f32.mrb[57].mxu0  ;;  %v2411_v42 = vpop.f32.mrb[56].mxu1 }
 0x3c3   :  { %v2567_v10 = vadd.f32 %v2566_v15, %v2411_v42  ;;  %v2413_v53 = vpop.f32.mrb[57].mxu1  ;;  %3156 = vmatpush1.bf16.msra.mxu0 %v3155_v6 }
 0x3c4   :  { %3157 = vmatprep.subr.bf16.mxu0 %v3235_v27 }
 0x3c6   :  { %v2416_v29 = vpop.f32.mrb[58].mxu1 }
 0x3c7   :  { %v2572_v41 = vadd.f32 %v3028_v2, %v2416_v29  ;;  %v2418_v63 = vpop.f32.mrb[59].mxu1 }
 0x3c9   :  { %v3158_v14 = vpack.c.bf16 %v2572_v41, %v2567_v10 }
 0x3ca   :  { %v2421_v62 = vpop.f32.mrb[60].mxu1 }
 0x3cb   :  { %v2577_v3 = vadd.f32 %v2576_v11, %v2421_v62  ;;  %v2423_v13 = vpop.f32.mrb[61].mxu1  ;;  %3159 = vmatpush1.bf16.msra.mxu0 %v3158_v14 }
 0x3cc   :  { %3160 = vmatprep.subr.bf16.mxu0 %v3235_v27 }
 0x3ce   :  { %v2426_v0 = vpop.f32.mrb[62].mxu1 }
 0x3cf   :  { %v2582_v56 = vadd.f32 %v3031_v32, %v2426_v0  ;;  %v2428_v55 = vpop.f32.mrb[63].mxu1 }
 0x3d1   :  { %v3161_v17 = vpack.c.bf16 %v2582_v56, %v2577_v3 }
 0x3d2   :  { %v2431_v1 = vpop.f32.mrb[64].mxu1 }
 0x3d3   :  { %v2587_v7 = vadd.f32 %v2586_v22, %v2431_v1  ;;  %v2433_v58 = vpop.f32.mrb[65].mxu1  ;;  %3162 = vmatpush1.bf16.msra.mxu0 %v3161_v17 }
 0x3d4   :  { %3163 = vmatprep.subr.bf16.mxu0 %v3235_v27 }
 0x3d6   :  { %v2436_v28 = vpop.f32.mrb[66].mxu1 }
 0x3d7   :  { %v2592_v25 = vadd.f32 %v3034_v31, %v2436_v28  ;;  %v2438_v5 = vpop.f32.mrb[67].mxu1 }
 0x3d9   :  { %v3164_v12 = vpack.c.bf16 %v2592_v25, %v2587_v7 }
 0x3db   :  { %3165 = vmatpush1.bf16.msra.mxu0 %v3164_v12 }
 0x3de   :  { %2673 = vmatmul.mubr.f32.vlgmr.msra.gmra.mrb[58].mxu0 %v5055_v36 }
 0x4b1   :  { %v2674_v37 = vpop.f32.mrb[58].mxu0 }
 0x4b2   :  { %v2675_v48 = vadd.f32 %v2823_v9, %v2674_v37  ;;  %v2676_v16 = vpop.f32.mrb[59].mxu0 }
 0x4b4   :  { %2679 = vst.msk [vmem:[#allocation3] sm:$0xf] %vm2678_vm12, %v2675_v48 }
 0x4b5   :  { %3219 = shalt.err (!%p3216_p4)
}
 0x4b6   :  { %s3220_s28 = scalar_lea.hbm %s5092_s9, 64 }
 0x4b7   :  { %p3221_p5 = scmp.ne.s32.totalorder %s5092_s9, %s3220_s28  ;;  %p3224_p6 = scmp.lt.u32.totalorder %s3220_s28, %s5092_s9 }
 0x4b9   :  { %p3226_p7 = pnand %p3224_p6, %p3221_p5 }
 0x4bb   :  { %3229 = shalt.err (!%p3226_p7)
}
 0x4bc   :  { %2691 = dma.vmem_to_hbm [thread:$0]  %s2689_s24, 64, %s5092_s9, [#allocation4]  }
 0x4bd   :  { %3230 = dma.done.wait [#allocation4], 64  }
 0x4be   :  { %3231 = vsyncadd [#allocation4], 4294967232 }
 0x4bf   :  { %2697 = vsyncpa [#allocation4], 1 }

</bundles_post_ra>
